<compile_context>
chip_gen: v6e
topology: v6e:2x2x1
jax: 0.10.0
libtpu: 0.0.40
codegen_flags: <defaults>
</compile_context>

<pallas_src>
import jax
import jax.numpy as jnp
from jax.experimental import pallas as pl
from jax.experimental.pallas import tpu as pltpu


def _add3_kernel(x605_ref, x591_ref, x620_ref, o_ref):
    # x606 = x605 + x591 ; x621 = x620 + x606
    o_ref[...] = x620_ref[...] + (x605_ref[...] + x591_ref[...])


def add3(x605, x591, x620):
    """out = x620 + (x605 + x591); all inputs share one shape/dtype."""
    assert x605.shape == x591.shape == x620.shape
    assert x605.dtype == x591.dtype == x620.dtype

    shape = x605.shape
    dtype = x605.dtype
    total = 1
    for d in shape:
        total *= d
    nbytes = total * jnp.dtype(dtype).itemsize

    # Single full-array block: 3 inputs + 1 output resident in VMEM at once.
    # Guard against reuse on tensors that would blow the scoped VMEM budget
    # (16 MiB on v5e, 32 MiB on v6e/v7x); larger shapes need a tiled variant.
    assert 4 * nbytes <= 8 * 1024 * 1024, (
        "add3: tensor too large for the single-block kernel; add a tiled path"
    )

    # Native layout, whole array as one block, explicit VMEM residency.
    spec = pl.BlockSpec(memory_space=pltpu.VMEM)

    return pl.pallas_call(
        _add3_kernel,
        out_shape=jax.ShapeDtypeStruct(shape, dtype),
        grid=(),
        in_specs=[spec, spec, spec],
        out_specs=spec,
        # Alias x620 (input index 2) as the output buffer.
        input_output_aliases={2: 0},
        # Tiny op: 2 adds/elem, 3 reads + 1 write per element.
        cost_estimate=pl.CostEstimate(
            flops=2 * total, transcendentals=0, bytes_accessed=4 * nbytes
        ),
    )(x605, x591, x620)


if __name__ == "__main__":
    key = jax.random.PRNGKey(0)
    k1, k2, k3 = jax.random.split(key, 3)

    shape = (1, 344, 7, 7)
    x591 = jax.random.normal(k1, shape, dtype=jnp.float32)
    x605 = jax.random.normal(k2, shape, dtype=jnp.float32)
    x620 = jax.random.normal(k3, shape, dtype=jnp.float32)

    # Reference computed first (the kernel may alias/reuse x620's buffer
    # when its input is donated under jit).
    ref = x620 + (x605 + x591)

    out = add3(x605, x591, x620)
    jax.block_until_ready(out)

    assert out.shape == shape
    assert out.dtype == jnp.float32
    assert jnp.allclose(out, ref, atol=1e-6), "mismatch vs reference"

    print("KERNEL_OK")
</pallas_src>

<mosaic_0001>
module attributes {stable_mosaic.version = 11 : i64} {
  func.func @_add3_kernel(%arg0: memref<1x344x7x7xf32, #tpu.memory_space<vmem>>, %arg1: memref<1x344x7x7xf32, #tpu.memory_space<vmem>>, %arg2: memref<1x344x7x7xf32, #tpu.memory_space<vmem>>, %arg3: memref<1x344x7x7xf32, #tpu.memory_space<vmem>>) attributes {dimension_semantics = [], scalar_prefetch = 0 : i64, scratch_operands = 0 : i64, tpu.core_type = #tpu.core_type<tc>} {
    %c0 = arith.constant 0 : index
    %c0_0 = arith.constant 0 : index
    %c0_1 = arith.constant 0 : index
    %c0_2 = arith.constant 0 : index
    %0 = vector.load %arg2[%c0, %c0_0, %c0_1, %c0_2] : memref<1x344x7x7xf32, #tpu.memory_space<vmem>>, vector<1x344x7x7xf32>
    %c0_3 = arith.constant 0 : index
    %c0_4 = arith.constant 0 : index
    %c0_5 = arith.constant 0 : index
    %c0_6 = arith.constant 0 : index
    %1 = vector.load %arg0[%c0_3, %c0_4, %c0_5, %c0_6] : memref<1x344x7x7xf32, #tpu.memory_space<vmem>>, vector<1x344x7x7xf32>
    %c0_7 = arith.constant 0 : index
    %c0_8 = arith.constant 0 : index
    %c0_9 = arith.constant 0 : index
    %c0_10 = arith.constant 0 : index
    %2 = vector.load %arg1[%c0_7, %c0_8, %c0_9, %c0_10] : memref<1x344x7x7xf32, #tpu.memory_space<vmem>>, vector<1x344x7x7xf32>
    %3 = arith.addf %1, %2 : vector<1x344x7x7xf32>
    %4 = arith.addf %0, %3 : vector<1x344x7x7xf32>
    %c0_11 = arith.constant 0 : index
    %c0_12 = arith.constant 0 : index
    %c0_13 = arith.constant 0 : index
    %c0_14 = arith.constant 0 : index
    %5 = vector.load %arg3[%c0_11, %c0_12, %c0_13, %c0_14] : memref<1x344x7x7xf32, #tpu.memory_space<vmem>>, vector<1x344x7x7xf32>
    tpu.vector_store %arg3[%c0_11, %c0_12, %c0_13, %c0_14], %4 {strides = array<i32>} : memref<1x344x7x7xf32, #tpu.memory_space<vmem>>, vector<1x344x7x7xf32>,
    return
  }
}

</mosaic_0001>

<bundles_post_ra>
// kernel: tpu_custom_call.1
= control target key start
LH: loop header
LB: loop body
LE: loop exit
PB: predicated region body
PF: predicated region fallthrough
CT: control target
= control target key end

     0   :  { %vm1734_vm0 = vcmask 55296   ;;  %s6575_s0 = inlined_call_operand.vmem [shape: f32[1,344,7,7], index: 0, kind: input, shape index: {}]   ;;  %s6576_s1 = inlined_call_operand.vmem [shape: f32[1,344,7,7], index: 1, kind: input, shape index: {}]   ;;  %s6577_s2 = inlined_call_operand.vmem [shape: f32[1,344,7,7], index: 2, kind: input, shape index: {}, may-alias: {2,3}]   ;;  %s6578_s3 = inlined_call_operand.vmem [shape: f32[1,344,7,7], index: 3, kind: output, shape index: {}, may-alias: {2,3}]  }
   0x1   :  { %v14_v0 = vld [vmem:[%s6577_s2] sm:$0x7f]  ;;  %v15_v4 = vld [vmem:[%s6577_s2 + $0x8] sm:$0x7f]  ;;  %v16_v8 = vld [vmem:[%s6577_s2 + $0x10] sm:$0x7f] }
   0x2   :  { %v358_v1 = vld [vmem:[%s6575_s0] sm:$0x7f]  ;;  %v359_v5 = vld [vmem:[%s6575_s0 + $0x8] sm:$0x7f]  ;;  %v360_v9 = vld [vmem:[%s6575_s0 + $0x10] sm:$0x7f] }
   0x3   :  { %v702_v2 = vld [vmem:[%s6576_s1] sm:$0x7f]  ;;  %v703_v6 = vld [vmem:[%s6576_s1 + $0x8] sm:$0x7f]  ;;  %v704_v10 = vld [vmem:[%s6576_s1 + $0x10] sm:$0x7f] }
   0x4   :  { %v1046_v3 = vadd.f32 %v702_v2, %v358_v1  ;;  %v1047_v7 = vadd.f32 %v703_v6, %v359_v5  ;;  %v1048_v12 = vadd.f32 %v704_v10, %v360_v9  ;;  %v17_v13 = vld [vmem:[%s6577_s2 + $0x18] sm:$0x7f]  ;;  %v18_v18 = vld [vmem:[%s6577_s2 + $0x20] sm:$0x7f]  ;;  %v363_v24 = vld [vmem:[%s6575_s0 + $0x28] sm:$0x7f] }
   0x5   :  { %v361_v14 = vld [vmem:[%s6575_s0 + $0x18] sm:$0x7f]  ;;  %v362_v19 = vld [vmem:[%s6575_s0 + $0x20] sm:$0x7f]  ;;  %v707_v25 = vld [vmem:[%s6576_s1 + $0x28] sm:$0x7f] }
   0x6   :  { %v1390_v11 = vadd.f32 %v1046_v3, %v14_v0  ;;  %v705_v15 = vld [vmem:[%s6576_s1 + $0x18] sm:$0x7f]  ;;  %v1391_v16 = vadd.f32 %v1047_v7, %v15_v4  ;;  %v706_v20 = vld [vmem:[%s6576_s1 + $0x20] sm:$0x7f]  ;;  %v1392_v21 = vadd.f32 %v1048_v12, %v16_v8  ;;  %v1051_v27 = vadd.f32 %v707_v25, %v363_v24  ;;  %v364_v29 = vld [vmem:[%s6575_s0 + $0x30] sm:$0x7f] }
   0x7   :  { %v1049_v17 = vadd.f32 %v705_v15, %v361_v14  ;;  %v1050_v22 = vadd.f32 %v706_v20, %v362_v19  ;;  %v708_v30 = vld [vmem:[%s6576_s1 + $0x30] sm:$0x7f]  ;;  %v365_v34 = vld [vmem:[%s6575_s0 + $0x38] sm:$0x7f]  ;;  %v366_v39 = vld [vmem:[%s6575_s0 + $0x40] sm:$0x7f] }
   0x8   :  { %1735 = vst.msk [vmem:[%s6578_s3] sm:$0x7f] %vm1734_vm0, %v1390_v11  ;;  %v1052_v32 = vadd.f32 %v708_v30, %v364_v29  ;;  %v709_v35 = vld [vmem:[%s6576_s1 + $0x38] sm:$0x7f]  ;;  %v710_v40 = vld [vmem:[%s6576_s1 + $0x40] sm:$0x7f] }
   0x9   :  { %v1393_v26 = vadd.f32 %v1049_v17, %v17_v13  ;;  %v1394_v31 = vadd.f32 %v1050_v22, %v18_v18  ;;  %v1053_v37 = vadd.f32 %v709_v35, %v365_v34  ;;  %v1054_v42 = vadd.f32 %v710_v40, %v366_v39  ;;  %v367_v44 = vld [vmem:[%s6575_s0 + $0x48] sm:$0x7f]  ;;  %v368_v49 = vld [vmem:[%s6575_s0 + $0x50] sm:$0x7f]  ;;  %v369_v54 = vld [vmem:[%s6575_s0 + $0x58] sm:$0x7f] }
   0xa   :  { %v711_v45 = vld [vmem:[%s6576_s1 + $0x48] sm:$0x7f]  ;;  %v712_v50 = vld [vmem:[%s6576_s1 + $0x50] sm:$0x7f]  ;;  %v713_v55 = vld [vmem:[%s6576_s1 + $0x58] sm:$0x7f] }
   0xb   :  { %v1055_v47 = vadd.f32 %v711_v45, %v367_v44  ;;  %v1056_v52 = vadd.f32 %v712_v50, %v368_v49  ;;  %v1057_v57 = vadd.f32 %v713_v55, %v369_v54  ;;  %v370_v59 = vld [vmem:[%s6575_s0 + $0x60] sm:$0x7f]  ;;  %v371_v0 = vld [vmem:[%s6575_s0 + $0x68] sm:$0x7f]  ;;  %v372_v5 = vld [vmem:[%s6575_s0 + $0x70] sm:$0x7f] }
   0xc   :  { %v714_v60 = vld [vmem:[%s6576_s1 + $0x60] sm:$0x7f]  ;;  %v715_v1 = vld [vmem:[%s6576_s1 + $0x68] sm:$0x7f]  ;;  %v716_v6 = vld [vmem:[%s6576_s1 + $0x70] sm:$0x7f] }
   0xd   :  { %v1058_v62 = vadd.f32 %v714_v60, %v370_v59  ;;  %v1059_v3 = vadd.f32 %v715_v1, %v371_v0  ;;  %v1060_v8 = vadd.f32 %v716_v6, %v372_v5  ;;  %v373_v10 = vld [vmem:[%s6575_s0 + $0x78] sm:$0x7f]  ;;  %v374_v15 = vld [vmem:[%s6575_s0 + $0x80] sm:$0x7f]  ;;  %v375_v20 = vld [vmem:[%s6575_s0 + $0x88] sm:$0x7f] }
   0xe   :  { %v717_v11 = vld [vmem:[%s6576_s1 + $0x78] sm:$0x7f]  ;;  %v376_v25 = vld [vmem:[%s6575_s0 + $0x90] sm:$0x7f]  ;;  %v378_v35 = vld [vmem:[%s6575_s0 + $0xa0] sm:$0x7f] }
   0xf   :  { %v19_v23 = vld [vmem:[%s6577_s2 + $0x28] sm:$0x7f]  ;;  %v1061_v13 = vadd.f32 %v717_v11, %v373_v10  ;;  %v377_v30 = vld [vmem:[%s6575_s0 + $0x98] sm:$0x7f]  ;;  %v380_v45 = vld [vmem:[%s6575_s0 + $0xb0] sm:$0x7f] }
  0x10   :  { %1736 = vst.msk [vmem:[%s6578_s3 + $0x8] sm:$0x7f] %vm1734_vm0, %v1391_v16  ;;  %v1395_v36 = vadd.f32 %v1051_v27, %v19_v23  ;;  %v718_v16 = vld [vmem:[%s6576_s1 + $0x80] sm:$0x7f]  ;;  %v379_v40 = vld [vmem:[%s6575_s0 + $0xa8] sm:$0x7f] }
  0x11   :  { %v1062_v18 = vadd.f32 %v718_v16, %v374_v15  ;;  %v381_v50 = vld [vmem:[%s6575_s0 + $0xb8] sm:$0x7f]  ;;  %v382_v55 = vld [vmem:[%s6575_s0 + $0xc0] sm:$0x7f]  ;;  %v383_v60 = vld [vmem:[%s6575_s0 + $0xc8] sm:$0x7f] }
  0x12   :  { %v384_v1 = vld [vmem:[%s6575_s0 + $0xd0] sm:$0x7f]  ;;  %v385_v6 = vld [vmem:[%s6575_s0 + $0xd8] sm:$0x7f]  ;;  %v386_v11 = vld [vmem:[%s6575_s0 + $0xe0] sm:$0x7f] }
  0x13   :  { %v387_v16 = vld [vmem:[%s6575_s0 + $0xe8] sm:$0x7f] }
  0x17   :  { %v20_v28 = vld [vmem:[%s6577_s2 + $0x30] sm:$0x7f] }
  0x18   :  { %1737 = vst.msk [vmem:[%s6578_s3 + $0x10] sm:$0x7f] %vm1734_vm0, %v1392_v21  ;;  %v1396_v41 = vadd.f32 %v1052_v32, %v20_v28  ;;  %v719_v21 = vld [vmem:[%s6576_s1 + $0x88] sm:$0x7f] }
  0x19   :  { %v1063_v23 = vadd.f32 %v719_v21, %v375_v20  ;;  %v388_v21 = vld [vmem:[%s6575_s0 + $0xf0] sm:$0x7f] }
  0x1f   :  { %v21_v33 = vld [vmem:[%s6577_s2 + $0x38] sm:$0x7f] }
  0x20   :  { %1738 = vst.msk [vmem:[%s6578_s3 + $0x18] sm:$0x7f] %vm1734_vm0, %v1393_v26  ;;  %v1397_v46 = vadd.f32 %v1053_v37, %v21_v33  ;;  %v720_v26 = vld [vmem:[%s6576_s1 + $0x90] sm:$0x7f] }
  0x21   :  { %v1064_v28 = vadd.f32 %v720_v26, %v376_v25  ;;  %v389_v26 = vld [vmem:[%s6575_s0 + $0xf8] sm:$0x7f] }
  0x27   :  { %v22_v38 = vld [vmem:[%s6577_s2 + $0x40] sm:$0x7f] }
  0x28   :  { %1739 = vst.msk [vmem:[%s6578_s3 + $0x20] sm:$0x7f] %vm1734_vm0, %v1394_v31  ;;  %v1398_v51 = vadd.f32 %v1054_v42, %v22_v38  ;;  %v721_v31 = vld [vmem:[%s6576_s1 + $0x98] sm:$0x7f] }
  0x29   :  { %v1065_v33 = vadd.f32 %v721_v31, %v377_v30  ;;  %v390_v31 = vld [vmem:[%s6575_s0 + $0x100] sm:$0x7f] }
  0x2f   :  { %v23_v43 = vld [vmem:[%s6577_s2 + $0x48] sm:$0x7f] }
  0x30   :  { %1740 = vst.msk [vmem:[%s6578_s3 + $0x28] sm:$0x7f] %vm1734_vm0, %v1395_v36  ;;  %v1399_v56 = vadd.f32 %v1055_v47, %v23_v43  ;;  %v722_v36 = vld [vmem:[%s6576_s1 + $0xa0] sm:$0x7f] }
  0x31   :  { %v1066_v38 = vadd.f32 %v722_v36, %v378_v35  ;;  %v391_v36 = vld [vmem:[%s6575_s0 + $0x108] sm:$0x7f] }
  0x37   :  { %v24_v48 = vld [vmem:[%s6577_s2 + $0x50] sm:$0x7f] }
  0x38   :  { %1741 = vst.msk [vmem:[%s6578_s3 + $0x30] sm:$0x7f] %vm1734_vm0, %v1396_v41  ;;  %v1400_v61 = vadd.f32 %v1056_v52, %v24_v48  ;;  %v723_v41 = vld [vmem:[%s6576_s1 + $0xa8] sm:$0x7f] }
  0x39   :  { %v1067_v43 = vadd.f32 %v723_v41, %v379_v40  ;;  %v392_v41 = vld [vmem:[%s6575_s0 + $0x110] sm:$0x7f] }
  0x3f   :  { %v25_v53 = vld [vmem:[%s6577_s2 + $0x58] sm:$0x7f] }
  0x40   :  { %1742 = vst.msk [vmem:[%s6578_s3 + $0x38] sm:$0x7f] %vm1734_vm0, %v1397_v46  ;;  %v1401_v2 = vadd.f32 %v1057_v57, %v25_v53  ;;  %v724_v46 = vld [vmem:[%s6576_s1 + $0xb0] sm:$0x7f] }
  0x41   :  { %v1068_v48 = vadd.f32 %v724_v46, %v380_v45  ;;  %v393_v46 = vld [vmem:[%s6575_s0 + $0x118] sm:$0x7f] }
  0x47   :  { %v26_v58 = vld [vmem:[%s6577_s2 + $0x60] sm:$0x7f] }
  0x48   :  { %1743 = vst.msk [vmem:[%s6578_s3 + $0x40] sm:$0x7f] %vm1734_vm0, %v1398_v51  ;;  %v1402_v7 = vadd.f32 %v1058_v62, %v26_v58  ;;  %v725_v51 = vld [vmem:[%s6576_s1 + $0xb8] sm:$0x7f] }
  0x49   :  { %v1069_v53 = vadd.f32 %v725_v51, %v381_v50  ;;  %v394_v51 = vld [vmem:[%s6575_s0 + $0x120] sm:$0x7f] }
  0x4f   :  { %v27_v63 = vld [vmem:[%s6577_s2 + $0x68] sm:$0x7f] }
  0x50   :  { %1744 = vst.msk [vmem:[%s6578_s3 + $0x48] sm:$0x7f] %vm1734_vm0, %v1399_v56  ;;  %v1403_v12 = vadd.f32 %v1059_v3, %v27_v63  ;;  %v726_v56 = vld [vmem:[%s6576_s1 + $0xc0] sm:$0x7f] }
  0x51   :  { %v1070_v58 = vadd.f32 %v726_v56, %v382_v55  ;;  %v395_v56 = vld [vmem:[%s6575_s0 + $0x128] sm:$0x7f] }
  0x57   :  { %v28_v4 = vld [vmem:[%s6577_s2 + $0x70] sm:$0x7f] }
  0x58   :  { %1745 = vst.msk [vmem:[%s6578_s3 + $0x50] sm:$0x7f] %vm1734_vm0, %v1400_v61  ;;  %v1404_v17 = vadd.f32 %v1060_v8, %v28_v4  ;;  %v727_v61 = vld [vmem:[%s6576_s1 + $0xc8] sm:$0x7f] }
  0x59   :  { %v1071_v63 = vadd.f32 %v727_v61, %v383_v60  ;;  %v396_v61 = vld [vmem:[%s6575_s0 + $0x130] sm:$0x7f] }
  0x5f   :  { %v29_v9 = vld [vmem:[%s6577_s2 + $0x78] sm:$0x7f] }
  0x60   :  { %1746 = vst.msk [vmem:[%s6578_s3 + $0x58] sm:$0x7f] %vm1734_vm0, %v1401_v2  ;;  %v1405_v22 = vadd.f32 %v1061_v13, %v29_v9  ;;  %v728_v2 = vld [vmem:[%s6576_s1 + $0xd0] sm:$0x7f] }
  0x61   :  { %v1072_v4 = vadd.f32 %v728_v2, %v384_v1  ;;  %v397_v2 = vld [vmem:[%s6575_s0 + $0x138] sm:$0x7f] }
  0x67   :  { %v30_v14 = vld [vmem:[%s6577_s2 + $0x80] sm:$0x7f] }
  0x68   :  { %1747 = vst.msk [vmem:[%s6578_s3 + $0x60] sm:$0x7f] %vm1734_vm0, %v1402_v7  ;;  %v1406_v27 = vadd.f32 %v1062_v18, %v30_v14  ;;  %v729_v7 = vld [vmem:[%s6576_s1 + $0xd8] sm:$0x7f] }
  0x69   :  { %v1073_v9 = vadd.f32 %v729_v7, %v385_v6  ;;  %v398_v7 = vld [vmem:[%s6575_s0 + $0x140] sm:$0x7f] }
  0x6f   :  { %v31_v19 = vld [vmem:[%s6577_s2 + $0x88] sm:$0x7f] }
  0x70   :  { %1748 = vst.msk [vmem:[%s6578_s3 + $0x68] sm:$0x7f] %vm1734_vm0, %v1403_v12  ;;  %v1407_v32 = vadd.f32 %v1063_v23, %v31_v19  ;;  %v730_v12 = vld [vmem:[%s6576_s1 + $0xe0] sm:$0x7f] }
  0x71   :  { %v1074_v14 = vadd.f32 %v730_v12, %v386_v11  ;;  %v399_v12 = vld [vmem:[%s6575_s0 + $0x148] sm:$0x7f] }
  0x77   :  { %v32_v24 = vld [vmem:[%s6577_s2 + $0x90] sm:$0x7f] }
  0x78   :  { %1749 = vst.msk [vmem:[%s6578_s3 + $0x70] sm:$0x7f] %vm1734_vm0, %v1404_v17  ;;  %v1408_v37 = vadd.f32 %v1064_v28, %v32_v24  ;;  %v731_v17 = vld [vmem:[%s6576_s1 + $0xe8] sm:$0x7f] }
  0x79   :  { %v1075_v19 = vadd.f32 %v731_v17, %v387_v16  ;;  %v400_v17 = vld [vmem:[%s6575_s0 + $0x150] sm:$0x7f] }
  0x7f   :  { %v33_v29 = vld [vmem:[%s6577_s2 + $0x98] sm:$0x7f] }
  0x80   :  { %1750 = vst.msk [vmem:[%s6578_s3 + $0x78] sm:$0x7f] %vm1734_vm0, %v1405_v22  ;;  %v1409_v42 = vadd.f32 %v1065_v33, %v33_v29  ;;  %v732_v22 = vld [vmem:[%s6576_s1 + $0xf0] sm:$0x7f] }
  0x81   :  { %v1076_v24 = vadd.f32 %v732_v22, %v388_v21  ;;  %v401_v22 = vld [vmem:[%s6575_s0 + $0x158] sm:$0x7f] }
  0x87   :  { %v34_v34 = vld [vmem:[%s6577_s2 + $0xa0] sm:$0x7f] }
  0x88   :  { %1751 = vst.msk [vmem:[%s6578_s3 + $0x80] sm:$0x7f] %vm1734_vm0, %v1406_v27  ;;  %v1410_v47 = vadd.f32 %v1066_v38, %v34_v34  ;;  %v733_v27 = vld [vmem:[%s6576_s1 + $0xf8] sm:$0x7f] }
  0x89   :  { %v1077_v29 = vadd.f32 %v733_v27, %v389_v26  ;;  %v402_v27 = vld [vmem:[%s6575_s0 + $0x160] sm:$0x7f] }
  0x8f   :  { %v35_v39 = vld [vmem:[%s6577_s2 + $0xa8] sm:$0x7f] }
  0x90   :  { %1752 = vst.msk [vmem:[%s6578_s3 + $0x88] sm:$0x7f] %vm1734_vm0, %v1407_v32  ;;  %v1411_v52 = vadd.f32 %v1067_v43, %v35_v39  ;;  %v734_v32 = vld [vmem:[%s6576_s1 + $0x100] sm:$0x7f] }
  0x91   :  { %v1078_v34 = vadd.f32 %v734_v32, %v390_v31  ;;  %v403_v32 = vld [vmem:[%s6575_s0 + $0x168] sm:$0x7f] }
  0x97   :  { %v36_v44 = vld [vmem:[%s6577_s2 + $0xb0] sm:$0x7f] }
  0x98   :  { %1753 = vst.msk [vmem:[%s6578_s3 + $0x90] sm:$0x7f] %vm1734_vm0, %v1408_v37  ;;  %v1412_v57 = vadd.f32 %v1068_v48, %v36_v44  ;;  %v735_v37 = vld [vmem:[%s6576_s1 + $0x108] sm:$0x7f] }
  0x99   :  { %v1079_v39 = vadd.f32 %v735_v37, %v391_v36  ;;  %v404_v37 = vld [vmem:[%s6575_s0 + $0x170] sm:$0x7f] }
  0x9f   :  { %v37_v49 = vld [vmem:[%s6577_s2 + $0xb8] sm:$0x7f] }
  0xa0   :  { %1754 = vst.msk [vmem:[%s6578_s3 + $0x98] sm:$0x7f] %vm1734_vm0, %v1409_v42  ;;  %v1413_v62 = vadd.f32 %v1069_v53, %v37_v49  ;;  %v736_v42 = vld [vmem:[%s6576_s1 + $0x110] sm:$0x7f] }
  0xa1   :  { %v1080_v44 = vadd.f32 %v736_v42, %v392_v41  ;;  %v405_v42 = vld [vmem:[%s6575_s0 + $0x178] sm:$0x7f] }
  0xa7   :  { %v38_v54 = vld [vmem:[%s6577_s2 + $0xc0] sm:$0x7f] }
  0xa8   :  { %1755 = vst.msk [vmem:[%s6578_s3 + $0xa0] sm:$0x7f] %vm1734_vm0, %v1410_v47  ;;  %v1414_v3 = vadd.f32 %v1070_v58, %v38_v54  ;;  %v737_v47 = vld [vmem:[%s6576_s1 + $0x118] sm:$0x7f] }
  0xa9   :  { %v1081_v49 = vadd.f32 %v737_v47, %v393_v46  ;;  %v406_v47 = vld [vmem:[%s6575_s0 + $0x180] sm:$0x7f] }
  0xaf   :  { %v39_v59 = vld [vmem:[%s6577_s2 + $0xc8] sm:$0x7f] }
  0xb0   :  { %1756 = vst.msk [vmem:[%s6578_s3 + $0xa8] sm:$0x7f] %vm1734_vm0, %v1411_v52  ;;  %v1415_v8 = vadd.f32 %v1071_v63, %v39_v59  ;;  %v738_v52 = vld [vmem:[%s6576_s1 + $0x120] sm:$0x7f] }
  0xb1   :  { %v1082_v54 = vadd.f32 %v738_v52, %v394_v51  ;;  %v407_v52 = vld [vmem:[%s6575_s0 + $0x188] sm:$0x7f] }
  0xb7   :  { %v40_v0 = vld [vmem:[%s6577_s2 + $0xd0] sm:$0x7f] }
  0xb8   :  { %1757 = vst.msk [vmem:[%s6578_s3 + $0xb0] sm:$0x7f] %vm1734_vm0, %v1412_v57  ;;  %v1416_v13 = vadd.f32 %v1072_v4, %v40_v0  ;;  %v739_v57 = vld [vmem:[%s6576_s1 + $0x128] sm:$0x7f] }
  0xb9   :  { %v1083_v59 = vadd.f32 %v739_v57, %v395_v56  ;;  %v408_v57 = vld [vmem:[%s6575_s0 + $0x190] sm:$0x7f] }
  0xbf   :  { %v41_v5 = vld [vmem:[%s6577_s2 + $0xd8] sm:$0x7f] }
  0xc0   :  { %1758 = vst.msk [vmem:[%s6578_s3 + $0xb8] sm:$0x7f] %vm1734_vm0, %v1413_v62  ;;  %v1417_v18 = vadd.f32 %v1073_v9, %v41_v5  ;;  %v740_v62 = vld [vmem:[%s6576_s1 + $0x130] sm:$0x7f] }
  0xc1   :  { %v1084_v0 = vadd.f32 %v740_v62, %v396_v61  ;;  %v409_v62 = vld [vmem:[%s6575_s0 + $0x198] sm:$0x7f] }
  0xc7   :  { %v42_v10 = vld [vmem:[%s6577_s2 + $0xe0] sm:$0x7f] }
  0xc8   :  { %1759 = vst.msk [vmem:[%s6578_s3 + $0xc0] sm:$0x7f] %vm1734_vm0, %v1414_v3  ;;  %v1418_v23 = vadd.f32 %v1074_v14, %v42_v10  ;;  %v741_v3 = vld [vmem:[%s6576_s1 + $0x138] sm:$0x7f] }
  0xc9   :  { %v1085_v5 = vadd.f32 %v741_v3, %v397_v2  ;;  %v410_v3 = vld [vmem:[%s6575_s0 + $0x1a0] sm:$0x7f] }
  0xcf   :  { %v43_v15 = vld [vmem:[%s6577_s2 + $0xe8] sm:$0x7f] }
  0xd0   :  { %1760 = vst.msk [vmem:[%s6578_s3 + $0xc8] sm:$0x7f] %vm1734_vm0, %v1415_v8  ;;  %v1419_v28 = vadd.f32 %v1075_v19, %v43_v15  ;;  %v742_v8 = vld [vmem:[%s6576_s1 + $0x140] sm:$0x7f] }
  0xd1   :  { %v1086_v10 = vadd.f32 %v742_v8, %v398_v7  ;;  %v411_v8 = vld [vmem:[%s6575_s0 + $0x1a8] sm:$0x7f] }
  0xd7   :  { %v44_v20 = vld [vmem:[%s6577_s2 + $0xf0] sm:$0x7f] }
  0xd8   :  { %1761 = vst.msk [vmem:[%s6578_s3 + $0xd0] sm:$0x7f] %vm1734_vm0, %v1416_v13  ;;  %v1420_v33 = vadd.f32 %v1076_v24, %v44_v20  ;;  %v743_v13 = vld [vmem:[%s6576_s1 + $0x148] sm:$0x7f] }
  0xd9   :  { %v1087_v15 = vadd.f32 %v743_v13, %v399_v12  ;;  %v412_v13 = vld [vmem:[%s6575_s0 + $0x1b0] sm:$0x7f] }
  0xdf   :  { %v45_v25 = vld [vmem:[%s6577_s2 + $0xf8] sm:$0x7f] }
  0xe0   :  { %1762 = vst.msk [vmem:[%s6578_s3 + $0xd8] sm:$0x7f] %vm1734_vm0, %v1417_v18  ;;  %v1421_v38 = vadd.f32 %v1077_v29, %v45_v25  ;;  %v744_v18 = vld [vmem:[%s6576_s1 + $0x150] sm:$0x7f] }
  0xe1   :  { %v1088_v20 = vadd.f32 %v744_v18, %v400_v17  ;;  %v413_v18 = vld [vmem:[%s6575_s0 + $0x1b8] sm:$0x7f] }
  0xe7   :  { %v46_v30 = vld [vmem:[%s6577_s2 + $0x100] sm:$0x7f] }
  0xe8   :  { %1763 = vst.msk [vmem:[%s6578_s3 + $0xe0] sm:$0x7f] %vm1734_vm0, %v1418_v23  ;;  %v1422_v43 = vadd.f32 %v1078_v34, %v46_v30  ;;  %v745_v23 = vld [vmem:[%s6576_s1 + $0x158] sm:$0x7f] }
  0xe9   :  { %v1089_v25 = vadd.f32 %v745_v23, %v401_v22  ;;  %v414_v23 = vld [vmem:[%s6575_s0 + $0x1c0] sm:$0x7f] }
  0xef   :  { %v47_v35 = vld [vmem:[%s6577_s2 + $0x108] sm:$0x7f] }
  0xf0   :  { %1764 = vst.msk [vmem:[%s6578_s3 + $0xe8] sm:$0x7f] %vm1734_vm0, %v1419_v28  ;;  %v1423_v48 = vadd.f32 %v1079_v39, %v47_v35  ;;  %v746_v28 = vld [vmem:[%s6576_s1 + $0x160] sm:$0x7f] }
  0xf1   :  { %v1090_v30 = vadd.f32 %v746_v28, %v402_v27  ;;  %v415_v28 = vld [vmem:[%s6575_s0 + $0x1c8] sm:$0x7f] }
  0xf7   :  { %v48_v40 = vld [vmem:[%s6577_s2 + $0x110] sm:$0x7f] }
  0xf8   :  { %1765 = vst.msk [vmem:[%s6578_s3 + $0xf0] sm:$0x7f] %vm1734_vm0, %v1420_v33  ;;  %v1424_v53 = vadd.f32 %v1080_v44, %v48_v40  ;;  %v747_v33 = vld [vmem:[%s6576_s1 + $0x168] sm:$0x7f] }
  0xf9   :  { %v1091_v35 = vadd.f32 %v747_v33, %v403_v32  ;;  %v416_v33 = vld [vmem:[%s6575_s0 + $0x1d0] sm:$0x7f] }
  0xff   :  { %v49_v45 = vld [vmem:[%s6577_s2 + $0x118] sm:$0x7f] }
 0x100   :  { %1766 = vst.msk [vmem:[%s6578_s3 + $0xf8] sm:$0x7f] %vm1734_vm0, %v1421_v38  ;;  %v1425_v58 = vadd.f32 %v1081_v49, %v49_v45  ;;  %v748_v38 = vld [vmem:[%s6576_s1 + $0x170] sm:$0x7f] }
 0x101   :  { %v1092_v40 = vadd.f32 %v748_v38, %v404_v37  ;;  %v417_v38 = vld [vmem:[%s6575_s0 + $0x1d8] sm:$0x7f] }
 0x107   :  { %v50_v50 = vld [vmem:[%s6577_s2 + $0x120] sm:$0x7f] }
 0x108   :  { %1767 = vst.msk [vmem:[%s6578_s3 + $0x100] sm:$0x7f] %vm1734_vm0, %v1422_v43  ;;  %v1426_v63 = vadd.f32 %v1082_v54, %v50_v50  ;;  %v749_v43 = vld [vmem:[%s6576_s1 + $0x178] sm:$0x7f] }
 0x109   :  { %v1093_v45 = vadd.f32 %v749_v43, %v405_v42  ;;  %v418_v43 = vld [vmem:[%s6575_s0 + $0x1e0] sm:$0x7f] }
 0x10f   :  { %v51_v55 = vld [vmem:[%s6577_s2 + $0x128] sm:$0x7f] }
 0x110   :  { %1768 = vst.msk [vmem:[%s6578_s3 + $0x108] sm:$0x7f] %vm1734_vm0, %v1423_v48  ;;  %v1427_v4 = vadd.f32 %v1083_v59, %v51_v55  ;;  %v750_v48 = vld [vmem:[%s6576_s1 + $0x180] sm:$0x7f] }
 0x111   :  { %v1094_v50 = vadd.f32 %v750_v48, %v406_v47  ;;  %v419_v48 = vld [vmem:[%s6575_s0 + $0x1e8] sm:$0x7f] }
 0x117   :  { %v52_v60 = vld [vmem:[%s6577_s2 + $0x130] sm:$0x7f] }
 0x118   :  { %1769 = vst.msk [vmem:[%s6578_s3 + $0x110] sm:$0x7f] %vm1734_vm0, %v1424_v53  ;;  %v1428_v9 = vadd.f32 %v1084_v0, %v52_v60  ;;  %v751_v53 = vld [vmem:[%s6576_s1 + $0x188] sm:$0x7f] }
 0x119   :  { %v1095_v55 = vadd.f32 %v751_v53, %v407_v52  ;;  %v420_v53 = vld [vmem:[%s6575_s0 + $0x1f0] sm:$0x7f] }
 0x11f   :  { %v53_v1 = vld [vmem:[%s6577_s2 + $0x138] sm:$0x7f] }
 0x120   :  { %1770 = vst.msk [vmem:[%s6578_s3 + $0x118] sm:$0x7f] %vm1734_vm0, %v1425_v58  ;;  %v1429_v14 = vadd.f32 %v1085_v5, %v53_v1  ;;  %v752_v58 = vld [vmem:[%s6576_s1 + $0x190] sm:$0x7f] }
 0x121   :  { %v1096_v60 = vadd.f32 %v752_v58, %v408_v57  ;;  %v421_v58 = vld [vmem:[%s6575_s0 + $0x1f8] sm:$0x7f] }
 0x127   :  { %v54_v6 = vld [vmem:[%s6577_s2 + $0x140] sm:$0x7f] }
 0x128   :  { %1771 = vst.msk [vmem:[%s6578_s3 + $0x120] sm:$0x7f] %vm1734_vm0, %v1426_v63  ;;  %v1430_v19 = vadd.f32 %v1086_v10, %v54_v6  ;;  %v753_v63 = vld [vmem:[%s6576_s1 + $0x198] sm:$0x7f] }
 0x129   :  { %v1097_v1 = vadd.f32 %v753_v63, %v409_v62  ;;  %v422_v63 = vld [vmem:[%s6575_s0 + $0x200] sm:$0x7f] }
 0x12f   :  { %v55_v11 = vld [vmem:[%s6577_s2 + $0x148] sm:$0x7f] }
 0x130   :  { %1772 = vst.msk [vmem:[%s6578_s3 + $0x128] sm:$0x7f] %vm1734_vm0, %v1427_v4  ;;  %v1431_v24 = vadd.f32 %v1087_v15, %v55_v11  ;;  %v754_v4 = vld [vmem:[%s6576_s1 + $0x1a0] sm:$0x7f] }
 0x131   :  { %v1098_v6 = vadd.f32 %v754_v4, %v410_v3  ;;  %v423_v4 = vld [vmem:[%s6575_s0 + $0x208] sm:$0x7f] }
 0x137   :  { %v56_v16 = vld [vmem:[%s6577_s2 + $0x150] sm:$0x7f] }
 0x138   :  { %1773 = vst.msk [vmem:[%s6578_s3 + $0x130] sm:$0x7f] %vm1734_vm0, %v1428_v9  ;;  %v1432_v29 = vadd.f32 %v1088_v20, %v56_v16  ;;  %v755_v9 = vld [vmem:[%s6576_s1 + $0x1a8] sm:$0x7f] }
 0x139   :  { %v1099_v11 = vadd.f32 %v755_v9, %v411_v8  ;;  %v424_v9 = vld [vmem:[%s6575_s0 + $0x210] sm:$0x7f] }
 0x13f   :  { %v57_v21 = vld [vmem:[%s6577_s2 + $0x158] sm:$0x7f] }
 0x140   :  { %1774 = vst.msk [vmem:[%s6578_s3 + $0x138] sm:$0x7f] %vm1734_vm0, %v1429_v14  ;;  %v1433_v34 = vadd.f32 %v1089_v25, %v57_v21  ;;  %v756_v14 = vld [vmem:[%s6576_s1 + $0x1b0] sm:$0x7f] }
 0x141   :  { %v1100_v16 = vadd.f32 %v756_v14, %v412_v13  ;;  %v425_v14 = vld [vmem:[%s6575_s0 + $0x218] sm:$0x7f] }
 0x147   :  { %v58_v26 = vld [vmem:[%s6577_s2 + $0x160] sm:$0x7f] }
 0x148   :  { %1775 = vst.msk [vmem:[%s6578_s3 + $0x140] sm:$0x7f] %vm1734_vm0, %v1430_v19  ;;  %v1434_v39 = vadd.f32 %v1090_v30, %v58_v26  ;;  %v757_v19 = vld [vmem:[%s6576_s1 + $0x1b8] sm:$0x7f] }
 0x149   :  { %v1101_v21 = vadd.f32 %v757_v19, %v413_v18  ;;  %v426_v19 = vld [vmem:[%s6575_s0 + $0x220] sm:$0x7f] }
 0x14f   :  { %v59_v31 = vld [vmem:[%s6577_s2 + $0x168] sm:$0x7f] }
 0x150   :  { %1776 = vst.msk [vmem:[%s6578_s3 + $0x148] sm:$0x7f] %vm1734_vm0, %v1431_v24  ;;  %v1435_v44 = vadd.f32 %v1091_v35, %v59_v31  ;;  %v758_v24 = vld [vmem:[%s6576_s1 + $0x1c0] sm:$0x7f] }
 0x151   :  { %v1102_v26 = vadd.f32 %v758_v24, %v414_v23  ;;  %v427_v24 = vld [vmem:[%s6575_s0 + $0x228] sm:$0x7f] }
 0x157   :  { %v60_v36 = vld [vmem:[%s6577_s2 + $0x170] sm:$0x7f] }
 0x158   :  { %1777 = vst.msk [vmem:[%s6578_s3 + $0x150] sm:$0x7f] %vm1734_vm0, %v1432_v29  ;;  %v1436_v49 = vadd.f32 %v1092_v40, %v60_v36  ;;  %v759_v29 = vld [vmem:[%s6576_s1 + $0x1c8] sm:$0x7f] }
 0x159   :  { %v1103_v31 = vadd.f32 %v759_v29, %v415_v28  ;;  %v428_v29 = vld [vmem:[%s6575_s0 + $0x230] sm:$0x7f] }
 0x15f   :  { %v61_v41 = vld [vmem:[%s6577_s2 + $0x178] sm:$0x7f] }
 0x160   :  { %1778 = vst.msk [vmem:[%s6578_s3 + $0x158] sm:$0x7f] %vm1734_vm0, %v1433_v34  ;;  %v1437_v54 = vadd.f32 %v1093_v45, %v61_v41  ;;  %v760_v34 = vld [vmem:[%s6576_s1 + $0x1d0] sm:$0x7f] }
 0x161   :  { %v1104_v36 = vadd.f32 %v760_v34, %v416_v33  ;;  %v429_v34 = vld [vmem:[%s6575_s0 + $0x238] sm:$0x7f] }
 0x167   :  { %v62_v46 = vld [vmem:[%s6577_s2 + $0x180] sm:$0x7f] }
 0x168   :  { %1779 = vst.msk [vmem:[%s6578_s3 + $0x160] sm:$0x7f] %vm1734_vm0, %v1434_v39  ;;  %v1438_v59 = vadd.f32 %v1094_v50, %v62_v46  ;;  %v761_v39 = vld [vmem:[%s6576_s1 + $0x1d8] sm:$0x7f] }
 0x169   :  { %v1105_v41 = vadd.f32 %v761_v39, %v417_v38  ;;  %v430_v39 = vld [vmem:[%s6575_s0 + $0x240] sm:$0x7f] }
 0x16f   :  { %v63_v51 = vld [vmem:[%s6577_s2 + $0x188] sm:$0x7f] }
 0x170   :  { %1780 = vst.msk [vmem:[%s6578_s3 + $0x168] sm:$0x7f] %vm1734_vm0, %v1435_v44  ;;  %v1439_v0 = vadd.f32 %v1095_v55, %v63_v51  ;;  %v762_v44 = vld [vmem:[%s6576_s1 + $0x1e0] sm:$0x7f] }
 0x171   :  { %v1106_v46 = vadd.f32 %v762_v44, %v418_v43  ;;  %v431_v44 = vld [vmem:[%s6575_s0 + $0x248] sm:$0x7f] }
 0x177   :  { %v64_v56 = vld [vmem:[%s6577_s2 + $0x190] sm:$0x7f] }
 0x178   :  { %1781 = vst.msk [vmem:[%s6578_s3 + $0x170] sm:$0x7f] %vm1734_vm0, %v1436_v49  ;;  %v1440_v5 = vadd.f32 %v1096_v60, %v64_v56  ;;  %v763_v49 = vld [vmem:[%s6576_s1 + $0x1e8] sm:$0x7f] }
 0x179   :  { %v1107_v51 = vadd.f32 %v763_v49, %v419_v48  ;;  %v432_v49 = vld [vmem:[%s6575_s0 + $0x250] sm:$0x7f] }
 0x17f   :  { %v65_v61 = vld [vmem:[%s6577_s2 + $0x198] sm:$0x7f] }
 0x180   :  { %1782 = vst.msk [vmem:[%s6578_s3 + $0x178] sm:$0x7f] %vm1734_vm0, %v1437_v54  ;;  %v1441_v10 = vadd.f32 %v1097_v1, %v65_v61  ;;  %v764_v54 = vld [vmem:[%s6576_s1 + $0x1f0] sm:$0x7f] }
 0x181   :  { %v1108_v56 = vadd.f32 %v764_v54, %v420_v53  ;;  %v433_v54 = vld [vmem:[%s6575_s0 + $0x258] sm:$0x7f] }
 0x187   :  { %v66_v2 = vld [vmem:[%s6577_s2 + $0x1a0] sm:$0x7f] }
 0x188   :  { %1783 = vst.msk [vmem:[%s6578_s3 + $0x180] sm:$0x7f] %vm1734_vm0, %v1438_v59  ;;  %v1442_v15 = vadd.f32 %v1098_v6, %v66_v2  ;;  %v765_v59 = vld [vmem:[%s6576_s1 + $0x1f8] sm:$0x7f] }
 0x189   :  { %v1109_v61 = vadd.f32 %v765_v59, %v421_v58  ;;  %v434_v59 = vld [vmem:[%s6575_s0 + $0x260] sm:$0x7f] }
 0x18f   :  { %v67_v7 = vld [vmem:[%s6577_s2 + $0x1a8] sm:$0x7f] }
 0x190   :  { %1784 = vst.msk [vmem:[%s6578_s3 + $0x188] sm:$0x7f] %vm1734_vm0, %v1439_v0  ;;  %v1443_v20 = vadd.f32 %v1099_v11, %v67_v7  ;;  %v766_v0 = vld [vmem:[%s6576_s1 + $0x200] sm:$0x7f] }
 0x191   :  { %v1110_v2 = vadd.f32 %v766_v0, %v422_v63  ;;  %v435_v0 = vld [vmem:[%s6575_s0 + $0x268] sm:$0x7f] }
 0x197   :  { %v68_v12 = vld [vmem:[%s6577_s2 + $0x1b0] sm:$0x7f] }
 0x198   :  { %1785 = vst.msk [vmem:[%s6578_s3 + $0x190] sm:$0x7f] %vm1734_vm0, %v1440_v5  ;;  %v1444_v25 = vadd.f32 %v1100_v16, %v68_v12  ;;  %v767_v5 = vld [vmem:[%s6576_s1 + $0x208] sm:$0x7f] }
 0x199   :  { %v1111_v7 = vadd.f32 %v767_v5, %v423_v4  ;;  %v436_v5 = vld [vmem:[%s6575_s0 + $0x270] sm:$0x7f] }
 0x19f   :  { %v69_v17 = vld [vmem:[%s6577_s2 + $0x1b8] sm:$0x7f] }
 0x1a0   :  { %1786 = vst.msk [vmem:[%s6578_s3 + $0x198] sm:$0x7f] %vm1734_vm0, %v1441_v10  ;;  %v1445_v30 = vadd.f32 %v1101_v21, %v69_v17  ;;  %v768_v10 = vld [vmem:[%s6576_s1 + $0x210] sm:$0x7f] }
 0x1a1   :  { %v1112_v12 = vadd.f32 %v768_v10, %v424_v9  ;;  %v437_v10 = vld [vmem:[%s6575_s0 + $0x278] sm:$0x7f] }
 0x1a7   :  { %v70_v22 = vld [vmem:[%s6577_s2 + $0x1c0] sm:$0x7f] }
 0x1a8   :  { %1787 = vst.msk [vmem:[%s6578_s3 + $0x1a0] sm:$0x7f] %vm1734_vm0, %v1442_v15  ;;  %v1446_v35 = vadd.f32 %v1102_v26, %v70_v22  ;;  %v769_v15 = vld [vmem:[%s6576_s1 + $0x218] sm:$0x7f] }
 0x1a9   :  { %v1113_v17 = vadd.f32 %v769_v15, %v425_v14  ;;  %v438_v15 = vld [vmem:[%s6575_s0 + $0x280] sm:$0x7f] }
 0x1af   :  { %v71_v27 = vld [vmem:[%s6577_s2 + $0x1c8] sm:$0x7f] }
 0x1b0   :  { %1788 = vst.msk [vmem:[%s6578_s3 + $0x1a8] sm:$0x7f] %vm1734_vm0, %v1443_v20  ;;  %v1447_v40 = vadd.f32 %v1103_v31, %v71_v27  ;;  %v770_v20 = vld [vmem:[%s6576_s1 + $0x220] sm:$0x7f] }
 0x1b1   :  { %v1114_v22 = vadd.f32 %v770_v20, %v426_v19  ;;  %v439_v20 = vld [vmem:[%s6575_s0 + $0x288] sm:$0x7f] }
 0x1b7   :  { %v72_v32 = vld [vmem:[%s6577_s2 + $0x1d0] sm:$0x7f] }
 0x1b8   :  { %1789 = vst.msk [vmem:[%s6578_s3 + $0x1b0] sm:$0x7f] %vm1734_vm0, %v1444_v25  ;;  %v1448_v45 = vadd.f32 %v1104_v36, %v72_v32  ;;  %v771_v25 = vld [vmem:[%s6576_s1 + $0x228] sm:$0x7f] }
 0x1b9   :  { %v1115_v27 = vadd.f32 %v771_v25, %v427_v24  ;;  %v440_v25 = vld [vmem:[%s6575_s0 + $0x290] sm:$0x7f] }
 0x1bf   :  { %v73_v37 = vld [vmem:[%s6577_s2 + $0x1d8] sm:$0x7f] }
 0x1c0   :  { %1790 = vst.msk [vmem:[%s6578_s3 + $0x1b8] sm:$0x7f] %vm1734_vm0, %v1445_v30  ;;  %v1449_v50 = vadd.f32 %v1105_v41, %v73_v37  ;;  %v772_v30 = vld [vmem:[%s6576_s1 + $0x230] sm:$0x7f] }
 0x1c1   :  { %v1116_v32 = vadd.f32 %v772_v30, %v428_v29  ;;  %v441_v30 = vld [vmem:[%s6575_s0 + $0x298] sm:$0x7f] }
 0x1c7   :  { %v74_v42 = vld [vmem:[%s6577_s2 + $0x1e0] sm:$0x7f] }
 0x1c8   :  { %1791 = vst.msk [vmem:[%s6578_s3 + $0x1c0] sm:$0x7f] %vm1734_vm0, %v1446_v35  ;;  %v1450_v55 = vadd.f32 %v1106_v46, %v74_v42  ;;  %v773_v35 = vld [vmem:[%s6576_s1 + $0x238] sm:$0x7f] }
 0x1c9   :  { %v1117_v37 = vadd.f32 %v773_v35, %v429_v34  ;;  %v442_v35 = vld [vmem:[%s6575_s0 + $0x2a0] sm:$0x7f] }
 0x1cf   :  { %v75_v47 = vld [vmem:[%s6577_s2 + $0x1e8] sm:$0x7f] }
 0x1d0   :  { %1792 = vst.msk [vmem:[%s6578_s3 + $0x1c8] sm:$0x7f] %vm1734_vm0, %v1447_v40  ;;  %v1451_v60 = vadd.f32 %v1107_v51, %v75_v47  ;;  %v774_v40 = vld [vmem:[%s6576_s1 + $0x240] sm:$0x7f] }
 0x1d1   :  { %v1118_v42 = vadd.f32 %v774_v40, %v430_v39  ;;  %v443_v40 = vld [vmem:[%s6575_s0 + $0x2a8] sm:$0x7f] }
 0x1d7   :  { %v76_v52 = vld [vmem:[%s6577_s2 + $0x1f0] sm:$0x7f] }
 0x1d8   :  { %1793 = vst.msk [vmem:[%s6578_s3 + $0x1d0] sm:$0x7f] %vm1734_vm0, %v1448_v45  ;;  %v1452_v1 = vadd.f32 %v1108_v56, %v76_v52  ;;  %v775_v45 = vld [vmem:[%s6576_s1 + $0x248] sm:$0x7f] }
 0x1d9   :  { %v1119_v47 = vadd.f32 %v775_v45, %v431_v44  ;;  %v444_v45 = vld [vmem:[%s6575_s0 + $0x2b0] sm:$0x7f] }
 0x1df   :  { %v77_v57 = vld [vmem:[%s6577_s2 + $0x1f8] sm:$0x7f] }
 0x1e0   :  { %1794 = vst.msk [vmem:[%s6578_s3 + $0x1d8] sm:$0x7f] %vm1734_vm0, %v1449_v50  ;;  %v1453_v6 = vadd.f32 %v1109_v61, %v77_v57  ;;  %v776_v50 = vld [vmem:[%s6576_s1 + $0x250] sm:$0x7f] }
 0x1e1   :  { %v1120_v52 = vadd.f32 %v776_v50, %v432_v49  ;;  %v445_v50 = vld [vmem:[%s6575_s0 + $0x2b8] sm:$0x7f] }
 0x1e7   :  { %v78_v62 = vld [vmem:[%s6577_s2 + $0x200] sm:$0x7f] }
 0x1e8   :  { %1795 = vst.msk [vmem:[%s6578_s3 + $0x1e0] sm:$0x7f] %vm1734_vm0, %v1450_v55  ;;  %v1454_v11 = vadd.f32 %v1110_v2, %v78_v62  ;;  %v777_v55 = vld [vmem:[%s6576_s1 + $0x258] sm:$0x7f] }
 0x1e9   :  { %v1121_v57 = vadd.f32 %v777_v55, %v433_v54  ;;  %v446_v55 = vld [vmem:[%s6575_s0 + $0x2c0] sm:$0x7f] }
 0x1ef   :  { %v79_v3 = vld [vmem:[%s6577_s2 + $0x208] sm:$0x7f] }
 0x1f0   :  { %1796 = vst.msk [vmem:[%s6578_s3 + $0x1e8] sm:$0x7f] %vm1734_vm0, %v1451_v60  ;;  %v1455_v16 = vadd.f32 %v1111_v7, %v79_v3  ;;  %v778_v60 = vld [vmem:[%s6576_s1 + $0x260] sm:$0x7f] }
 0x1f1   :  { %v1122_v62 = vadd.f32 %v778_v60, %v434_v59  ;;  %v447_v60 = vld [vmem:[%s6575_s0 + $0x2c8] sm:$0x7f] }
 0x1f7   :  { %v80_v8 = vld [vmem:[%s6577_s2 + $0x210] sm:$0x7f] }
 0x1f8   :  { %1797 = vst.msk [vmem:[%s6578_s3 + $0x1f0] sm:$0x7f] %vm1734_vm0, %v1452_v1  ;;  %v1456_v21 = vadd.f32 %v1112_v12, %v80_v8  ;;  %v779_v1 = vld [vmem:[%s6576_s1 + $0x268] sm:$0x7f] }
 0x1f9   :  { %v1123_v3 = vadd.f32 %v779_v1, %v435_v0  ;;  %v448_v1 = vld [vmem:[%s6575_s0 + $0x2d0] sm:$0x7f] }
 0x1ff   :  { %v81_v13 = vld [vmem:[%s6577_s2 + $0x218] sm:$0x7f] }
 0x200   :  { %1798 = vst.msk [vmem:[%s6578_s3 + $0x1f8] sm:$0x7f] %vm1734_vm0, %v1453_v6  ;;  %v1457_v26 = vadd.f32 %v1113_v17, %v81_v13  ;;  %v780_v6 = vld [vmem:[%s6576_s1 + $0x270] sm:$0x7f] }
 0x201   :  { %v1124_v8 = vadd.f32 %v780_v6, %v436_v5  ;;  %v449_v6 = vld [vmem:[%s6575_s0 + $0x2d8] sm:$0x7f] }
 0x207   :  { %v82_v18 = vld [vmem:[%s6577_s2 + $0x220] sm:$0x7f] }
 0x208   :  { %1799 = vst.msk [vmem:[%s6578_s3 + $0x200] sm:$0x7f] %vm1734_vm0, %v1454_v11  ;;  %v1458_v31 = vadd.f32 %v1114_v22, %v82_v18  ;;  %v781_v11 = vld [vmem:[%s6576_s1 + $0x278] sm:$0x7f] }
 0x209   :  { %v1125_v13 = vadd.f32 %v781_v11, %v437_v10  ;;  %v450_v11 = vld [vmem:[%s6575_s0 + $0x2e0] sm:$0x7f] }
 0x20f   :  { %v83_v23 = vld [vmem:[%s6577_s2 + $0x228] sm:$0x7f] }
 0x210   :  { %1800 = vst.msk [vmem:[%s6578_s3 + $0x208] sm:$0x7f] %vm1734_vm0, %v1455_v16  ;;  %v1459_v36 = vadd.f32 %v1115_v27, %v83_v23  ;;  %v782_v16 = vld [vmem:[%s6576_s1 + $0x280] sm:$0x7f] }
 0x211   :  { %v1126_v18 = vadd.f32 %v782_v16, %v438_v15  ;;  %v451_v16 = vld [vmem:[%s6575_s0 + $0x2e8] sm:$0x7f] }
 0x217   :  { %v84_v28 = vld [vmem:[%s6577_s2 + $0x230] sm:$0x7f] }
 0x218   :  { %1801 = vst.msk [vmem:[%s6578_s3 + $0x210] sm:$0x7f] %vm1734_vm0, %v1456_v21  ;;  %v1460_v41 = vadd.f32 %v1116_v32, %v84_v28  ;;  %v783_v21 = vld [vmem:[%s6576_s1 + $0x288] sm:$0x7f] }
 0x219   :  { %v1127_v23 = vadd.f32 %v783_v21, %v439_v20  ;;  %v452_v21 = vld [vmem:[%s6575_s0 + $0x2f0] sm:$0x7f] }
 0x21f   :  { %v85_v33 = vld [vmem:[%s6577_s2 + $0x238] sm:$0x7f] }
 0x220   :  { %1802 = vst.msk [vmem:[%s6578_s3 + $0x218] sm:$0x7f] %vm1734_vm0, %v1457_v26  ;;  %v1461_v46 = vadd.f32 %v1117_v37, %v85_v33  ;;  %v784_v26 = vld [vmem:[%s6576_s1 + $0x290] sm:$0x7f] }
 0x221   :  { %v1128_v28 = vadd.f32 %v784_v26, %v440_v25  ;;  %v453_v26 = vld [vmem:[%s6575_s0 + $0x2f8] sm:$0x7f] }
 0x227   :  { %v86_v38 = vld [vmem:[%s6577_s2 + $0x240] sm:$0x7f] }
 0x228   :  { %1803 = vst.msk [vmem:[%s6578_s3 + $0x220] sm:$0x7f] %vm1734_vm0, %v1458_v31  ;;  %v1462_v51 = vadd.f32 %v1118_v42, %v86_v38  ;;  %v785_v31 = vld [vmem:[%s6576_s1 + $0x298] sm:$0x7f] }
 0x229   :  { %v1129_v33 = vadd.f32 %v785_v31, %v441_v30  ;;  %v454_v31 = vld [vmem:[%s6575_s0 + $0x300] sm:$0x7f] }
 0x22f   :  { %v87_v43 = vld [vmem:[%s6577_s2 + $0x248] sm:$0x7f] }
 0x230   :  { %1804 = vst.msk [vmem:[%s6578_s3 + $0x228] sm:$0x7f] %vm1734_vm0, %v1459_v36  ;;  %v1463_v56 = vadd.f32 %v1119_v47, %v87_v43  ;;  %v786_v36 = vld [vmem:[%s6576_s1 + $0x2a0] sm:$0x7f] }
 0x231   :  { %v1130_v38 = vadd.f32 %v786_v36, %v442_v35  ;;  %v455_v36 = vld [vmem:[%s6575_s0 + $0x308] sm:$0x7f] }
 0x237   :  { %v88_v48 = vld [vmem:[%s6577_s2 + $0x250] sm:$0x7f] }
 0x238   :  { %1805 = vst.msk [vmem:[%s6578_s3 + $0x230] sm:$0x7f] %vm1734_vm0, %v1460_v41  ;;  %v1464_v61 = vadd.f32 %v1120_v52, %v88_v48  ;;  %v787_v41 = vld [vmem:[%s6576_s1 + $0x2a8] sm:$0x7f] }
 0x239   :  { %v1131_v43 = vadd.f32 %v787_v41, %v443_v40  ;;  %v456_v41 = vld [vmem:[%s6575_s0 + $0x310] sm:$0x7f] }
 0x23f   :  { %v89_v53 = vld [vmem:[%s6577_s2 + $0x258] sm:$0x7f] }
 0x240   :  { %1806 = vst.msk [vmem:[%s6578_s3 + $0x238] sm:$0x7f] %vm1734_vm0, %v1461_v46  ;;  %v1465_v2 = vadd.f32 %v1121_v57, %v89_v53  ;;  %v788_v46 = vld [vmem:[%s6576_s1 + $0x2b0] sm:$0x7f] }
 0x241   :  { %v1132_v48 = vadd.f32 %v788_v46, %v444_v45  ;;  %v457_v46 = vld [vmem:[%s6575_s0 + $0x318] sm:$0x7f] }
 0x247   :  { %v90_v58 = vld [vmem:[%s6577_s2 + $0x260] sm:$0x7f] }
 0x248   :  { %1807 = vst.msk [vmem:[%s6578_s3 + $0x240] sm:$0x7f] %vm1734_vm0, %v1462_v51  ;;  %v1466_v7 = vadd.f32 %v1122_v62, %v90_v58  ;;  %v789_v51 = vld [vmem:[%s6576_s1 + $0x2b8] sm:$0x7f] }
 0x249   :  { %v1133_v53 = vadd.f32 %v789_v51, %v445_v50  ;;  %v458_v51 = vld [vmem:[%s6575_s0 + $0x320] sm:$0x7f] }
 0x24f   :  { %v91_v63 = vld [vmem:[%s6577_s2 + $0x268] sm:$0x7f] }
 0x250   :  { %1808 = vst.msk [vmem:[%s6578_s3 + $0x248] sm:$0x7f] %vm1734_vm0, %v1463_v56  ;;  %v1467_v12 = vadd.f32 %v1123_v3, %v91_v63  ;;  %v790_v56 = vld [vmem:[%s6576_s1 + $0x2c0] sm:$0x7f] }
 0x251   :  { %v1134_v58 = vadd.f32 %v790_v56, %v446_v55  ;;  %v459_v56 = vld [vmem:[%s6575_s0 + $0x328] sm:$0x7f] }
 0x257   :  { %v92_v4 = vld [vmem:[%s6577_s2 + $0x270] sm:$0x7f] }
 0x258   :  { %1809 = vst.msk [vmem:[%s6578_s3 + $0x250] sm:$0x7f] %vm1734_vm0, %v1464_v61  ;;  %v1468_v17 = vadd.f32 %v1124_v8, %v92_v4  ;;  %v791_v61 = vld [vmem:[%s6576_s1 + $0x2c8] sm:$0x7f] }
 0x259   :  { %v1135_v63 = vadd.f32 %v791_v61, %v447_v60  ;;  %v460_v61 = vld [vmem:[%s6575_s0 + $0x330] sm:$0x7f] }
 0x25f   :  { %v93_v9 = vld [vmem:[%s6577_s2 + $0x278] sm:$0x7f] }
 0x260   :  { %1810 = vst.msk [vmem:[%s6578_s3 + $0x258] sm:$0x7f] %vm1734_vm0, %v1465_v2  ;;  %v1469_v22 = vadd.f32 %v1125_v13, %v93_v9  ;;  %v792_v2 = vld [vmem:[%s6576_s1 + $0x2d0] sm:$0x7f] }
 0x261   :  { %v1136_v4 = vadd.f32 %v792_v2, %v448_v1  ;;  %v461_v2 = vld [vmem:[%s6575_s0 + $0x338] sm:$0x7f] }
 0x267   :  { %v94_v14 = vld [vmem:[%s6577_s2 + $0x280] sm:$0x7f] }
 0x268   :  { %1811 = vst.msk [vmem:[%s6578_s3 + $0x260] sm:$0x7f] %vm1734_vm0, %v1466_v7  ;;  %v1470_v27 = vadd.f32 %v1126_v18, %v94_v14  ;;  %v793_v7 = vld [vmem:[%s6576_s1 + $0x2d8] sm:$0x7f] }
 0x269   :  { %v1137_v9 = vadd.f32 %v793_v7, %v449_v6  ;;  %v462_v7 = vld [vmem:[%s6575_s0 + $0x340] sm:$0x7f] }
 0x26f   :  { %v95_v19 = vld [vmem:[%s6577_s2 + $0x288] sm:$0x7f] }
 0x270   :  { %1812 = vst.msk [vmem:[%s6578_s3 + $0x268] sm:$0x7f] %vm1734_vm0, %v1467_v12  ;;  %v1471_v32 = vadd.f32 %v1127_v23, %v95_v19  ;;  %v794_v12 = vld [vmem:[%s6576_s1 + $0x2e0] sm:$0x7f] }
 0x271   :  { %v1138_v14 = vadd.f32 %v794_v12, %v450_v11  ;;  %v463_v12 = vld [vmem:[%s6575_s0 + $0x348] sm:$0x7f] }
 0x277   :  { %v96_v24 = vld [vmem:[%s6577_s2 + $0x290] sm:$0x7f] }
 0x278   :  { %1813 = vst.msk [vmem:[%s6578_s3 + $0x270] sm:$0x7f] %vm1734_vm0, %v1468_v17  ;;  %v1472_v37 = vadd.f32 %v1128_v28, %v96_v24  ;;  %v795_v17 = vld [vmem:[%s6576_s1 + $0x2e8] sm:$0x7f] }
 0x279   :  { %v1139_v19 = vadd.f32 %v795_v17, %v451_v16  ;;  %v464_v17 = vld [vmem:[%s6575_s0 + $0x350] sm:$0x7f] }
 0x27f   :  { %v97_v29 = vld [vmem:[%s6577_s2 + $0x298] sm:$0x7f] }
 0x280   :  { %1814 = vst.msk [vmem:[%s6578_s3 + $0x278] sm:$0x7f] %vm1734_vm0, %v1469_v22  ;;  %v1473_v42 = vadd.f32 %v1129_v33, %v97_v29  ;;  %v796_v22 = vld [vmem:[%s6576_s1 + $0x2f0] sm:$0x7f] }
 0x281   :  { %v1140_v24 = vadd.f32 %v796_v22, %v452_v21  ;;  %v465_v22 = vld [vmem:[%s6575_s0 + $0x358] sm:$0x7f] }
 0x287   :  { %v98_v34 = vld [vmem:[%s6577_s2 + $0x2a0] sm:$0x7f] }
 0x288   :  { %1815 = vst.msk [vmem:[%s6578_s3 + $0x280] sm:$0x7f] %vm1734_vm0, %v1470_v27  ;;  %v1474_v47 = vadd.f32 %v1130_v38, %v98_v34  ;;  %v797_v27 = vld [vmem:[%s6576_s1 + $0x2f8] sm:$0x7f] }
 0x289   :  { %v1141_v29 = vadd.f32 %v797_v27, %v453_v26  ;;  %v466_v27 = vld [vmem:[%s6575_s0 + $0x360] sm:$0x7f] }
 0x28f   :  { %v99_v39 = vld [vmem:[%s6577_s2 + $0x2a8] sm:$0x7f] }
 0x290   :  { %1816 = vst.msk [vmem:[%s6578_s3 + $0x288] sm:$0x7f] %vm1734_vm0, %v1471_v32  ;;  %v1475_v52 = vadd.f32 %v1131_v43, %v99_v39  ;;  %v798_v32 = vld [vmem:[%s6576_s1 + $0x300] sm:$0x7f] }
 0x291   :  { %v1142_v34 = vadd.f32 %v798_v32, %v454_v31  ;;  %v467_v32 = vld [vmem:[%s6575_s0 + $0x368] sm:$0x7f] }
 0x297   :  { %v100_v44 = vld [vmem:[%s6577_s2 + $0x2b0] sm:$0x7f] }
 0x298   :  { %1817 = vst.msk [vmem:[%s6578_s3 + $0x290] sm:$0x7f] %vm1734_vm0, %v1472_v37  ;;  %v1476_v57 = vadd.f32 %v1132_v48, %v100_v44  ;;  %v799_v37 = vld [vmem:[%s6576_s1 + $0x308] sm:$0x7f] }
 0x299   :  { %v1143_v39 = vadd.f32 %v799_v37, %v455_v36  ;;  %v468_v37 = vld [vmem:[%s6575_s0 + $0x370] sm:$0x7f] }
 0x29f   :  { %v101_v49 = vld [vmem:[%s6577_s2 + $0x2b8] sm:$0x7f] }
 0x2a0   :  { %1818 = vst.msk [vmem:[%s6578_s3 + $0x298] sm:$0x7f] %vm1734_vm0, %v1473_v42  ;;  %v1477_v62 = vadd.f32 %v1133_v53, %v101_v49  ;;  %v800_v42 = vld [vmem:[%s6576_s1 + $0x310] sm:$0x7f] }
 0x2a1   :  { %v1144_v44 = vadd.f32 %v800_v42, %v456_v41  ;;  %v469_v42 = vld [vmem:[%s6575_s0 + $0x378] sm:$0x7f] }
 0x2a7   :  { %v102_v54 = vld [vmem:[%s6577_s2 + $0x2c0] sm:$0x7f] }
 0x2a8   :  { %1819 = vst.msk [vmem:[%s6578_s3 + $0x2a0] sm:$0x7f] %vm1734_vm0, %v1474_v47  ;;  %v1478_v3 = vadd.f32 %v1134_v58, %v102_v54  ;;  %v801_v47 = vld [vmem:[%s6576_s1 + $0x318] sm:$0x7f] }
 0x2a9   :  { %v1145_v49 = vadd.f32 %v801_v47, %v457_v46  ;;  %v470_v47 = vld [vmem:[%s6575_s0 + $0x380] sm:$0x7f] }
 0x2af   :  { %v103_v59 = vld [vmem:[%s6577_s2 + $0x2c8] sm:$0x7f] }
 0x2b0   :  { %1820 = vst.msk [vmem:[%s6578_s3 + $0x2a8] sm:$0x7f] %vm1734_vm0, %v1475_v52  ;;  %v1479_v8 = vadd.f32 %v1135_v63, %v103_v59  ;;  %v802_v52 = vld [vmem:[%s6576_s1 + $0x320] sm:$0x7f] }
 0x2b1   :  { %v1146_v54 = vadd.f32 %v802_v52, %v458_v51  ;;  %v471_v52 = vld [vmem:[%s6575_s0 + $0x388] sm:$0x7f] }
 0x2b7   :  { %v104_v0 = vld [vmem:[%s6577_s2 + $0x2d0] sm:$0x7f] }
 0x2b8   :  { %1821 = vst.msk [vmem:[%s6578_s3 + $0x2b0] sm:$0x7f] %vm1734_vm0, %v1476_v57  ;;  %v1480_v13 = vadd.f32 %v1136_v4, %v104_v0  ;;  %v803_v57 = vld [vmem:[%s6576_s1 + $0x328] sm:$0x7f] }
 0x2b9   :  { %v1147_v59 = vadd.f32 %v803_v57, %v459_v56  ;;  %v472_v57 = vld [vmem:[%s6575_s0 + $0x390] sm:$0x7f] }
 0x2bf   :  { %v105_v5 = vld [vmem:[%s6577_s2 + $0x2d8] sm:$0x7f] }
 0x2c0   :  { %1822 = vst.msk [vmem:[%s6578_s3 + $0x2b8] sm:$0x7f] %vm1734_vm0, %v1477_v62  ;;  %v1481_v18 = vadd.f32 %v1137_v9, %v105_v5  ;;  %v804_v62 = vld [vmem:[%s6576_s1 + $0x330] sm:$0x7f] }
 0x2c1   :  { %v1148_v0 = vadd.f32 %v804_v62, %v460_v61  ;;  %v473_v62 = vld [vmem:[%s6575_s0 + $0x398] sm:$0x7f] }
 0x2c7   :  { %v106_v10 = vld [vmem:[%s6577_s2 + $0x2e0] sm:$0x7f] }
 0x2c8   :  { %1823 = vst.msk [vmem:[%s6578_s3 + $0x2c0] sm:$0x7f] %vm1734_vm0, %v1478_v3  ;;  %v1482_v23 = vadd.f32 %v1138_v14, %v106_v10  ;;  %v805_v3 = vld [vmem:[%s6576_s1 + $0x338] sm:$0x7f] }
 0x2c9   :  { %v1149_v5 = vadd.f32 %v805_v3, %v461_v2  ;;  %v474_v3 = vld [vmem:[%s6575_s0 + $0x3a0] sm:$0x7f] }
 0x2cf   :  { %v107_v15 = vld [vmem:[%s6577_s2 + $0x2e8] sm:$0x7f] }
 0x2d0   :  { %1824 = vst.msk [vmem:[%s6578_s3 + $0x2c8] sm:$0x7f] %vm1734_vm0, %v1479_v8  ;;  %v1483_v28 = vadd.f32 %v1139_v19, %v107_v15  ;;  %v806_v8 = vld [vmem:[%s6576_s1 + $0x340] sm:$0x7f] }
 0x2d1   :  { %v1150_v10 = vadd.f32 %v806_v8, %v462_v7  ;;  %v475_v8 = vld [vmem:[%s6575_s0 + $0x3a8] sm:$0x7f] }
 0x2d7   :  { %v108_v20 = vld [vmem:[%s6577_s2 + $0x2f0] sm:$0x7f] }
 0x2d8   :  { %1825 = vst.msk [vmem:[%s6578_s3 + $0x2d0] sm:$0x7f] %vm1734_vm0, %v1480_v13  ;;  %v1484_v33 = vadd.f32 %v1140_v24, %v108_v20  ;;  %v807_v13 = vld [vmem:[%s6576_s1 + $0x348] sm:$0x7f] }
 0x2d9   :  { %v1151_v15 = vadd.f32 %v807_v13, %v463_v12  ;;  %v476_v13 = vld [vmem:[%s6575_s0 + $0x3b0] sm:$0x7f] }
 0x2df   :  { %v109_v25 = vld [vmem:[%s6577_s2 + $0x2f8] sm:$0x7f] }
 0x2e0   :  { %1826 = vst.msk [vmem:[%s6578_s3 + $0x2d8] sm:$0x7f] %vm1734_vm0, %v1481_v18  ;;  %v1485_v38 = vadd.f32 %v1141_v29, %v109_v25  ;;  %v808_v18 = vld [vmem:[%s6576_s1 + $0x350] sm:$0x7f] }
 0x2e1   :  { %v1152_v20 = vadd.f32 %v808_v18, %v464_v17  ;;  %v477_v18 = vld [vmem:[%s6575_s0 + $0x3b8] sm:$0x7f] }
 0x2e7   :  { %v110_v30 = vld [vmem:[%s6577_s2 + $0x300] sm:$0x7f] }
 0x2e8   :  { %1827 = vst.msk [vmem:[%s6578_s3 + $0x2e0] sm:$0x7f] %vm1734_vm0, %v1482_v23  ;;  %v1486_v43 = vadd.f32 %v1142_v34, %v110_v30  ;;  %v809_v23 = vld [vmem:[%s6576_s1 + $0x358] sm:$0x7f] }
 0x2e9   :  { %v1153_v25 = vadd.f32 %v809_v23, %v465_v22  ;;  %v478_v23 = vld [vmem:[%s6575_s0 + $0x3c0] sm:$0x7f] }
 0x2ef   :  { %v111_v35 = vld [vmem:[%s6577_s2 + $0x308] sm:$0x7f] }
 0x2f0   :  { %1828 = vst.msk [vmem:[%s6578_s3 + $0x2e8] sm:$0x7f] %vm1734_vm0, %v1483_v28  ;;  %v1487_v48 = vadd.f32 %v1143_v39, %v111_v35  ;;  %v810_v28 = vld [vmem:[%s6576_s1 + $0x360] sm:$0x7f] }
 0x2f1   :  { %v1154_v30 = vadd.f32 %v810_v28, %v466_v27  ;;  %v479_v28 = vld [vmem:[%s6575_s0 + $0x3c8] sm:$0x7f] }
 0x2f7   :  { %v112_v40 = vld [vmem:[%s6577_s2 + $0x310] sm:$0x7f] }
 0x2f8   :  { %1829 = vst.msk [vmem:[%s6578_s3 + $0x2f0] sm:$0x7f] %vm1734_vm0, %v1484_v33  ;;  %v1488_v53 = vadd.f32 %v1144_v44, %v112_v40  ;;  %v811_v33 = vld [vmem:[%s6576_s1 + $0x368] sm:$0x7f] }
 0x2f9   :  { %v1155_v35 = vadd.f32 %v811_v33, %v467_v32  ;;  %v480_v33 = vld [vmem:[%s6575_s0 + $0x3d0] sm:$0x7f] }
 0x2ff   :  { %v113_v45 = vld [vmem:[%s6577_s2 + $0x318] sm:$0x7f] }
 0x300   :  { %1830 = vst.msk [vmem:[%s6578_s3 + $0x2f8] sm:$0x7f] %vm1734_vm0, %v1485_v38  ;;  %v1489_v58 = vadd.f32 %v1145_v49, %v113_v45  ;;  %v812_v38 = vld [vmem:[%s6576_s1 + $0x370] sm:$0x7f] }
 0x301   :  { %v1156_v40 = vadd.f32 %v812_v38, %v468_v37  ;;  %v481_v38 = vld [vmem:[%s6575_s0 + $0x3d8] sm:$0x7f] }
 0x307   :  { %v114_v50 = vld [vmem:[%s6577_s2 + $0x320] sm:$0x7f] }
 0x308   :  { %1831 = vst.msk [vmem:[%s6578_s3 + $0x300] sm:$0x7f] %vm1734_vm0, %v1486_v43  ;;  %v1490_v63 = vadd.f32 %v1146_v54, %v114_v50  ;;  %v813_v43 = vld [vmem:[%s6576_s1 + $0x378] sm:$0x7f] }
 0x309   :  { %v1157_v45 = vadd.f32 %v813_v43, %v469_v42  ;;  %v482_v43 = vld [vmem:[%s6575_s0 + $0x3e0] sm:$0x7f] }
 0x30f   :  { %v115_v55 = vld [vmem:[%s6577_s2 + $0x328] sm:$0x7f] }
 0x310   :  { %1832 = vst.msk [vmem:[%s6578_s3 + $0x308] sm:$0x7f] %vm1734_vm0, %v1487_v48  ;;  %v1491_v4 = vadd.f32 %v1147_v59, %v115_v55  ;;  %v814_v48 = vld [vmem:[%s6576_s1 + $0x380] sm:$0x7f] }
 0x311   :  { %v1158_v50 = vadd.f32 %v814_v48, %v470_v47  ;;  %v483_v48 = vld [vmem:[%s6575_s0 + $0x3e8] sm:$0x7f] }
 0x317   :  { %v116_v60 = vld [vmem:[%s6577_s2 + $0x330] sm:$0x7f] }
 0x318   :  { %1833 = vst.msk [vmem:[%s6578_s3 + $0x310] sm:$0x7f] %vm1734_vm0, %v1488_v53  ;;  %v1492_v9 = vadd.f32 %v1148_v0, %v116_v60  ;;  %v815_v53 = vld [vmem:[%s6576_s1 + $0x388] sm:$0x7f] }
 0x319   :  { %v1159_v55 = vadd.f32 %v815_v53, %v471_v52  ;;  %v484_v53 = vld [vmem:[%s6575_s0 + $0x3f0] sm:$0x7f] }
 0x31f   :  { %v117_v1 = vld [vmem:[%s6577_s2 + $0x338] sm:$0x7f] }
 0x320   :  { %1834 = vst.msk [vmem:[%s6578_s3 + $0x318] sm:$0x7f] %vm1734_vm0, %v1489_v58  ;;  %v1493_v14 = vadd.f32 %v1149_v5, %v117_v1  ;;  %v816_v58 = vld [vmem:[%s6576_s1 + $0x390] sm:$0x7f] }
 0x321   :  { %v1160_v60 = vadd.f32 %v816_v58, %v472_v57  ;;  %v485_v58 = vld [vmem:[%s6575_s0 + $0x3f8] sm:$0x7f] }
 0x327   :  { %v118_v6 = vld [vmem:[%s6577_s2 + $0x340] sm:$0x7f] }
 0x328   :  { %1835 = vst.msk [vmem:[%s6578_s3 + $0x320] sm:$0x7f] %vm1734_vm0, %v1490_v63  ;;  %v1494_v19 = vadd.f32 %v1150_v10, %v118_v6  ;;  %v817_v63 = vld [vmem:[%s6576_s1 + $0x398] sm:$0x7f] }
 0x329   :  { %v1161_v1 = vadd.f32 %v817_v63, %v473_v62  ;;  %v486_v63 = vld [vmem:[%s6575_s0 + $0x400] sm:$0x7f] }
 0x32f   :  { %v119_v11 = vld [vmem:[%s6577_s2 + $0x348] sm:$0x7f] }
 0x330   :  { %1836 = vst.msk [vmem:[%s6578_s3 + $0x328] sm:$0x7f] %vm1734_vm0, %v1491_v4  ;;  %v1495_v24 = vadd.f32 %v1151_v15, %v119_v11  ;;  %v818_v4 = vld [vmem:[%s6576_s1 + $0x3a0] sm:$0x7f] }
 0x331   :  { %v1162_v6 = vadd.f32 %v818_v4, %v474_v3  ;;  %v487_v4 = vld [vmem:[%s6575_s0 + $0x408] sm:$0x7f] }
 0x337   :  { %v120_v16 = vld [vmem:[%s6577_s2 + $0x350] sm:$0x7f] }
 0x338   :  { %1837 = vst.msk [vmem:[%s6578_s3 + $0x330] sm:$0x7f] %vm1734_vm0, %v1492_v9  ;;  %v1496_v29 = vadd.f32 %v1152_v20, %v120_v16  ;;  %v819_v9 = vld [vmem:[%s6576_s1 + $0x3a8] sm:$0x7f] }
 0x339   :  { %v1163_v11 = vadd.f32 %v819_v9, %v475_v8  ;;  %v488_v9 = vld [vmem:[%s6575_s0 + $0x410] sm:$0x7f] }
 0x33f   :  { %v121_v21 = vld [vmem:[%s6577_s2 + $0x358] sm:$0x7f] }
 0x340   :  { %1838 = vst.msk [vmem:[%s6578_s3 + $0x338] sm:$0x7f] %vm1734_vm0, %v1493_v14  ;;  %v1497_v34 = vadd.f32 %v1153_v25, %v121_v21  ;;  %v820_v14 = vld [vmem:[%s6576_s1 + $0x3b0] sm:$0x7f] }
 0x341   :  { %v1164_v16 = vadd.f32 %v820_v14, %v476_v13  ;;  %v489_v14 = vld [vmem:[%s6575_s0 + $0x418] sm:$0x7f] }
 0x347   :  { %v122_v26 = vld [vmem:[%s6577_s2 + $0x360] sm:$0x7f] }
 0x348   :  { %1839 = vst.msk [vmem:[%s6578_s3 + $0x340] sm:$0x7f] %vm1734_vm0, %v1494_v19  ;;  %v1498_v39 = vadd.f32 %v1154_v30, %v122_v26  ;;  %v821_v19 = vld [vmem:[%s6576_s1 + $0x3b8] sm:$0x7f] }
 0x349   :  { %v1165_v21 = vadd.f32 %v821_v19, %v477_v18  ;;  %v490_v19 = vld [vmem:[%s6575_s0 + $0x420] sm:$0x7f] }
 0x34f   :  { %v123_v31 = vld [vmem:[%s6577_s2 + $0x368] sm:$0x7f] }
 0x350   :  { %1840 = vst.msk [vmem:[%s6578_s3 + $0x348] sm:$0x7f] %vm1734_vm0, %v1495_v24  ;;  %v1499_v44 = vadd.f32 %v1155_v35, %v123_v31  ;;  %v822_v24 = vld [vmem:[%s6576_s1 + $0x3c0] sm:$0x7f] }
 0x351   :  { %v1166_v26 = vadd.f32 %v822_v24, %v478_v23  ;;  %v491_v24 = vld [vmem:[%s6575_s0 + $0x428] sm:$0x7f] }
 0x357   :  { %v124_v36 = vld [vmem:[%s6577_s2 + $0x370] sm:$0x7f] }
 0x358   :  { %1841 = vst.msk [vmem:[%s6578_s3 + $0x350] sm:$0x7f] %vm1734_vm0, %v1496_v29  ;;  %v1500_v49 = vadd.f32 %v1156_v40, %v124_v36  ;;  %v823_v29 = vld [vmem:[%s6576_s1 + $0x3c8] sm:$0x7f] }
 0x359   :  { %v1167_v31 = vadd.f32 %v823_v29, %v479_v28  ;;  %v492_v29 = vld [vmem:[%s6575_s0 + $0x430] sm:$0x7f] }
 0x35f   :  { %v125_v41 = vld [vmem:[%s6577_s2 + $0x378] sm:$0x7f] }
 0x360   :  { %1842 = vst.msk [vmem:[%s6578_s3 + $0x358] sm:$0x7f] %vm1734_vm0, %v1497_v34  ;;  %v1501_v54 = vadd.f32 %v1157_v45, %v125_v41  ;;  %v824_v34 = vld [vmem:[%s6576_s1 + $0x3d0] sm:$0x7f] }
 0x361   :  { %v1168_v36 = vadd.f32 %v824_v34, %v480_v33  ;;  %v493_v34 = vld [vmem:[%s6575_s0 + $0x438] sm:$0x7f] }
 0x367   :  { %v126_v46 = vld [vmem:[%s6577_s2 + $0x380] sm:$0x7f] }
 0x368   :  { %1843 = vst.msk [vmem:[%s6578_s3 + $0x360] sm:$0x7f] %vm1734_vm0, %v1498_v39  ;;  %v1502_v59 = vadd.f32 %v1158_v50, %v126_v46  ;;  %v825_v39 = vld [vmem:[%s6576_s1 + $0x3d8] sm:$0x7f] }
 0x369   :  { %v1169_v41 = vadd.f32 %v825_v39, %v481_v38  ;;  %v494_v39 = vld [vmem:[%s6575_s0 + $0x440] sm:$0x7f] }
 0x36f   :  { %v127_v51 = vld [vmem:[%s6577_s2 + $0x388] sm:$0x7f] }
 0x370   :  { %1844 = vst.msk [vmem:[%s6578_s3 + $0x368] sm:$0x7f] %vm1734_vm0, %v1499_v44  ;;  %v1503_v0 = vadd.f32 %v1159_v55, %v127_v51  ;;  %v826_v44 = vld [vmem:[%s6576_s1 + $0x3e0] sm:$0x7f] }
 0x371   :  { %v1170_v46 = vadd.f32 %v826_v44, %v482_v43  ;;  %v495_v44 = vld [vmem:[%s6575_s0 + $0x448] sm:$0x7f] }
 0x377   :  { %v128_v56 = vld [vmem:[%s6577_s2 + $0x390] sm:$0x7f] }
 0x378   :  { %1845 = vst.msk [vmem:[%s6578_s3 + $0x370] sm:$0x7f] %vm1734_vm0, %v1500_v49  ;;  %v1504_v5 = vadd.f32 %v1160_v60, %v128_v56  ;;  %v827_v49 = vld [vmem:[%s6576_s1 + $0x3e8] sm:$0x7f] }
 0x379   :  { %v1171_v51 = vadd.f32 %v827_v49, %v483_v48  ;;  %v496_v49 = vld [vmem:[%s6575_s0 + $0x450] sm:$0x7f] }
 0x37f   :  { %v129_v61 = vld [vmem:[%s6577_s2 + $0x398] sm:$0x7f] }
 0x380   :  { %1846 = vst.msk [vmem:[%s6578_s3 + $0x378] sm:$0x7f] %vm1734_vm0, %v1501_v54  ;;  %v1505_v10 = vadd.f32 %v1161_v1, %v129_v61  ;;  %v828_v54 = vld [vmem:[%s6576_s1 + $0x3f0] sm:$0x7f] }
 0x381   :  { %v1172_v56 = vadd.f32 %v828_v54, %v484_v53  ;;  %v497_v54 = vld [vmem:[%s6575_s0 + $0x458] sm:$0x7f] }
 0x387   :  { %v130_v2 = vld [vmem:[%s6577_s2 + $0x3a0] sm:$0x7f] }
 0x388   :  { %1847 = vst.msk [vmem:[%s6578_s3 + $0x380] sm:$0x7f] %vm1734_vm0, %v1502_v59  ;;  %v1506_v15 = vadd.f32 %v1162_v6, %v130_v2  ;;  %v829_v59 = vld [vmem:[%s6576_s1 + $0x3f8] sm:$0x7f] }
 0x389   :  { %v1173_v61 = vadd.f32 %v829_v59, %v485_v58  ;;  %v498_v59 = vld [vmem:[%s6575_s0 + $0x460] sm:$0x7f] }
 0x38f   :  { %v131_v7 = vld [vmem:[%s6577_s2 + $0x3a8] sm:$0x7f] }
 0x390   :  { %1848 = vst.msk [vmem:[%s6578_s3 + $0x388] sm:$0x7f] %vm1734_vm0, %v1503_v0  ;;  %v1507_v20 = vadd.f32 %v1163_v11, %v131_v7  ;;  %v830_v0 = vld [vmem:[%s6576_s1 + $0x400] sm:$0x7f] }
 0x391   :  { %v1174_v2 = vadd.f32 %v830_v0, %v486_v63  ;;  %v499_v0 = vld [vmem:[%s6575_s0 + $0x468] sm:$0x7f] }
 0x397   :  { %v132_v12 = vld [vmem:[%s6577_s2 + $0x3b0] sm:$0x7f] }
 0x398   :  { %1849 = vst.msk [vmem:[%s6578_s3 + $0x390] sm:$0x7f] %vm1734_vm0, %v1504_v5  ;;  %v1508_v25 = vadd.f32 %v1164_v16, %v132_v12  ;;  %v831_v5 = vld [vmem:[%s6576_s1 + $0x408] sm:$0x7f] }
 0x399   :  { %v1175_v7 = vadd.f32 %v831_v5, %v487_v4  ;;  %v500_v5 = vld [vmem:[%s6575_s0 + $0x470] sm:$0x7f] }
 0x39f   :  { %v133_v17 = vld [vmem:[%s6577_s2 + $0x3b8] sm:$0x7f] }
 0x3a0   :  { %1850 = vst.msk [vmem:[%s6578_s3 + $0x398] sm:$0x7f] %vm1734_vm0, %v1505_v10  ;;  %v1509_v30 = vadd.f32 %v1165_v21, %v133_v17  ;;  %v832_v10 = vld [vmem:[%s6576_s1 + $0x410] sm:$0x7f] }
 0x3a1   :  { %v1176_v12 = vadd.f32 %v832_v10, %v488_v9  ;;  %v501_v10 = vld [vmem:[%s6575_s0 + $0x478] sm:$0x7f] }
 0x3a7   :  { %v134_v22 = vld [vmem:[%s6577_s2 + $0x3c0] sm:$0x7f] }
 0x3a8   :  { %1851 = vst.msk [vmem:[%s6578_s3 + $0x3a0] sm:$0x7f] %vm1734_vm0, %v1506_v15  ;;  %v1510_v35 = vadd.f32 %v1166_v26, %v134_v22  ;;  %v833_v15 = vld [vmem:[%s6576_s1 + $0x418] sm:$0x7f] }
 0x3a9   :  { %v1177_v17 = vadd.f32 %v833_v15, %v489_v14  ;;  %v502_v15 = vld [vmem:[%s6575_s0 + $0x480] sm:$0x7f] }
 0x3af   :  { %v135_v27 = vld [vmem:[%s6577_s2 + $0x3c8] sm:$0x7f] }
 0x3b0   :  { %1852 = vst.msk [vmem:[%s6578_s3 + $0x3a8] sm:$0x7f] %vm1734_vm0, %v1507_v20  ;;  %v1511_v40 = vadd.f32 %v1167_v31, %v135_v27  ;;  %v834_v20 = vld [vmem:[%s6576_s1 + $0x420] sm:$0x7f] }
 0x3b1   :  { %v1178_v22 = vadd.f32 %v834_v20, %v490_v19  ;;  %v503_v20 = vld [vmem:[%s6575_s0 + $0x488] sm:$0x7f] }
 0x3b7   :  { %v136_v32 = vld [vmem:[%s6577_s2 + $0x3d0] sm:$0x7f] }
 0x3b8   :  { %1853 = vst.msk [vmem:[%s6578_s3 + $0x3b0] sm:$0x7f] %vm1734_vm0, %v1508_v25  ;;  %v1512_v45 = vadd.f32 %v1168_v36, %v136_v32  ;;  %v835_v25 = vld [vmem:[%s6576_s1 + $0x428] sm:$0x7f] }
 0x3b9   :  { %v1179_v27 = vadd.f32 %v835_v25, %v491_v24  ;;  %v504_v25 = vld [vmem:[%s6575_s0 + $0x490] sm:$0x7f] }
 0x3bf   :  { %v137_v37 = vld [vmem:[%s6577_s2 + $0x3d8] sm:$0x7f] }
 0x3c0   :  { %1854 = vst.msk [vmem:[%s6578_s3 + $0x3b8] sm:$0x7f] %vm1734_vm0, %v1509_v30  ;;  %v1513_v50 = vadd.f32 %v1169_v41, %v137_v37  ;;  %v836_v30 = vld [vmem:[%s6576_s1 + $0x430] sm:$0x7f] }
 0x3c1   :  { %v1180_v32 = vadd.f32 %v836_v30, %v492_v29  ;;  %v505_v30 = vld [vmem:[%s6575_s0 + $0x498] sm:$0x7f] }
 0x3c7   :  { %v138_v42 = vld [vmem:[%s6577_s2 + $0x3e0] sm:$0x7f] }
 0x3c8   :  { %1855 = vst.msk [vmem:[%s6578_s3 + $0x3c0] sm:$0x7f] %vm1734_vm0, %v1510_v35  ;;  %v1514_v55 = vadd.f32 %v1170_v46, %v138_v42  ;;  %v837_v35 = vld [vmem:[%s6576_s1 + $0x438] sm:$0x7f] }
 0x3c9   :  { %v1181_v37 = vadd.f32 %v837_v35, %v493_v34  ;;  %v506_v35 = vld [vmem:[%s6575_s0 + $0x4a0] sm:$0x7f] }
 0x3cf   :  { %v139_v47 = vld [vmem:[%s6577_s2 + $0x3e8] sm:$0x7f] }
 0x3d0   :  { %1856 = vst.msk [vmem:[%s6578_s3 + $0x3c8] sm:$0x7f] %vm1734_vm0, %v1511_v40  ;;  %v1515_v60 = vadd.f32 %v1171_v51, %v139_v47  ;;  %v838_v40 = vld [vmem:[%s6576_s1 + $0x440] sm:$0x7f] }
 0x3d1   :  { %v1182_v42 = vadd.f32 %v838_v40, %v494_v39  ;;  %v507_v40 = vld [vmem:[%s6575_s0 + $0x4a8] sm:$0x7f] }
 0x3d7   :  { %v140_v52 = vld [vmem:[%s6577_s2 + $0x3f0] sm:$0x7f] }
 0x3d8   :  { %1857 = vst.msk [vmem:[%s6578_s3 + $0x3d0] sm:$0x7f] %vm1734_vm0, %v1512_v45  ;;  %v1516_v1 = vadd.f32 %v1172_v56, %v140_v52  ;;  %v839_v45 = vld [vmem:[%s6576_s1 + $0x448] sm:$0x7f] }
 0x3d9   :  { %v1183_v47 = vadd.f32 %v839_v45, %v495_v44  ;;  %v508_v45 = vld [vmem:[%s6575_s0 + $0x4b0] sm:$0x7f] }
 0x3df   :  { %v141_v57 = vld [vmem:[%s6577_s2 + $0x3f8] sm:$0x7f] }
 0x3e0   :  { %1858 = vst.msk [vmem:[%s6578_s3 + $0x3d8] sm:$0x7f] %vm1734_vm0, %v1513_v50  ;;  %v1517_v6 = vadd.f32 %v1173_v61, %v141_v57  ;;  %v840_v50 = vld [vmem:[%s6576_s1 + $0x450] sm:$0x7f] }
 0x3e1   :  { %v1184_v52 = vadd.f32 %v840_v50, %v496_v49  ;;  %v509_v50 = vld [vmem:[%s6575_s0 + $0x4b8] sm:$0x7f] }
 0x3e7   :  { %v142_v62 = vld [vmem:[%s6577_s2 + $0x400] sm:$0x7f] }
 0x3e8   :  { %1859 = vst.msk [vmem:[%s6578_s3 + $0x3e0] sm:$0x7f] %vm1734_vm0, %v1514_v55  ;;  %v1518_v11 = vadd.f32 %v1174_v2, %v142_v62  ;;  %v841_v55 = vld [vmem:[%s6576_s1 + $0x458] sm:$0x7f] }
 0x3e9   :  { %v1185_v57 = vadd.f32 %v841_v55, %v497_v54  ;;  %v510_v55 = vld [vmem:[%s6575_s0 + $0x4c0] sm:$0x7f] }
 0x3ef   :  { %v143_v3 = vld [vmem:[%s6577_s2 + $0x408] sm:$0x7f] }
 0x3f0   :  { %1860 = vst.msk [vmem:[%s6578_s3 + $0x3e8] sm:$0x7f] %vm1734_vm0, %v1515_v60  ;;  %v1519_v16 = vadd.f32 %v1175_v7, %v143_v3  ;;  %v842_v60 = vld [vmem:[%s6576_s1 + $0x460] sm:$0x7f] }
 0x3f1   :  { %v1186_v62 = vadd.f32 %v842_v60, %v498_v59  ;;  %v511_v60 = vld [vmem:[%s6575_s0 + $0x4c8] sm:$0x7f] }
 0x3f7   :  { %v144_v8 = vld [vmem:[%s6577_s2 + $0x410] sm:$0x7f] }
 0x3f8   :  { %1861 = vst.msk [vmem:[%s6578_s3 + $0x3f0] sm:$0x7f] %vm1734_vm0, %v1516_v1  ;;  %v1520_v21 = vadd.f32 %v1176_v12, %v144_v8  ;;  %v843_v1 = vld [vmem:[%s6576_s1 + $0x468] sm:$0x7f] }
 0x3f9   :  { %v1187_v3 = vadd.f32 %v843_v1, %v499_v0  ;;  %v512_v1 = vld [vmem:[%s6575_s0 + $0x4d0] sm:$0x7f] }
 0x3ff   :  { %v145_v13 = vld [vmem:[%s6577_s2 + $0x418] sm:$0x7f] }
 0x400   :  { %1862 = vst.msk [vmem:[%s6578_s3 + $0x3f8] sm:$0x7f] %vm1734_vm0, %v1517_v6  ;;  %v1521_v26 = vadd.f32 %v1177_v17, %v145_v13  ;;  %v844_v6 = vld [vmem:[%s6576_s1 + $0x470] sm:$0x7f] }
 0x401   :  { %v1188_v8 = vadd.f32 %v844_v6, %v500_v5  ;;  %v513_v6 = vld [vmem:[%s6575_s0 + $0x4d8] sm:$0x7f] }
 0x407   :  { %v146_v18 = vld [vmem:[%s6577_s2 + $0x420] sm:$0x7f] }
 0x408   :  { %1863 = vst.msk [vmem:[%s6578_s3 + $0x400] sm:$0x7f] %vm1734_vm0, %v1518_v11  ;;  %v1522_v31 = vadd.f32 %v1178_v22, %v146_v18  ;;  %v845_v11 = vld [vmem:[%s6576_s1 + $0x478] sm:$0x7f] }
 0x409   :  { %v1189_v13 = vadd.f32 %v845_v11, %v501_v10  ;;  %v514_v11 = vld [vmem:[%s6575_s0 + $0x4e0] sm:$0x7f] }
 0x40f   :  { %v147_v23 = vld [vmem:[%s6577_s2 + $0x428] sm:$0x7f] }
 0x410   :  { %1864 = vst.msk [vmem:[%s6578_s3 + $0x408] sm:$0x7f] %vm1734_vm0, %v1519_v16  ;;  %v1523_v36 = vadd.f32 %v1179_v27, %v147_v23  ;;  %v846_v16 = vld [vmem:[%s6576_s1 + $0x480] sm:$0x7f] }
 0x411   :  { %v1190_v18 = vadd.f32 %v846_v16, %v502_v15  ;;  %v515_v16 = vld [vmem:[%s6575_s0 + $0x4e8] sm:$0x7f] }
 0x417   :  { %v148_v28 = vld [vmem:[%s6577_s2 + $0x430] sm:$0x7f] }
 0x418   :  { %1865 = vst.msk [vmem:[%s6578_s3 + $0x410] sm:$0x7f] %vm1734_vm0, %v1520_v21  ;;  %v1524_v41 = vadd.f32 %v1180_v32, %v148_v28  ;;  %v847_v21 = vld [vmem:[%s6576_s1 + $0x488] sm:$0x7f] }
 0x419   :  { %v1191_v23 = vadd.f32 %v847_v21, %v503_v20  ;;  %v516_v21 = vld [vmem:[%s6575_s0 + $0x4f0] sm:$0x7f] }
 0x41f   :  { %v149_v33 = vld [vmem:[%s6577_s2 + $0x438] sm:$0x7f] }
 0x420   :  { %1866 = vst.msk [vmem:[%s6578_s3 + $0x418] sm:$0x7f] %vm1734_vm0, %v1521_v26  ;;  %v1525_v46 = vadd.f32 %v1181_v37, %v149_v33  ;;  %v848_v26 = vld [vmem:[%s6576_s1 + $0x490] sm:$0x7f] }
 0x421   :  { %v1192_v28 = vadd.f32 %v848_v26, %v504_v25  ;;  %v517_v26 = vld [vmem:[%s6575_s0 + $0x4f8] sm:$0x7f] }
 0x427   :  { %v150_v38 = vld [vmem:[%s6577_s2 + $0x440] sm:$0x7f] }
 0x428   :  { %1867 = vst.msk [vmem:[%s6578_s3 + $0x420] sm:$0x7f] %vm1734_vm0, %v1522_v31  ;;  %v1526_v51 = vadd.f32 %v1182_v42, %v150_v38  ;;  %v849_v31 = vld [vmem:[%s6576_s1 + $0x498] sm:$0x7f] }
 0x429   :  { %v1193_v33 = vadd.f32 %v849_v31, %v505_v30  ;;  %v518_v31 = vld [vmem:[%s6575_s0 + $0x500] sm:$0x7f] }
 0x42f   :  { %v151_v43 = vld [vmem:[%s6577_s2 + $0x448] sm:$0x7f] }
 0x430   :  { %1868 = vst.msk [vmem:[%s6578_s3 + $0x428] sm:$0x7f] %vm1734_vm0, %v1523_v36  ;;  %v1527_v56 = vadd.f32 %v1183_v47, %v151_v43  ;;  %v850_v36 = vld [vmem:[%s6576_s1 + $0x4a0] sm:$0x7f] }
 0x431   :  { %v1194_v38 = vadd.f32 %v850_v36, %v506_v35  ;;  %v519_v36 = vld [vmem:[%s6575_s0 + $0x508] sm:$0x7f] }
 0x437   :  { %v152_v48 = vld [vmem:[%s6577_s2 + $0x450] sm:$0x7f] }
 0x438   :  { %1869 = vst.msk [vmem:[%s6578_s3 + $0x430] sm:$0x7f] %vm1734_vm0, %v1524_v41  ;;  %v1528_v61 = vadd.f32 %v1184_v52, %v152_v48  ;;  %v851_v41 = vld [vmem:[%s6576_s1 + $0x4a8] sm:$0x7f] }
 0x439   :  { %v1195_v43 = vadd.f32 %v851_v41, %v507_v40  ;;  %v520_v41 = vld [vmem:[%s6575_s0 + $0x510] sm:$0x7f] }
 0x43f   :  { %v153_v53 = vld [vmem:[%s6577_s2 + $0x458] sm:$0x7f] }
 0x440   :  { %1870 = vst.msk [vmem:[%s6578_s3 + $0x438] sm:$0x7f] %vm1734_vm0, %v1525_v46  ;;  %v1529_v2 = vadd.f32 %v1185_v57, %v153_v53  ;;  %v852_v46 = vld [vmem:[%s6576_s1 + $0x4b0] sm:$0x7f] }
 0x441   :  { %v1196_v48 = vadd.f32 %v852_v46, %v508_v45  ;;  %v521_v46 = vld [vmem:[%s6575_s0 + $0x518] sm:$0x7f] }
 0x447   :  { %v154_v58 = vld [vmem:[%s6577_s2 + $0x460] sm:$0x7f] }
 0x448   :  { %1871 = vst.msk [vmem:[%s6578_s3 + $0x440] sm:$0x7f] %vm1734_vm0, %v1526_v51  ;;  %v1530_v7 = vadd.f32 %v1186_v62, %v154_v58  ;;  %v853_v51 = vld [vmem:[%s6576_s1 + $0x4b8] sm:$0x7f] }
 0x449   :  { %v1197_v53 = vadd.f32 %v853_v51, %v509_v50  ;;  %v522_v51 = vld [vmem:[%s6575_s0 + $0x520] sm:$0x7f] }
 0x44f   :  { %v155_v63 = vld [vmem:[%s6577_s2 + $0x468] sm:$0x7f] }
 0x450   :  { %1872 = vst.msk [vmem:[%s6578_s3 + $0x448] sm:$0x7f] %vm1734_vm0, %v1527_v56  ;;  %v1531_v12 = vadd.f32 %v1187_v3, %v155_v63  ;;  %v854_v56 = vld [vmem:[%s6576_s1 + $0x4c0] sm:$0x7f] }
 0x451   :  { %v1198_v58 = vadd.f32 %v854_v56, %v510_v55  ;;  %v523_v56 = vld [vmem:[%s6575_s0 + $0x528] sm:$0x7f] }
 0x457   :  { %v156_v4 = vld [vmem:[%s6577_s2 + $0x470] sm:$0x7f] }
 0x458   :  { %1873 = vst.msk [vmem:[%s6578_s3 + $0x450] sm:$0x7f] %vm1734_vm0, %v1528_v61  ;;  %v1532_v17 = vadd.f32 %v1188_v8, %v156_v4  ;;  %v855_v61 = vld [vmem:[%s6576_s1 + $0x4c8] sm:$0x7f] }
 0x459   :  { %v1199_v63 = vadd.f32 %v855_v61, %v511_v60  ;;  %v524_v61 = vld [vmem:[%s6575_s0 + $0x530] sm:$0x7f] }
 0x45f   :  { %v157_v9 = vld [vmem:[%s6577_s2 + $0x478] sm:$0x7f] }
 0x460   :  { %1874 = vst.msk [vmem:[%s6578_s3 + $0x458] sm:$0x7f] %vm1734_vm0, %v1529_v2  ;;  %v1533_v22 = vadd.f32 %v1189_v13, %v157_v9  ;;  %v856_v2 = vld [vmem:[%s6576_s1 + $0x4d0] sm:$0x7f] }
 0x461   :  { %v1200_v4 = vadd.f32 %v856_v2, %v512_v1  ;;  %v525_v2 = vld [vmem:[%s6575_s0 + $0x538] sm:$0x7f] }
 0x467   :  { %v158_v14 = vld [vmem:[%s6577_s2 + $0x480] sm:$0x7f] }
 0x468   :  { %1875 = vst.msk [vmem:[%s6578_s3 + $0x460] sm:$0x7f] %vm1734_vm0, %v1530_v7  ;;  %v1534_v27 = vadd.f32 %v1190_v18, %v158_v14  ;;  %v857_v7 = vld [vmem:[%s6576_s1 + $0x4d8] sm:$0x7f] }
 0x469   :  { %v1201_v9 = vadd.f32 %v857_v7, %v513_v6  ;;  %v526_v7 = vld [vmem:[%s6575_s0 + $0x540] sm:$0x7f] }
 0x46f   :  { %v159_v19 = vld [vmem:[%s6577_s2 + $0x488] sm:$0x7f] }
 0x470   :  { %1876 = vst.msk [vmem:[%s6578_s3 + $0x468] sm:$0x7f] %vm1734_vm0, %v1531_v12  ;;  %v1535_v32 = vadd.f32 %v1191_v23, %v159_v19  ;;  %v858_v12 = vld [vmem:[%s6576_s1 + $0x4e0] sm:$0x7f] }
 0x471   :  { %v1202_v14 = vadd.f32 %v858_v12, %v514_v11  ;;  %v527_v12 = vld [vmem:[%s6575_s0 + $0x548] sm:$0x7f] }
 0x477   :  { %v160_v24 = vld [vmem:[%s6577_s2 + $0x490] sm:$0x7f] }
 0x478   :  { %1877 = vst.msk [vmem:[%s6578_s3 + $0x470] sm:$0x7f] %vm1734_vm0, %v1532_v17  ;;  %v1536_v37 = vadd.f32 %v1192_v28, %v160_v24  ;;  %v859_v17 = vld [vmem:[%s6576_s1 + $0x4e8] sm:$0x7f] }
 0x479   :  { %v1203_v19 = vadd.f32 %v859_v17, %v515_v16  ;;  %v528_v17 = vld [vmem:[%s6575_s0 + $0x550] sm:$0x7f] }
 0x47f   :  { %v161_v29 = vld [vmem:[%s6577_s2 + $0x498] sm:$0x7f] }
 0x480   :  { %1878 = vst.msk [vmem:[%s6578_s3 + $0x478] sm:$0x7f] %vm1734_vm0, %v1533_v22  ;;  %v1537_v42 = vadd.f32 %v1193_v33, %v161_v29  ;;  %v860_v22 = vld [vmem:[%s6576_s1 + $0x4f0] sm:$0x7f] }
 0x481   :  { %v1204_v24 = vadd.f32 %v860_v22, %v516_v21  ;;  %v529_v22 = vld [vmem:[%s6575_s0 + $0x558] sm:$0x7f] }
 0x487   :  { %v162_v34 = vld [vmem:[%s6577_s2 + $0x4a0] sm:$0x7f] }
 0x488   :  { %1879 = vst.msk [vmem:[%s6578_s3 + $0x480] sm:$0x7f] %vm1734_vm0, %v1534_v27  ;;  %v1538_v47 = vadd.f32 %v1194_v38, %v162_v34  ;;  %v861_v27 = vld [vmem:[%s6576_s1 + $0x4f8] sm:$0x7f] }
 0x489   :  { %v1205_v29 = vadd.f32 %v861_v27, %v517_v26  ;;  %v530_v27 = vld [vmem:[%s6575_s0 + $0x560] sm:$0x7f] }
 0x48f   :  { %v163_v39 = vld [vmem:[%s6577_s2 + $0x4a8] sm:$0x7f] }
 0x490   :  { %1880 = vst.msk [vmem:[%s6578_s3 + $0x488] sm:$0x7f] %vm1734_vm0, %v1535_v32  ;;  %v1539_v52 = vadd.f32 %v1195_v43, %v163_v39  ;;  %v862_v32 = vld [vmem:[%s6576_s1 + $0x500] sm:$0x7f] }
 0x491   :  { %v1206_v34 = vadd.f32 %v862_v32, %v518_v31  ;;  %v531_v32 = vld [vmem:[%s6575_s0 + $0x568] sm:$0x7f] }
 0x497   :  { %v164_v44 = vld [vmem:[%s6577_s2 + $0x4b0] sm:$0x7f] }
 0x498   :  { %1881 = vst.msk [vmem:[%s6578_s3 + $0x490] sm:$0x7f] %vm1734_vm0, %v1536_v37  ;;  %v1540_v57 = vadd.f32 %v1196_v48, %v164_v44  ;;  %v863_v37 = vld [vmem:[%s6576_s1 + $0x508] sm:$0x7f] }
 0x499   :  { %v1207_v39 = vadd.f32 %v863_v37, %v519_v36  ;;  %v532_v37 = vld [vmem:[%s6575_s0 + $0x570] sm:$0x7f] }
 0x49f   :  { %v165_v49 = vld [vmem:[%s6577_s2 + $0x4b8] sm:$0x7f] }
 0x4a0   :  { %1882 = vst.msk [vmem:[%s6578_s3 + $0x498] sm:$0x7f] %vm1734_vm0, %v1537_v42  ;;  %v1541_v62 = vadd.f32 %v1197_v53, %v165_v49  ;;  %v864_v42 = vld [vmem:[%s6576_s1 + $0x510] sm:$0x7f] }
 0x4a1   :  { %v1208_v44 = vadd.f32 %v864_v42, %v520_v41  ;;  %v533_v42 = vld [vmem:[%s6575_s0 + $0x578] sm:$0x7f] }
 0x4a7   :  { %v166_v54 = vld [vmem:[%s6577_s2 + $0x4c0] sm:$0x7f] }
 0x4a8   :  { %1883 = vst.msk [vmem:[%s6578_s3 + $0x4a0] sm:$0x7f] %vm1734_vm0, %v1538_v47  ;;  %v1542_v3 = vadd.f32 %v1198_v58, %v166_v54  ;;  %v865_v47 = vld [vmem:[%s6576_s1 + $0x518] sm:$0x7f] }
 0x4a9   :  { %v1209_v49 = vadd.f32 %v865_v47, %v521_v46  ;;  %v534_v47 = vld [vmem:[%s6575_s0 + $0x580] sm:$0x7f] }
 0x4af   :  { %v167_v59 = vld [vmem:[%s6577_s2 + $0x4c8] sm:$0x7f] }
 0x4b0   :  { %1884 = vst.msk [vmem:[%s6578_s3 + $0x4a8] sm:$0x7f] %vm1734_vm0, %v1539_v52  ;;  %v1543_v8 = vadd.f32 %v1199_v63, %v167_v59  ;;  %v866_v52 = vld [vmem:[%s6576_s1 + $0x520] sm:$0x7f] }
 0x4b1   :  { %v1210_v54 = vadd.f32 %v866_v52, %v522_v51  ;;  %v535_v52 = vld [vmem:[%s6575_s0 + $0x588] sm:$0x7f] }
 0x4b7   :  { %v168_v0 = vld [vmem:[%s6577_s2 + $0x4d0] sm:$0x7f] }
 0x4b8   :  { %1885 = vst.msk [vmem:[%s6578_s3 + $0x4b0] sm:$0x7f] %vm1734_vm0, %v1540_v57  ;;  %v1544_v13 = vadd.f32 %v1200_v4, %v168_v0  ;;  %v867_v57 = vld [vmem:[%s6576_s1 + $0x528] sm:$0x7f] }
 0x4b9   :  { %v1211_v59 = vadd.f32 %v867_v57, %v523_v56  ;;  %v536_v57 = vld [vmem:[%s6575_s0 + $0x590] sm:$0x7f] }
 0x4bf   :  { %v169_v5 = vld [vmem:[%s6577_s2 + $0x4d8] sm:$0x7f] }
 0x4c0   :  { %1886 = vst.msk [vmem:[%s6578_s3 + $0x4b8] sm:$0x7f] %vm1734_vm0, %v1541_v62  ;;  %v1545_v18 = vadd.f32 %v1201_v9, %v169_v5  ;;  %v868_v62 = vld [vmem:[%s6576_s1 + $0x530] sm:$0x7f] }
 0x4c1   :  { %v1212_v0 = vadd.f32 %v868_v62, %v524_v61  ;;  %v537_v62 = vld [vmem:[%s6575_s0 + $0x598] sm:$0x7f] }
 0x4c7   :  { %v170_v10 = vld [vmem:[%s6577_s2 + $0x4e0] sm:$0x7f] }
 0x4c8   :  { %1887 = vst.msk [vmem:[%s6578_s3 + $0x4c0] sm:$0x7f] %vm1734_vm0, %v1542_v3  ;;  %v1546_v23 = vadd.f32 %v1202_v14, %v170_v10  ;;  %v869_v3 = vld [vmem:[%s6576_s1 + $0x538] sm:$0x7f] }
 0x4c9   :  { %v1213_v5 = vadd.f32 %v869_v3, %v525_v2  ;;  %v538_v3 = vld [vmem:[%s6575_s0 + $0x5a0] sm:$0x7f] }
 0x4cf   :  { %v171_v15 = vld [vmem:[%s6577_s2 + $0x4e8] sm:$0x7f] }
 0x4d0   :  { %1888 = vst.msk [vmem:[%s6578_s3 + $0x4c8] sm:$0x7f] %vm1734_vm0, %v1543_v8  ;;  %v1547_v28 = vadd.f32 %v1203_v19, %v171_v15  ;;  %v870_v8 = vld [vmem:[%s6576_s1 + $0x540] sm:$0x7f] }
 0x4d1   :  { %v1214_v10 = vadd.f32 %v870_v8, %v526_v7  ;;  %v539_v8 = vld [vmem:[%s6575_s0 + $0x5a8] sm:$0x7f] }
 0x4d7   :  { %v172_v20 = vld [vmem:[%s6577_s2 + $0x4f0] sm:$0x7f] }
 0x4d8   :  { %1889 = vst.msk [vmem:[%s6578_s3 + $0x4d0] sm:$0x7f] %vm1734_vm0, %v1544_v13  ;;  %v1548_v33 = vadd.f32 %v1204_v24, %v172_v20  ;;  %v871_v13 = vld [vmem:[%s6576_s1 + $0x548] sm:$0x7f] }
 0x4d9   :  { %v1215_v15 = vadd.f32 %v871_v13, %v527_v12  ;;  %v540_v13 = vld [vmem:[%s6575_s0 + $0x5b0] sm:$0x7f] }
 0x4df   :  { %v173_v25 = vld [vmem:[%s6577_s2 + $0x4f8] sm:$0x7f] }
 0x4e0   :  { %1890 = vst.msk [vmem:[%s6578_s3 + $0x4d8] sm:$0x7f] %vm1734_vm0, %v1545_v18  ;;  %v1549_v38 = vadd.f32 %v1205_v29, %v173_v25  ;;  %v872_v18 = vld [vmem:[%s6576_s1 + $0x550] sm:$0x7f] }
 0x4e1   :  { %v1216_v20 = vadd.f32 %v872_v18, %v528_v17  ;;  %v541_v18 = vld [vmem:[%s6575_s0 + $0x5b8] sm:$0x7f] }
 0x4e7   :  { %v174_v30 = vld [vmem:[%s6577_s2 + $0x500] sm:$0x7f] }
 0x4e8   :  { %1891 = vst.msk [vmem:[%s6578_s3 + $0x4e0] sm:$0x7f] %vm1734_vm0, %v1546_v23  ;;  %v1550_v43 = vadd.f32 %v1206_v34, %v174_v30  ;;  %v873_v23 = vld [vmem:[%s6576_s1 + $0x558] sm:$0x7f] }
 0x4e9   :  { %v1217_v25 = vadd.f32 %v873_v23, %v529_v22  ;;  %v542_v23 = vld [vmem:[%s6575_s0 + $0x5c0] sm:$0x7f] }
 0x4ef   :  { %v175_v35 = vld [vmem:[%s6577_s2 + $0x508] sm:$0x7f] }
 0x4f0   :  { %1892 = vst.msk [vmem:[%s6578_s3 + $0x4e8] sm:$0x7f] %vm1734_vm0, %v1547_v28  ;;  %v1551_v48 = vadd.f32 %v1207_v39, %v175_v35  ;;  %v874_v28 = vld [vmem:[%s6576_s1 + $0x560] sm:$0x7f] }
 0x4f1   :  { %v1218_v30 = vadd.f32 %v874_v28, %v530_v27  ;;  %v543_v28 = vld [vmem:[%s6575_s0 + $0x5c8] sm:$0x7f] }
 0x4f7   :  { %v176_v40 = vld [vmem:[%s6577_s2 + $0x510] sm:$0x7f] }
 0x4f8   :  { %1893 = vst.msk [vmem:[%s6578_s3 + $0x4f0] sm:$0x7f] %vm1734_vm0, %v1548_v33  ;;  %v1552_v53 = vadd.f32 %v1208_v44, %v176_v40  ;;  %v875_v33 = vld [vmem:[%s6576_s1 + $0x568] sm:$0x7f] }
 0x4f9   :  { %v1219_v35 = vadd.f32 %v875_v33, %v531_v32  ;;  %v544_v33 = vld [vmem:[%s6575_s0 + $0x5d0] sm:$0x7f] }
 0x4ff   :  { %v177_v45 = vld [vmem:[%s6577_s2 + $0x518] sm:$0x7f] }
 0x500   :  { %1894 = vst.msk [vmem:[%s6578_s3 + $0x4f8] sm:$0x7f] %vm1734_vm0, %v1549_v38  ;;  %v1553_v58 = vadd.f32 %v1209_v49, %v177_v45  ;;  %v876_v38 = vld [vmem:[%s6576_s1 + $0x570] sm:$0x7f] }
 0x501   :  { %v1220_v40 = vadd.f32 %v876_v38, %v532_v37  ;;  %v545_v38 = vld [vmem:[%s6575_s0 + $0x5d8] sm:$0x7f] }
 0x507   :  { %v178_v50 = vld [vmem:[%s6577_s2 + $0x520] sm:$0x7f] }
 0x508   :  { %1895 = vst.msk [vmem:[%s6578_s3 + $0x500] sm:$0x7f] %vm1734_vm0, %v1550_v43  ;;  %v1554_v63 = vadd.f32 %v1210_v54, %v178_v50  ;;  %v877_v43 = vld [vmem:[%s6576_s1 + $0x578] sm:$0x7f] }
 0x509   :  { %v1221_v45 = vadd.f32 %v877_v43, %v533_v42  ;;  %v546_v43 = vld [vmem:[%s6575_s0 + $0x5e0] sm:$0x7f] }
 0x50f   :  { %v179_v55 = vld [vmem:[%s6577_s2 + $0x528] sm:$0x7f] }
 0x510   :  { %1896 = vst.msk [vmem:[%s6578_s3 + $0x508] sm:$0x7f] %vm1734_vm0, %v1551_v48  ;;  %v1555_v4 = vadd.f32 %v1211_v59, %v179_v55  ;;  %v878_v48 = vld [vmem:[%s6576_s1 + $0x580] sm:$0x7f] }
 0x511   :  { %v1222_v50 = vadd.f32 %v878_v48, %v534_v47  ;;  %v547_v48 = vld [vmem:[%s6575_s0 + $0x5e8] sm:$0x7f] }
 0x517   :  { %v180_v60 = vld [vmem:[%s6577_s2 + $0x530] sm:$0x7f] }
 0x518   :  { %1897 = vst.msk [vmem:[%s6578_s3 + $0x510] sm:$0x7f] %vm1734_vm0, %v1552_v53  ;;  %v1556_v9 = vadd.f32 %v1212_v0, %v180_v60  ;;  %v879_v53 = vld [vmem:[%s6576_s1 + $0x588] sm:$0x7f] }
 0x519   :  { %v1223_v55 = vadd.f32 %v879_v53, %v535_v52  ;;  %v548_v53 = vld [vmem:[%s6575_s0 + $0x5f0] sm:$0x7f] }
 0x51f   :  { %v181_v1 = vld [vmem:[%s6577_s2 + $0x538] sm:$0x7f] }
 0x520   :  { %1898 = vst.msk [vmem:[%s6578_s3 + $0x518] sm:$0x7f] %vm1734_vm0, %v1553_v58  ;;  %v1557_v14 = vadd.f32 %v1213_v5, %v181_v1  ;;  %v880_v58 = vld [vmem:[%s6576_s1 + $0x590] sm:$0x7f] }
 0x521   :  { %v1224_v60 = vadd.f32 %v880_v58, %v536_v57  ;;  %v549_v58 = vld [vmem:[%s6575_s0 + $0x5f8] sm:$0x7f] }
 0x527   :  { %v182_v6 = vld [vmem:[%s6577_s2 + $0x540] sm:$0x7f] }
 0x528   :  { %1899 = vst.msk [vmem:[%s6578_s3 + $0x520] sm:$0x7f] %vm1734_vm0, %v1554_v63  ;;  %v1558_v19 = vadd.f32 %v1214_v10, %v182_v6  ;;  %v881_v63 = vld [vmem:[%s6576_s1 + $0x598] sm:$0x7f] }
 0x529   :  { %v1225_v1 = vadd.f32 %v881_v63, %v537_v62  ;;  %v550_v63 = vld [vmem:[%s6575_s0 + $0x600] sm:$0x7f] }
 0x52f   :  { %v183_v11 = vld [vmem:[%s6577_s2 + $0x548] sm:$0x7f] }
 0x530   :  { %1900 = vst.msk [vmem:[%s6578_s3 + $0x528] sm:$0x7f] %vm1734_vm0, %v1555_v4  ;;  %v1559_v24 = vadd.f32 %v1215_v15, %v183_v11  ;;  %v882_v4 = vld [vmem:[%s6576_s1 + $0x5a0] sm:$0x7f] }
 0x531   :  { %v1226_v6 = vadd.f32 %v882_v4, %v538_v3  ;;  %v551_v4 = vld [vmem:[%s6575_s0 + $0x608] sm:$0x7f] }
 0x537   :  { %v184_v16 = vld [vmem:[%s6577_s2 + $0x550] sm:$0x7f] }
 0x538   :  { %1901 = vst.msk [vmem:[%s6578_s3 + $0x530] sm:$0x7f] %vm1734_vm0, %v1556_v9  ;;  %v1560_v29 = vadd.f32 %v1216_v20, %v184_v16  ;;  %v883_v9 = vld [vmem:[%s6576_s1 + $0x5a8] sm:$0x7f] }
 0x539   :  { %v1227_v11 = vadd.f32 %v883_v9, %v539_v8  ;;  %v552_v9 = vld [vmem:[%s6575_s0 + $0x610] sm:$0x7f] }
 0x53f   :  { %v185_v21 = vld [vmem:[%s6577_s2 + $0x558] sm:$0x7f] }
 0x540   :  { %1902 = vst.msk [vmem:[%s6578_s3 + $0x538] sm:$0x7f] %vm1734_vm0, %v1557_v14  ;;  %v1561_v34 = vadd.f32 %v1217_v25, %v185_v21  ;;  %v884_v14 = vld [vmem:[%s6576_s1 + $0x5b0] sm:$0x7f] }
 0x541   :  { %v1228_v16 = vadd.f32 %v884_v14, %v540_v13  ;;  %v553_v14 = vld [vmem:[%s6575_s0 + $0x618] sm:$0x7f] }
 0x547   :  { %v186_v26 = vld [vmem:[%s6577_s2 + $0x560] sm:$0x7f] }
 0x548   :  { %1903 = vst.msk [vmem:[%s6578_s3 + $0x540] sm:$0x7f] %vm1734_vm0, %v1558_v19  ;;  %v1562_v39 = vadd.f32 %v1218_v30, %v186_v26  ;;  %v885_v19 = vld [vmem:[%s6576_s1 + $0x5b8] sm:$0x7f] }
 0x549   :  { %v1229_v21 = vadd.f32 %v885_v19, %v541_v18  ;;  %v554_v19 = vld [vmem:[%s6575_s0 + $0x620] sm:$0x7f] }
 0x54f   :  { %v187_v31 = vld [vmem:[%s6577_s2 + $0x568] sm:$0x7f] }
 0x550   :  { %1904 = vst.msk [vmem:[%s6578_s3 + $0x548] sm:$0x7f] %vm1734_vm0, %v1559_v24  ;;  %v1563_v44 = vadd.f32 %v1219_v35, %v187_v31  ;;  %v886_v24 = vld [vmem:[%s6576_s1 + $0x5c0] sm:$0x7f] }
 0x551   :  { %v1230_v26 = vadd.f32 %v886_v24, %v542_v23  ;;  %v555_v24 = vld [vmem:[%s6575_s0 + $0x628] sm:$0x7f] }
 0x557   :  { %v188_v36 = vld [vmem:[%s6577_s2 + $0x570] sm:$0x7f] }
 0x558   :  { %1905 = vst.msk [vmem:[%s6578_s3 + $0x550] sm:$0x7f] %vm1734_vm0, %v1560_v29  ;;  %v1564_v49 = vadd.f32 %v1220_v40, %v188_v36  ;;  %v887_v29 = vld [vmem:[%s6576_s1 + $0x5c8] sm:$0x7f] }
 0x559   :  { %v1231_v31 = vadd.f32 %v887_v29, %v543_v28  ;;  %v556_v29 = vld [vmem:[%s6575_s0 + $0x630] sm:$0x7f] }
 0x55f   :  { %v189_v41 = vld [vmem:[%s6577_s2 + $0x578] sm:$0x7f] }
 0x560   :  { %1906 = vst.msk [vmem:[%s6578_s3 + $0x558] sm:$0x7f] %vm1734_vm0, %v1561_v34  ;;  %v1565_v54 = vadd.f32 %v1221_v45, %v189_v41  ;;  %v888_v34 = vld [vmem:[%s6576_s1 + $0x5d0] sm:$0x7f] }
 0x561   :  { %v1232_v36 = vadd.f32 %v888_v34, %v544_v33  ;;  %v557_v34 = vld [vmem:[%s6575_s0 + $0x638] sm:$0x7f] }
 0x567   :  { %v190_v46 = vld [vmem:[%s6577_s2 + $0x580] sm:$0x7f] }
 0x568   :  { %1907 = vst.msk [vmem:[%s6578_s3 + $0x560] sm:$0x7f] %vm1734_vm0, %v1562_v39  ;;  %v1566_v59 = vadd.f32 %v1222_v50, %v190_v46  ;;  %v889_v39 = vld [vmem:[%s6576_s1 + $0x5d8] sm:$0x7f] }
 0x569   :  { %v1233_v41 = vadd.f32 %v889_v39, %v545_v38  ;;  %v558_v39 = vld [vmem:[%s6575_s0 + $0x640] sm:$0x7f] }
 0x56f   :  { %v191_v51 = vld [vmem:[%s6577_s2 + $0x588] sm:$0x7f] }
 0x570   :  { %1908 = vst.msk [vmem:[%s6578_s3 + $0x568] sm:$0x7f] %vm1734_vm0, %v1563_v44  ;;  %v1567_v0 = vadd.f32 %v1223_v55, %v191_v51  ;;  %v890_v44 = vld [vmem:[%s6576_s1 + $0x5e0] sm:$0x7f] }
 0x571   :  { %v1234_v46 = vadd.f32 %v890_v44, %v546_v43  ;;  %v559_v44 = vld [vmem:[%s6575_s0 + $0x648] sm:$0x7f] }
 0x577   :  { %v192_v56 = vld [vmem:[%s6577_s2 + $0x590] sm:$0x7f] }
 0x578   :  { %1909 = vst.msk [vmem:[%s6578_s3 + $0x570] sm:$0x7f] %vm1734_vm0, %v1564_v49  ;;  %v1568_v5 = vadd.f32 %v1224_v60, %v192_v56  ;;  %v891_v49 = vld [vmem:[%s6576_s1 + $0x5e8] sm:$0x7f] }
 0x579   :  { %v1235_v51 = vadd.f32 %v891_v49, %v547_v48  ;;  %v560_v49 = vld [vmem:[%s6575_s0 + $0x650] sm:$0x7f] }
 0x57f   :  { %v193_v61 = vld [vmem:[%s6577_s2 + $0x598] sm:$0x7f] }
 0x580   :  { %1910 = vst.msk [vmem:[%s6578_s3 + $0x578] sm:$0x7f] %vm1734_vm0, %v1565_v54  ;;  %v1569_v10 = vadd.f32 %v1225_v1, %v193_v61  ;;  %v892_v54 = vld [vmem:[%s6576_s1 + $0x5f0] sm:$0x7f] }
 0x581   :  { %v1236_v56 = vadd.f32 %v892_v54, %v548_v53  ;;  %v561_v54 = vld [vmem:[%s6575_s0 + $0x658] sm:$0x7f] }
 0x587   :  { %v194_v2 = vld [vmem:[%s6577_s2 + $0x5a0] sm:$0x7f] }
 0x588   :  { %1911 = vst.msk [vmem:[%s6578_s3 + $0x580] sm:$0x7f] %vm1734_vm0, %v1566_v59  ;;  %v1570_v15 = vadd.f32 %v1226_v6, %v194_v2  ;;  %v893_v59 = vld [vmem:[%s6576_s1 + $0x5f8] sm:$0x7f] }
 0x589   :  { %v1237_v61 = vadd.f32 %v893_v59, %v549_v58  ;;  %v562_v59 = vld [vmem:[%s6575_s0 + $0x660] sm:$0x7f] }
 0x58f   :  { %v195_v7 = vld [vmem:[%s6577_s2 + $0x5a8] sm:$0x7f] }
 0x590   :  { %1912 = vst.msk [vmem:[%s6578_s3 + $0x588] sm:$0x7f] %vm1734_vm0, %v1567_v0  ;;  %v1571_v20 = vadd.f32 %v1227_v11, %v195_v7  ;;  %v894_v0 = vld [vmem:[%s6576_s1 + $0x600] sm:$0x7f] }
 0x591   :  { %v1238_v2 = vadd.f32 %v894_v0, %v550_v63  ;;  %v563_v0 = vld [vmem:[%s6575_s0 + $0x668] sm:$0x7f] }
 0x597   :  { %v196_v12 = vld [vmem:[%s6577_s2 + $0x5b0] sm:$0x7f] }
 0x598   :  { %1913 = vst.msk [vmem:[%s6578_s3 + $0x590] sm:$0x7f] %vm1734_vm0, %v1568_v5  ;;  %v1572_v25 = vadd.f32 %v1228_v16, %v196_v12  ;;  %v895_v5 = vld [vmem:[%s6576_s1 + $0x608] sm:$0x7f] }
 0x599   :  { %v1239_v7 = vadd.f32 %v895_v5, %v551_v4  ;;  %v564_v5 = vld [vmem:[%s6575_s0 + $0x670] sm:$0x7f] }
 0x59f   :  { %v197_v17 = vld [vmem:[%s6577_s2 + $0x5b8] sm:$0x7f] }
 0x5a0   :  { %1914 = vst.msk [vmem:[%s6578_s3 + $0x598] sm:$0x7f] %vm1734_vm0, %v1569_v10  ;;  %v1573_v30 = vadd.f32 %v1229_v21, %v197_v17  ;;  %v896_v10 = vld [vmem:[%s6576_s1 + $0x610] sm:$0x7f] }
 0x5a1   :  { %v1240_v12 = vadd.f32 %v896_v10, %v552_v9  ;;  %v565_v10 = vld [vmem:[%s6575_s0 + $0x678] sm:$0x7f] }
 0x5a7   :  { %v198_v22 = vld [vmem:[%s6577_s2 + $0x5c0] sm:$0x7f] }
 0x5a8   :  { %1915 = vst.msk [vmem:[%s6578_s3 + $0x5a0] sm:$0x7f] %vm1734_vm0, %v1570_v15  ;;  %v1574_v35 = vadd.f32 %v1230_v26, %v198_v22  ;;  %v897_v15 = vld [vmem:[%s6576_s1 + $0x618] sm:$0x7f] }
 0x5a9   :  { %v1241_v17 = vadd.f32 %v897_v15, %v553_v14  ;;  %v566_v15 = vld [vmem:[%s6575_s0 + $0x680] sm:$0x7f] }
 0x5af   :  { %v199_v27 = vld [vmem:[%s6577_s2 + $0x5c8] sm:$0x7f] }
 0x5b0   :  { %1916 = vst.msk [vmem:[%s6578_s3 + $0x5a8] sm:$0x7f] %vm1734_vm0, %v1571_v20  ;;  %v1575_v40 = vadd.f32 %v1231_v31, %v199_v27  ;;  %v898_v20 = vld [vmem:[%s6576_s1 + $0x620] sm:$0x7f] }
 0x5b1   :  { %v1242_v22 = vadd.f32 %v898_v20, %v554_v19  ;;  %v567_v20 = vld [vmem:[%s6575_s0 + $0x688] sm:$0x7f] }
 0x5b7   :  { %v200_v32 = vld [vmem:[%s6577_s2 + $0x5d0] sm:$0x7f] }
 0x5b8   :  { %1917 = vst.msk [vmem:[%s6578_s3 + $0x5b0] sm:$0x7f] %vm1734_vm0, %v1572_v25  ;;  %v1576_v45 = vadd.f32 %v1232_v36, %v200_v32  ;;  %v899_v25 = vld [vmem:[%s6576_s1 + $0x628] sm:$0x7f] }
 0x5b9   :  { %v1243_v27 = vadd.f32 %v899_v25, %v555_v24  ;;  %v568_v25 = vld [vmem:[%s6575_s0 + $0x690] sm:$0x7f] }
 0x5bf   :  { %v201_v37 = vld [vmem:[%s6577_s2 + $0x5d8] sm:$0x7f] }
 0x5c0   :  { %1918 = vst.msk [vmem:[%s6578_s3 + $0x5b8] sm:$0x7f] %vm1734_vm0, %v1573_v30  ;;  %v1577_v50 = vadd.f32 %v1233_v41, %v201_v37  ;;  %v900_v30 = vld [vmem:[%s6576_s1 + $0x630] sm:$0x7f] }
 0x5c1   :  { %v1244_v32 = vadd.f32 %v900_v30, %v556_v29  ;;  %v569_v30 = vld [vmem:[%s6575_s0 + $0x698] sm:$0x7f] }
 0x5c7   :  { %v202_v42 = vld [vmem:[%s6577_s2 + $0x5e0] sm:$0x7f] }
 0x5c8   :  { %1919 = vst.msk [vmem:[%s6578_s3 + $0x5c0] sm:$0x7f] %vm1734_vm0, %v1574_v35  ;;  %v1578_v55 = vadd.f32 %v1234_v46, %v202_v42  ;;  %v901_v35 = vld [vmem:[%s6576_s1 + $0x638] sm:$0x7f] }
 0x5c9   :  { %v1245_v37 = vadd.f32 %v901_v35, %v557_v34  ;;  %v570_v35 = vld [vmem:[%s6575_s0 + $0x6a0] sm:$0x7f] }
 0x5cf   :  { %v203_v47 = vld [vmem:[%s6577_s2 + $0x5e8] sm:$0x7f] }
 0x5d0   :  { %1920 = vst.msk [vmem:[%s6578_s3 + $0x5c8] sm:$0x7f] %vm1734_vm0, %v1575_v40  ;;  %v1579_v60 = vadd.f32 %v1235_v51, %v203_v47  ;;  %v902_v40 = vld [vmem:[%s6576_s1 + $0x640] sm:$0x7f] }
 0x5d1   :  { %v1246_v42 = vadd.f32 %v902_v40, %v558_v39  ;;  %v571_v40 = vld [vmem:[%s6575_s0 + $0x6a8] sm:$0x7f] }
 0x5d7   :  { %v204_v52 = vld [vmem:[%s6577_s2 + $0x5f0] sm:$0x7f] }
 0x5d8   :  { %1921 = vst.msk [vmem:[%s6578_s3 + $0x5d0] sm:$0x7f] %vm1734_vm0, %v1576_v45  ;;  %v1580_v1 = vadd.f32 %v1236_v56, %v204_v52  ;;  %v903_v45 = vld [vmem:[%s6576_s1 + $0x648] sm:$0x7f] }
 0x5d9   :  { %v1247_v47 = vadd.f32 %v903_v45, %v559_v44  ;;  %v572_v45 = vld [vmem:[%s6575_s0 + $0x6b0] sm:$0x7f] }
 0x5df   :  { %v205_v57 = vld [vmem:[%s6577_s2 + $0x5f8] sm:$0x7f] }
 0x5e0   :  { %1922 = vst.msk [vmem:[%s6578_s3 + $0x5d8] sm:$0x7f] %vm1734_vm0, %v1577_v50  ;;  %v1581_v6 = vadd.f32 %v1237_v61, %v205_v57  ;;  %v904_v50 = vld [vmem:[%s6576_s1 + $0x650] sm:$0x7f] }
 0x5e1   :  { %v1248_v52 = vadd.f32 %v904_v50, %v560_v49  ;;  %v573_v50 = vld [vmem:[%s6575_s0 + $0x6b8] sm:$0x7f] }
 0x5e7   :  { %v206_v62 = vld [vmem:[%s6577_s2 + $0x600] sm:$0x7f] }
 0x5e8   :  { %1923 = vst.msk [vmem:[%s6578_s3 + $0x5e0] sm:$0x7f] %vm1734_vm0, %v1578_v55  ;;  %v1582_v11 = vadd.f32 %v1238_v2, %v206_v62  ;;  %v905_v55 = vld [vmem:[%s6576_s1 + $0x658] sm:$0x7f] }
 0x5e9   :  { %v1249_v57 = vadd.f32 %v905_v55, %v561_v54  ;;  %v574_v55 = vld [vmem:[%s6575_s0 + $0x6c0] sm:$0x7f] }
 0x5ef   :  { %v207_v3 = vld [vmem:[%s6577_s2 + $0x608] sm:$0x7f] }
 0x5f0   :  { %1924 = vst.msk [vmem:[%s6578_s3 + $0x5e8] sm:$0x7f] %vm1734_vm0, %v1579_v60  ;;  %v1583_v16 = vadd.f32 %v1239_v7, %v207_v3  ;;  %v906_v60 = vld [vmem:[%s6576_s1 + $0x660] sm:$0x7f] }
 0x5f1   :  { %v1250_v62 = vadd.f32 %v906_v60, %v562_v59  ;;  %v575_v60 = vld [vmem:[%s6575_s0 + $0x6c8] sm:$0x7f] }
 0x5f7   :  { %v208_v8 = vld [vmem:[%s6577_s2 + $0x610] sm:$0x7f] }
 0x5f8   :  { %1925 = vst.msk [vmem:[%s6578_s3 + $0x5f0] sm:$0x7f] %vm1734_vm0, %v1580_v1  ;;  %v1584_v21 = vadd.f32 %v1240_v12, %v208_v8  ;;  %v907_v1 = vld [vmem:[%s6576_s1 + $0x668] sm:$0x7f] }
 0x5f9   :  { %v1251_v3 = vadd.f32 %v907_v1, %v563_v0  ;;  %v576_v1 = vld [vmem:[%s6575_s0 + $0x6d0] sm:$0x7f] }
 0x5ff   :  { %v209_v13 = vld [vmem:[%s6577_s2 + $0x618] sm:$0x7f] }
 0x600   :  { %1926 = vst.msk [vmem:[%s6578_s3 + $0x5f8] sm:$0x7f] %vm1734_vm0, %v1581_v6  ;;  %v1585_v26 = vadd.f32 %v1241_v17, %v209_v13  ;;  %v908_v6 = vld [vmem:[%s6576_s1 + $0x670] sm:$0x7f] }
 0x601   :  { %v1252_v8 = vadd.f32 %v908_v6, %v564_v5  ;;  %v577_v6 = vld [vmem:[%s6575_s0 + $0x6d8] sm:$0x7f] }
 0x607   :  { %v210_v18 = vld [vmem:[%s6577_s2 + $0x620] sm:$0x7f] }
 0x608   :  { %1927 = vst.msk [vmem:[%s6578_s3 + $0x600] sm:$0x7f] %vm1734_vm0, %v1582_v11  ;;  %v1586_v31 = vadd.f32 %v1242_v22, %v210_v18  ;;  %v909_v11 = vld [vmem:[%s6576_s1 + $0x678] sm:$0x7f] }
 0x609   :  { %v1253_v13 = vadd.f32 %v909_v11, %v565_v10  ;;  %v578_v11 = vld [vmem:[%s6575_s0 + $0x6e0] sm:$0x7f] }
 0x60f   :  { %v211_v23 = vld [vmem:[%s6577_s2 + $0x628] sm:$0x7f] }
 0x610   :  { %1928 = vst.msk [vmem:[%s6578_s3 + $0x608] sm:$0x7f] %vm1734_vm0, %v1583_v16  ;;  %v1587_v36 = vadd.f32 %v1243_v27, %v211_v23  ;;  %v910_v16 = vld [vmem:[%s6576_s1 + $0x680] sm:$0x7f] }
 0x611   :  { %v1254_v18 = vadd.f32 %v910_v16, %v566_v15  ;;  %v579_v16 = vld [vmem:[%s6575_s0 + $0x6e8] sm:$0x7f] }
 0x617   :  { %v212_v28 = vld [vmem:[%s6577_s2 + $0x630] sm:$0x7f] }
 0x618   :  { %1929 = vst.msk [vmem:[%s6578_s3 + $0x610] sm:$0x7f] %vm1734_vm0, %v1584_v21  ;;  %v1588_v41 = vadd.f32 %v1244_v32, %v212_v28  ;;  %v911_v21 = vld [vmem:[%s6576_s1 + $0x688] sm:$0x7f] }
 0x619   :  { %v1255_v23 = vadd.f32 %v911_v21, %v567_v20  ;;  %v580_v21 = vld [vmem:[%s6575_s0 + $0x6f0] sm:$0x7f] }
 0x61f   :  { %v213_v33 = vld [vmem:[%s6577_s2 + $0x638] sm:$0x7f] }
 0x620   :  { %1930 = vst.msk [vmem:[%s6578_s3 + $0x618] sm:$0x7f] %vm1734_vm0, %v1585_v26  ;;  %v1589_v46 = vadd.f32 %v1245_v37, %v213_v33  ;;  %v912_v26 = vld [vmem:[%s6576_s1 + $0x690] sm:$0x7f] }
 0x621   :  { %v1256_v28 = vadd.f32 %v912_v26, %v568_v25  ;;  %v581_v26 = vld [vmem:[%s6575_s0 + $0x6f8] sm:$0x7f] }
 0x627   :  { %v214_v38 = vld [vmem:[%s6577_s2 + $0x640] sm:$0x7f] }
 0x628   :  { %1931 = vst.msk [vmem:[%s6578_s3 + $0x620] sm:$0x7f] %vm1734_vm0, %v1586_v31  ;;  %v1590_v51 = vadd.f32 %v1246_v42, %v214_v38  ;;  %v913_v31 = vld [vmem:[%s6576_s1 + $0x698] sm:$0x7f] }
 0x629   :  { %v1257_v33 = vadd.f32 %v913_v31, %v569_v30  ;;  %v582_v31 = vld [vmem:[%s6575_s0 + $0x700] sm:$0x7f] }
 0x62f   :  { %v215_v43 = vld [vmem:[%s6577_s2 + $0x648] sm:$0x7f] }
 0x630   :  { %1932 = vst.msk [vmem:[%s6578_s3 + $0x628] sm:$0x7f] %vm1734_vm0, %v1587_v36  ;;  %v1591_v56 = vadd.f32 %v1247_v47, %v215_v43  ;;  %v914_v36 = vld [vmem:[%s6576_s1 + $0x6a0] sm:$0x7f] }
 0x631   :  { %v1258_v38 = vadd.f32 %v914_v36, %v570_v35  ;;  %v583_v36 = vld [vmem:[%s6575_s0 + $0x708] sm:$0x7f] }
 0x637   :  { %v216_v48 = vld [vmem:[%s6577_s2 + $0x650] sm:$0x7f] }
 0x638   :  { %1933 = vst.msk [vmem:[%s6578_s3 + $0x630] sm:$0x7f] %vm1734_vm0, %v1588_v41  ;;  %v1592_v61 = vadd.f32 %v1248_v52, %v216_v48  ;;  %v915_v41 = vld [vmem:[%s6576_s1 + $0x6a8] sm:$0x7f] }
 0x639   :  { %v1259_v43 = vadd.f32 %v915_v41, %v571_v40  ;;  %v584_v41 = vld [vmem:[%s6575_s0 + $0x710] sm:$0x7f] }
 0x63f   :  { %v217_v53 = vld [vmem:[%s6577_s2 + $0x658] sm:$0x7f] }
 0x640   :  { %1934 = vst.msk [vmem:[%s6578_s3 + $0x638] sm:$0x7f] %vm1734_vm0, %v1589_v46  ;;  %v1593_v2 = vadd.f32 %v1249_v57, %v217_v53  ;;  %v916_v46 = vld [vmem:[%s6576_s1 + $0x6b0] sm:$0x7f] }
 0x641   :  { %v1260_v48 = vadd.f32 %v916_v46, %v572_v45  ;;  %v585_v46 = vld [vmem:[%s6575_s0 + $0x718] sm:$0x7f] }
 0x647   :  { %v218_v58 = vld [vmem:[%s6577_s2 + $0x660] sm:$0x7f] }
 0x648   :  { %1935 = vst.msk [vmem:[%s6578_s3 + $0x640] sm:$0x7f] %vm1734_vm0, %v1590_v51  ;;  %v1594_v7 = vadd.f32 %v1250_v62, %v218_v58  ;;  %v917_v51 = vld [vmem:[%s6576_s1 + $0x6b8] sm:$0x7f] }
 0x649   :  { %v1261_v53 = vadd.f32 %v917_v51, %v573_v50  ;;  %v586_v51 = vld [vmem:[%s6575_s0 + $0x720] sm:$0x7f] }
 0x64f   :  { %v219_v63 = vld [vmem:[%s6577_s2 + $0x668] sm:$0x7f] }
 0x650   :  { %1936 = vst.msk [vmem:[%s6578_s3 + $0x648] sm:$0x7f] %vm1734_vm0, %v1591_v56  ;;  %v1595_v12 = vadd.f32 %v1251_v3, %v219_v63  ;;  %v918_v56 = vld [vmem:[%s6576_s1 + $0x6c0] sm:$0x7f] }
 0x651   :  { %v1262_v58 = vadd.f32 %v918_v56, %v574_v55  ;;  %v587_v56 = vld [vmem:[%s6575_s0 + $0x728] sm:$0x7f] }
 0x657   :  { %v220_v4 = vld [vmem:[%s6577_s2 + $0x670] sm:$0x7f] }
 0x658   :  { %1937 = vst.msk [vmem:[%s6578_s3 + $0x650] sm:$0x7f] %vm1734_vm0, %v1592_v61  ;;  %v1596_v17 = vadd.f32 %v1252_v8, %v220_v4  ;;  %v919_v61 = vld [vmem:[%s6576_s1 + $0x6c8] sm:$0x7f] }
 0x659   :  { %v1263_v63 = vadd.f32 %v919_v61, %v575_v60  ;;  %v588_v61 = vld [vmem:[%s6575_s0 + $0x730] sm:$0x7f] }
 0x65f   :  { %v221_v9 = vld [vmem:[%s6577_s2 + $0x678] sm:$0x7f] }
 0x660   :  { %1938 = vst.msk [vmem:[%s6578_s3 + $0x658] sm:$0x7f] %vm1734_vm0, %v1593_v2  ;;  %v1597_v22 = vadd.f32 %v1253_v13, %v221_v9  ;;  %v920_v2 = vld [vmem:[%s6576_s1 + $0x6d0] sm:$0x7f] }
 0x661   :  { %v1264_v4 = vadd.f32 %v920_v2, %v576_v1  ;;  %v589_v2 = vld [vmem:[%s6575_s0 + $0x738] sm:$0x7f] }
 0x667   :  { %v222_v14 = vld [vmem:[%s6577_s2 + $0x680] sm:$0x7f] }
 0x668   :  { %1939 = vst.msk [vmem:[%s6578_s3 + $0x660] sm:$0x7f] %vm1734_vm0, %v1594_v7  ;;  %v1598_v27 = vadd.f32 %v1254_v18, %v222_v14  ;;  %v921_v7 = vld [vmem:[%s6576_s1 + $0x6d8] sm:$0x7f] }
 0x669   :  { %v1265_v9 = vadd.f32 %v921_v7, %v577_v6  ;;  %v590_v7 = vld [vmem:[%s6575_s0 + $0x740] sm:$0x7f] }
 0x66f   :  { %v223_v19 = vld [vmem:[%s6577_s2 + $0x688] sm:$0x7f] }
 0x670   :  { %1940 = vst.msk [vmem:[%s6578_s3 + $0x668] sm:$0x7f] %vm1734_vm0, %v1595_v12  ;;  %v1599_v32 = vadd.f32 %v1255_v23, %v223_v19  ;;  %v922_v12 = vld [vmem:[%s6576_s1 + $0x6e0] sm:$0x7f] }
 0x671   :  { %v1266_v14 = vadd.f32 %v922_v12, %v578_v11  ;;  %v591_v12 = vld [vmem:[%s6575_s0 + $0x748] sm:$0x7f] }
 0x677   :  { %v224_v24 = vld [vmem:[%s6577_s2 + $0x690] sm:$0x7f] }
 0x678   :  { %1941 = vst.msk [vmem:[%s6578_s3 + $0x670] sm:$0x7f] %vm1734_vm0, %v1596_v17  ;;  %v1600_v37 = vadd.f32 %v1256_v28, %v224_v24  ;;  %v923_v17 = vld [vmem:[%s6576_s1 + $0x6e8] sm:$0x7f] }
 0x679   :  { %v1267_v19 = vadd.f32 %v923_v17, %v579_v16  ;;  %v592_v17 = vld [vmem:[%s6575_s0 + $0x750] sm:$0x7f] }
 0x67f   :  { %v225_v29 = vld [vmem:[%s6577_s2 + $0x698] sm:$0x7f] }
 0x680   :  { %1942 = vst.msk [vmem:[%s6578_s3 + $0x678] sm:$0x7f] %vm1734_vm0, %v1597_v22  ;;  %v1601_v42 = vadd.f32 %v1257_v33, %v225_v29  ;;  %v924_v22 = vld [vmem:[%s6576_s1 + $0x6f0] sm:$0x7f] }
 0x681   :  { %v1268_v24 = vadd.f32 %v924_v22, %v580_v21  ;;  %v593_v22 = vld [vmem:[%s6575_s0 + $0x758] sm:$0x7f] }
 0x687   :  { %v226_v34 = vld [vmem:[%s6577_s2 + $0x6a0] sm:$0x7f] }
 0x688   :  { %1943 = vst.msk [vmem:[%s6578_s3 + $0x680] sm:$0x7f] %vm1734_vm0, %v1598_v27  ;;  %v1602_v47 = vadd.f32 %v1258_v38, %v226_v34  ;;  %v925_v27 = vld [vmem:[%s6576_s1 + $0x6f8] sm:$0x7f] }
 0x689   :  { %v1269_v29 = vadd.f32 %v925_v27, %v581_v26  ;;  %v594_v27 = vld [vmem:[%s6575_s0 + $0x760] sm:$0x7f] }
 0x68f   :  { %v227_v39 = vld [vmem:[%s6577_s2 + $0x6a8] sm:$0x7f] }
 0x690   :  { %1944 = vst.msk [vmem:[%s6578_s3 + $0x688] sm:$0x7f] %vm1734_vm0, %v1599_v32  ;;  %v1603_v52 = vadd.f32 %v1259_v43, %v227_v39  ;;  %v926_v32 = vld [vmem:[%s6576_s1 + $0x700] sm:$0x7f] }
 0x691   :  { %v1270_v34 = vadd.f32 %v926_v32, %v582_v31  ;;  %v595_v32 = vld [vmem:[%s6575_s0 + $0x768] sm:$0x7f] }
 0x697   :  { %v228_v44 = vld [vmem:[%s6577_s2 + $0x6b0] sm:$0x7f] }
 0x698   :  { %1945 = vst.msk [vmem:[%s6578_s3 + $0x690] sm:$0x7f] %vm1734_vm0, %v1600_v37  ;;  %v1604_v57 = vadd.f32 %v1260_v48, %v228_v44  ;;  %v927_v37 = vld [vmem:[%s6576_s1 + $0x708] sm:$0x7f] }
 0x699   :  { %v1271_v39 = vadd.f32 %v927_v37, %v583_v36  ;;  %v596_v37 = vld [vmem:[%s6575_s0 + $0x770] sm:$0x7f] }
 0x69f   :  { %v229_v49 = vld [vmem:[%s6577_s2 + $0x6b8] sm:$0x7f] }
 0x6a0   :  { %1946 = vst.msk [vmem:[%s6578_s3 + $0x698] sm:$0x7f] %vm1734_vm0, %v1601_v42  ;;  %v1605_v62 = vadd.f32 %v1261_v53, %v229_v49  ;;  %v928_v42 = vld [vmem:[%s6576_s1 + $0x710] sm:$0x7f] }
 0x6a1   :  { %v1272_v44 = vadd.f32 %v928_v42, %v584_v41  ;;  %v597_v42 = vld [vmem:[%s6575_s0 + $0x778] sm:$0x7f] }
 0x6a7   :  { %v230_v54 = vld [vmem:[%s6577_s2 + $0x6c0] sm:$0x7f] }
 0x6a8   :  { %1947 = vst.msk [vmem:[%s6578_s3 + $0x6a0] sm:$0x7f] %vm1734_vm0, %v1602_v47  ;;  %v1606_v3 = vadd.f32 %v1262_v58, %v230_v54  ;;  %v929_v47 = vld [vmem:[%s6576_s1 + $0x718] sm:$0x7f] }
 0x6a9   :  { %v1273_v49 = vadd.f32 %v929_v47, %v585_v46  ;;  %v598_v47 = vld [vmem:[%s6575_s0 + $0x780] sm:$0x7f] }
 0x6af   :  { %v231_v59 = vld [vmem:[%s6577_s2 + $0x6c8] sm:$0x7f] }
 0x6b0   :  { %1948 = vst.msk [vmem:[%s6578_s3 + $0x6a8] sm:$0x7f] %vm1734_vm0, %v1603_v52  ;;  %v1607_v8 = vadd.f32 %v1263_v63, %v231_v59  ;;  %v930_v52 = vld [vmem:[%s6576_s1 + $0x720] sm:$0x7f] }
 0x6b1   :  { %v1274_v54 = vadd.f32 %v930_v52, %v586_v51  ;;  %v599_v52 = vld [vmem:[%s6575_s0 + $0x788] sm:$0x7f] }
 0x6b7   :  { %v232_v0 = vld [vmem:[%s6577_s2 + $0x6d0] sm:$0x7f] }
 0x6b8   :  { %1949 = vst.msk [vmem:[%s6578_s3 + $0x6b0] sm:$0x7f] %vm1734_vm0, %v1604_v57  ;;  %v1608_v13 = vadd.f32 %v1264_v4, %v232_v0  ;;  %v931_v57 = vld [vmem:[%s6576_s1 + $0x728] sm:$0x7f] }
 0x6b9   :  { %v1275_v59 = vadd.f32 %v931_v57, %v587_v56  ;;  %v600_v57 = vld [vmem:[%s6575_s0 + $0x790] sm:$0x7f] }
 0x6bf   :  { %v233_v5 = vld [vmem:[%s6577_s2 + $0x6d8] sm:$0x7f] }
 0x6c0   :  { %1950 = vst.msk [vmem:[%s6578_s3 + $0x6b8] sm:$0x7f] %vm1734_vm0, %v1605_v62  ;;  %v1609_v18 = vadd.f32 %v1265_v9, %v233_v5  ;;  %v932_v62 = vld [vmem:[%s6576_s1 + $0x730] sm:$0x7f] }
 0x6c1   :  { %v1276_v0 = vadd.f32 %v932_v62, %v588_v61  ;;  %v601_v62 = vld [vmem:[%s6575_s0 + $0x798] sm:$0x7f] }
 0x6c7   :  { %v234_v10 = vld [vmem:[%s6577_s2 + $0x6e0] sm:$0x7f] }
 0x6c8   :  { %1951 = vst.msk [vmem:[%s6578_s3 + $0x6c0] sm:$0x7f] %vm1734_vm0, %v1606_v3  ;;  %v1610_v23 = vadd.f32 %v1266_v14, %v234_v10  ;;  %v933_v3 = vld [vmem:[%s6576_s1 + $0x738] sm:$0x7f] }
 0x6c9   :  { %v1277_v5 = vadd.f32 %v933_v3, %v589_v2  ;;  %v602_v3 = vld [vmem:[%s6575_s0 + $0x7a0] sm:$0x7f] }
 0x6cf   :  { %v235_v15 = vld [vmem:[%s6577_s2 + $0x6e8] sm:$0x7f] }
 0x6d0   :  { %1952 = vst.msk [vmem:[%s6578_s3 + $0x6c8] sm:$0x7f] %vm1734_vm0, %v1607_v8  ;;  %v1611_v28 = vadd.f32 %v1267_v19, %v235_v15  ;;  %v934_v8 = vld [vmem:[%s6576_s1 + $0x740] sm:$0x7f] }
 0x6d1   :  { %v1278_v10 = vadd.f32 %v934_v8, %v590_v7  ;;  %v603_v8 = vld [vmem:[%s6575_s0 + $0x7a8] sm:$0x7f] }
 0x6d7   :  { %v236_v20 = vld [vmem:[%s6577_s2 + $0x6f0] sm:$0x7f] }
 0x6d8   :  { %1953 = vst.msk [vmem:[%s6578_s3 + $0x6d0] sm:$0x7f] %vm1734_vm0, %v1608_v13  ;;  %v1612_v33 = vadd.f32 %v1268_v24, %v236_v20  ;;  %v935_v13 = vld [vmem:[%s6576_s1 + $0x748] sm:$0x7f] }
 0x6d9   :  { %v1279_v15 = vadd.f32 %v935_v13, %v591_v12  ;;  %v604_v13 = vld [vmem:[%s6575_s0 + $0x7b0] sm:$0x7f] }
 0x6df   :  { %v237_v25 = vld [vmem:[%s6577_s2 + $0x6f8] sm:$0x7f] }
 0x6e0   :  { %1954 = vst.msk [vmem:[%s6578_s3 + $0x6d8] sm:$0x7f] %vm1734_vm0, %v1609_v18  ;;  %v1613_v38 = vadd.f32 %v1269_v29, %v237_v25  ;;  %v936_v18 = vld [vmem:[%s6576_s1 + $0x750] sm:$0x7f] }
 0x6e1   :  { %v1280_v20 = vadd.f32 %v936_v18, %v592_v17  ;;  %v605_v18 = vld [vmem:[%s6575_s0 + $0x7b8] sm:$0x7f] }
 0x6e7   :  { %v238_v30 = vld [vmem:[%s6577_s2 + $0x700] sm:$0x7f] }
 0x6e8   :  { %1955 = vst.msk [vmem:[%s6578_s3 + $0x6e0] sm:$0x7f] %vm1734_vm0, %v1610_v23  ;;  %v1614_v43 = vadd.f32 %v1270_v34, %v238_v30  ;;  %v937_v23 = vld [vmem:[%s6576_s1 + $0x758] sm:$0x7f] }
 0x6e9   :  { %v1281_v25 = vadd.f32 %v937_v23, %v593_v22  ;;  %v606_v23 = vld [vmem:[%s6575_s0 + $0x7c0] sm:$0x7f] }
 0x6ef   :  { %v239_v35 = vld [vmem:[%s6577_s2 + $0x708] sm:$0x7f] }
 0x6f0   :  { %1956 = vst.msk [vmem:[%s6578_s3 + $0x6e8] sm:$0x7f] %vm1734_vm0, %v1611_v28  ;;  %v1615_v48 = vadd.f32 %v1271_v39, %v239_v35  ;;  %v938_v28 = vld [vmem:[%s6576_s1 + $0x760] sm:$0x7f] }
 0x6f1   :  { %v1282_v30 = vadd.f32 %v938_v28, %v594_v27  ;;  %v607_v28 = vld [vmem:[%s6575_s0 + $0x7c8] sm:$0x7f] }
 0x6f7   :  { %v240_v40 = vld [vmem:[%s6577_s2 + $0x710] sm:$0x7f] }
 0x6f8   :  { %1957 = vst.msk [vmem:[%s6578_s3 + $0x6f0] sm:$0x7f] %vm1734_vm0, %v1612_v33  ;;  %v1616_v53 = vadd.f32 %v1272_v44, %v240_v40  ;;  %v939_v33 = vld [vmem:[%s6576_s1 + $0x768] sm:$0x7f] }
 0x6f9   :  { %v1283_v35 = vadd.f32 %v939_v33, %v595_v32  ;;  %v608_v33 = vld [vmem:[%s6575_s0 + $0x7d0] sm:$0x7f] }
 0x6ff   :  { %v241_v45 = vld [vmem:[%s6577_s2 + $0x718] sm:$0x7f] }
 0x700   :  { %1958 = vst.msk [vmem:[%s6578_s3 + $0x6f8] sm:$0x7f] %vm1734_vm0, %v1613_v38  ;;  %v1617_v58 = vadd.f32 %v1273_v49, %v241_v45  ;;  %v940_v38 = vld [vmem:[%s6576_s1 + $0x770] sm:$0x7f] }
 0x701   :  { %v1284_v40 = vadd.f32 %v940_v38, %v596_v37  ;;  %v609_v38 = vld [vmem:[%s6575_s0 + $0x7d8] sm:$0x7f] }
 0x707   :  { %v242_v50 = vld [vmem:[%s6577_s2 + $0x720] sm:$0x7f] }
 0x708   :  { %1959 = vst.msk [vmem:[%s6578_s3 + $0x700] sm:$0x7f] %vm1734_vm0, %v1614_v43  ;;  %v1618_v63 = vadd.f32 %v1274_v54, %v242_v50  ;;  %v941_v43 = vld [vmem:[%s6576_s1 + $0x778] sm:$0x7f] }
 0x709   :  { %v1285_v45 = vadd.f32 %v941_v43, %v597_v42  ;;  %v610_v43 = vld [vmem:[%s6575_s0 + $0x7e0] sm:$0x7f] }
 0x70f   :  { %v243_v55 = vld [vmem:[%s6577_s2 + $0x728] sm:$0x7f] }
 0x710   :  { %1960 = vst.msk [vmem:[%s6578_s3 + $0x708] sm:$0x7f] %vm1734_vm0, %v1615_v48  ;;  %v1619_v4 = vadd.f32 %v1275_v59, %v243_v55  ;;  %v942_v48 = vld [vmem:[%s6576_s1 + $0x780] sm:$0x7f] }
 0x711   :  { %v1286_v50 = vadd.f32 %v942_v48, %v598_v47  ;;  %v611_v48 = vld [vmem:[%s6575_s0 + $0x7e8] sm:$0x7f] }
 0x717   :  { %v244_v60 = vld [vmem:[%s6577_s2 + $0x730] sm:$0x7f] }
 0x718   :  { %1961 = vst.msk [vmem:[%s6578_s3 + $0x710] sm:$0x7f] %vm1734_vm0, %v1616_v53  ;;  %v1620_v9 = vadd.f32 %v1276_v0, %v244_v60  ;;  %v943_v53 = vld [vmem:[%s6576_s1 + $0x788] sm:$0x7f] }
 0x719   :  { %v1287_v55 = vadd.f32 %v943_v53, %v599_v52  ;;  %v612_v53 = vld [vmem:[%s6575_s0 + $0x7f0] sm:$0x7f] }
 0x71f   :  { %v245_v1 = vld [vmem:[%s6577_s2 + $0x738] sm:$0x7f] }
 0x720   :  { %1962 = vst.msk [vmem:[%s6578_s3 + $0x718] sm:$0x7f] %vm1734_vm0, %v1617_v58  ;;  %v1621_v14 = vadd.f32 %v1277_v5, %v245_v1  ;;  %v944_v58 = vld [vmem:[%s6576_s1 + $0x790] sm:$0x7f] }
 0x721   :  { %v1288_v60 = vadd.f32 %v944_v58, %v600_v57  ;;  %v613_v58 = vld [vmem:[%s6575_s0 + $0x7f8] sm:$0x7f] }
 0x727   :  { %v246_v6 = vld [vmem:[%s6577_s2 + $0x740] sm:$0x7f] }
 0x728   :  { %1963 = vst.msk [vmem:[%s6578_s3 + $0x720] sm:$0x7f] %vm1734_vm0, %v1618_v63  ;;  %v1622_v19 = vadd.f32 %v1278_v10, %v246_v6  ;;  %v945_v63 = vld [vmem:[%s6576_s1 + $0x798] sm:$0x7f] }
 0x729   :  { %v1289_v1 = vadd.f32 %v945_v63, %v601_v62  ;;  %v614_v63 = vld [vmem:[%s6575_s0 + $0x800] sm:$0x7f] }
 0x72f   :  { %v247_v11 = vld [vmem:[%s6577_s2 + $0x748] sm:$0x7f] }
 0x730   :  { %1964 = vst.msk [vmem:[%s6578_s3 + $0x728] sm:$0x7f] %vm1734_vm0, %v1619_v4  ;;  %v1623_v24 = vadd.f32 %v1279_v15, %v247_v11  ;;  %v946_v4 = vld [vmem:[%s6576_s1 + $0x7a0] sm:$0x7f] }
 0x731   :  { %v1290_v6 = vadd.f32 %v946_v4, %v602_v3  ;;  %v615_v4 = vld [vmem:[%s6575_s0 + $0x808] sm:$0x7f] }
 0x737   :  { %v248_v16 = vld [vmem:[%s6577_s2 + $0x750] sm:$0x7f] }
 0x738   :  { %1965 = vst.msk [vmem:[%s6578_s3 + $0x730] sm:$0x7f] %vm1734_vm0, %v1620_v9  ;;  %v1624_v29 = vadd.f32 %v1280_v20, %v248_v16  ;;  %v947_v9 = vld [vmem:[%s6576_s1 + $0x7a8] sm:$0x7f] }
 0x739   :  { %v1291_v11 = vadd.f32 %v947_v9, %v603_v8  ;;  %v616_v9 = vld [vmem:[%s6575_s0 + $0x810] sm:$0x7f] }
 0x73f   :  { %v249_v21 = vld [vmem:[%s6577_s2 + $0x758] sm:$0x7f] }
 0x740   :  { %1966 = vst.msk [vmem:[%s6578_s3 + $0x738] sm:$0x7f] %vm1734_vm0, %v1621_v14  ;;  %v1625_v34 = vadd.f32 %v1281_v25, %v249_v21  ;;  %v948_v14 = vld [vmem:[%s6576_s1 + $0x7b0] sm:$0x7f] }
 0x741   :  { %v1292_v16 = vadd.f32 %v948_v14, %v604_v13  ;;  %v617_v14 = vld [vmem:[%s6575_s0 + $0x818] sm:$0x7f] }
 0x747   :  { %v250_v26 = vld [vmem:[%s6577_s2 + $0x760] sm:$0x7f] }
 0x748   :  { %1967 = vst.msk [vmem:[%s6578_s3 + $0x740] sm:$0x7f] %vm1734_vm0, %v1622_v19  ;;  %v1626_v39 = vadd.f32 %v1282_v30, %v250_v26  ;;  %v949_v19 = vld [vmem:[%s6576_s1 + $0x7b8] sm:$0x7f] }
 0x749   :  { %v1293_v21 = vadd.f32 %v949_v19, %v605_v18  ;;  %v618_v19 = vld [vmem:[%s6575_s0 + $0x820] sm:$0x7f] }
 0x74f   :  { %v251_v31 = vld [vmem:[%s6577_s2 + $0x768] sm:$0x7f] }
 0x750   :  { %1968 = vst.msk [vmem:[%s6578_s3 + $0x748] sm:$0x7f] %vm1734_vm0, %v1623_v24  ;;  %v1627_v44 = vadd.f32 %v1283_v35, %v251_v31  ;;  %v950_v24 = vld [vmem:[%s6576_s1 + $0x7c0] sm:$0x7f] }
 0x751   :  { %v1294_v26 = vadd.f32 %v950_v24, %v606_v23  ;;  %v619_v24 = vld [vmem:[%s6575_s0 + $0x828] sm:$0x7f] }
 0x757   :  { %v252_v36 = vld [vmem:[%s6577_s2 + $0x770] sm:$0x7f] }
 0x758   :  { %1969 = vst.msk [vmem:[%s6578_s3 + $0x750] sm:$0x7f] %vm1734_vm0, %v1624_v29  ;;  %v1628_v49 = vadd.f32 %v1284_v40, %v252_v36  ;;  %v951_v29 = vld [vmem:[%s6576_s1 + $0x7c8] sm:$0x7f] }
 0x759   :  { %v1295_v31 = vadd.f32 %v951_v29, %v607_v28  ;;  %v620_v29 = vld [vmem:[%s6575_s0 + $0x830] sm:$0x7f] }
 0x75f   :  { %v253_v41 = vld [vmem:[%s6577_s2 + $0x778] sm:$0x7f] }
 0x760   :  { %1970 = vst.msk [vmem:[%s6578_s3 + $0x758] sm:$0x7f] %vm1734_vm0, %v1625_v34  ;;  %v1629_v54 = vadd.f32 %v1285_v45, %v253_v41  ;;  %v952_v34 = vld [vmem:[%s6576_s1 + $0x7d0] sm:$0x7f] }
 0x761   :  { %v1296_v36 = vadd.f32 %v952_v34, %v608_v33  ;;  %v621_v34 = vld [vmem:[%s6575_s0 + $0x838] sm:$0x7f] }
 0x767   :  { %v254_v46 = vld [vmem:[%s6577_s2 + $0x780] sm:$0x7f] }
 0x768   :  { %1971 = vst.msk [vmem:[%s6578_s3 + $0x760] sm:$0x7f] %vm1734_vm0, %v1626_v39  ;;  %v1630_v59 = vadd.f32 %v1286_v50, %v254_v46  ;;  %v953_v39 = vld [vmem:[%s6576_s1 + $0x7d8] sm:$0x7f] }
 0x769   :  { %v1297_v41 = vadd.f32 %v953_v39, %v609_v38  ;;  %v622_v39 = vld [vmem:[%s6575_s0 + $0x840] sm:$0x7f] }
 0x76f   :  { %v255_v51 = vld [vmem:[%s6577_s2 + $0x788] sm:$0x7f] }
 0x770   :  { %1972 = vst.msk [vmem:[%s6578_s3 + $0x768] sm:$0x7f] %vm1734_vm0, %v1627_v44  ;;  %v1631_v0 = vadd.f32 %v1287_v55, %v255_v51  ;;  %v954_v44 = vld [vmem:[%s6576_s1 + $0x7e0] sm:$0x7f] }
 0x771   :  { %v1298_v46 = vadd.f32 %v954_v44, %v610_v43  ;;  %v623_v44 = vld [vmem:[%s6575_s0 + $0x848] sm:$0x7f] }
 0x777   :  { %v256_v56 = vld [vmem:[%s6577_s2 + $0x790] sm:$0x7f] }
 0x778   :  { %1973 = vst.msk [vmem:[%s6578_s3 + $0x770] sm:$0x7f] %vm1734_vm0, %v1628_v49  ;;  %v1632_v5 = vadd.f32 %v1288_v60, %v256_v56  ;;  %v955_v49 = vld [vmem:[%s6576_s1 + $0x7e8] sm:$0x7f] }
 0x779   :  { %v1299_v51 = vadd.f32 %v955_v49, %v611_v48  ;;  %v624_v49 = vld [vmem:[%s6575_s0 + $0x850] sm:$0x7f] }
 0x77f   :  { %v257_v61 = vld [vmem:[%s6577_s2 + $0x798] sm:$0x7f] }
 0x780   :  { %1974 = vst.msk [vmem:[%s6578_s3 + $0x778] sm:$0x7f] %vm1734_vm0, %v1629_v54  ;;  %v1633_v10 = vadd.f32 %v1289_v1, %v257_v61  ;;  %v956_v54 = vld [vmem:[%s6576_s1 + $0x7f0] sm:$0x7f] }
 0x781   :  { %v1300_v56 = vadd.f32 %v956_v54, %v612_v53  ;;  %v625_v54 = vld [vmem:[%s6575_s0 + $0x858] sm:$0x7f] }
 0x787   :  { %v258_v2 = vld [vmem:[%s6577_s2 + $0x7a0] sm:$0x7f] }
 0x788   :  { %1975 = vst.msk [vmem:[%s6578_s3 + $0x780] sm:$0x7f] %vm1734_vm0, %v1630_v59  ;;  %v1634_v15 = vadd.f32 %v1290_v6, %v258_v2  ;;  %v957_v59 = vld [vmem:[%s6576_s1 + $0x7f8] sm:$0x7f] }
 0x789   :  { %v1301_v61 = vadd.f32 %v957_v59, %v613_v58  ;;  %v626_v59 = vld [vmem:[%s6575_s0 + $0x860] sm:$0x7f] }
 0x78f   :  { %v259_v7 = vld [vmem:[%s6577_s2 + $0x7a8] sm:$0x7f] }
 0x790   :  { %1976 = vst.msk [vmem:[%s6578_s3 + $0x788] sm:$0x7f] %vm1734_vm0, %v1631_v0  ;;  %v1635_v20 = vadd.f32 %v1291_v11, %v259_v7  ;;  %v958_v0 = vld [vmem:[%s6576_s1 + $0x800] sm:$0x7f] }
 0x791   :  { %v1302_v2 = vadd.f32 %v958_v0, %v614_v63  ;;  %v627_v0 = vld [vmem:[%s6575_s0 + $0x868] sm:$0x7f] }
 0x797   :  { %v260_v12 = vld [vmem:[%s6577_s2 + $0x7b0] sm:$0x7f] }
 0x798   :  { %1977 = vst.msk [vmem:[%s6578_s3 + $0x790] sm:$0x7f] %vm1734_vm0, %v1632_v5  ;;  %v1636_v25 = vadd.f32 %v1292_v16, %v260_v12  ;;  %v959_v5 = vld [vmem:[%s6576_s1 + $0x808] sm:$0x7f] }
 0x799   :  { %v1303_v7 = vadd.f32 %v959_v5, %v615_v4  ;;  %v628_v5 = vld [vmem:[%s6575_s0 + $0x870] sm:$0x7f] }
 0x79f   :  { %v261_v17 = vld [vmem:[%s6577_s2 + $0x7b8] sm:$0x7f] }
 0x7a0   :  { %1978 = vst.msk [vmem:[%s6578_s3 + $0x798] sm:$0x7f] %vm1734_vm0, %v1633_v10  ;;  %v1637_v30 = vadd.f32 %v1293_v21, %v261_v17  ;;  %v960_v10 = vld [vmem:[%s6576_s1 + $0x810] sm:$0x7f] }
 0x7a1   :  { %v1304_v12 = vadd.f32 %v960_v10, %v616_v9  ;;  %v629_v10 = vld [vmem:[%s6575_s0 + $0x878] sm:$0x7f] }
 0x7a7   :  { %v262_v22 = vld [vmem:[%s6577_s2 + $0x7c0] sm:$0x7f] }
 0x7a8   :  { %1979 = vst.msk [vmem:[%s6578_s3 + $0x7a0] sm:$0x7f] %vm1734_vm0, %v1634_v15  ;;  %v1638_v35 = vadd.f32 %v1294_v26, %v262_v22  ;;  %v961_v15 = vld [vmem:[%s6576_s1 + $0x818] sm:$0x7f] }
 0x7a9   :  { %v1305_v17 = vadd.f32 %v961_v15, %v617_v14  ;;  %v630_v15 = vld [vmem:[%s6575_s0 + $0x880] sm:$0x7f] }
 0x7af   :  { %v263_v27 = vld [vmem:[%s6577_s2 + $0x7c8] sm:$0x7f] }
 0x7b0   :  { %1980 = vst.msk [vmem:[%s6578_s3 + $0x7a8] sm:$0x7f] %vm1734_vm0, %v1635_v20  ;;  %v1639_v40 = vadd.f32 %v1295_v31, %v263_v27  ;;  %v962_v20 = vld [vmem:[%s6576_s1 + $0x820] sm:$0x7f] }
 0x7b1   :  { %v1306_v22 = vadd.f32 %v962_v20, %v618_v19  ;;  %v631_v20 = vld [vmem:[%s6575_s0 + $0x888] sm:$0x7f] }
 0x7b7   :  { %v264_v32 = vld [vmem:[%s6577_s2 + $0x7d0] sm:$0x7f] }
 0x7b8   :  { %1981 = vst.msk [vmem:[%s6578_s3 + $0x7b0] sm:$0x7f] %vm1734_vm0, %v1636_v25  ;;  %v1640_v45 = vadd.f32 %v1296_v36, %v264_v32  ;;  %v963_v25 = vld [vmem:[%s6576_s1 + $0x828] sm:$0x7f] }
 0x7b9   :  { %v1307_v27 = vadd.f32 %v963_v25, %v619_v24  ;;  %v632_v25 = vld [vmem:[%s6575_s0 + $0x890] sm:$0x7f] }
 0x7bf   :  { %v265_v37 = vld [vmem:[%s6577_s2 + $0x7d8] sm:$0x7f] }
 0x7c0   :  { %1982 = vst.msk [vmem:[%s6578_s3 + $0x7b8] sm:$0x7f] %vm1734_vm0, %v1637_v30  ;;  %v1641_v50 = vadd.f32 %v1297_v41, %v265_v37  ;;  %v964_v30 = vld [vmem:[%s6576_s1 + $0x830] sm:$0x7f] }
 0x7c1   :  { %v1308_v32 = vadd.f32 %v964_v30, %v620_v29  ;;  %v633_v30 = vld [vmem:[%s6575_s0 + $0x898] sm:$0x7f] }
 0x7c7   :  { %v266_v42 = vld [vmem:[%s6577_s2 + $0x7e0] sm:$0x7f] }
 0x7c8   :  { %1983 = vst.msk [vmem:[%s6578_s3 + $0x7c0] sm:$0x7f] %vm1734_vm0, %v1638_v35  ;;  %v1642_v55 = vadd.f32 %v1298_v46, %v266_v42  ;;  %v965_v35 = vld [vmem:[%s6576_s1 + $0x838] sm:$0x7f] }
 0x7c9   :  { %v1309_v37 = vadd.f32 %v965_v35, %v621_v34  ;;  %v634_v35 = vld [vmem:[%s6575_s0 + $0x8a0] sm:$0x7f] }
 0x7cf   :  { %v267_v47 = vld [vmem:[%s6577_s2 + $0x7e8] sm:$0x7f] }
 0x7d0   :  { %1984 = vst.msk [vmem:[%s6578_s3 + $0x7c8] sm:$0x7f] %vm1734_vm0, %v1639_v40  ;;  %v1643_v60 = vadd.f32 %v1299_v51, %v267_v47  ;;  %v966_v40 = vld [vmem:[%s6576_s1 + $0x840] sm:$0x7f] }
 0x7d1   :  { %v1310_v42 = vadd.f32 %v966_v40, %v622_v39  ;;  %v635_v40 = vld [vmem:[%s6575_s0 + $0x8a8] sm:$0x7f] }
 0x7d7   :  { %v268_v52 = vld [vmem:[%s6577_s2 + $0x7f0] sm:$0x7f] }
 0x7d8   :  { %1985 = vst.msk [vmem:[%s6578_s3 + $0x7d0] sm:$0x7f] %vm1734_vm0, %v1640_v45  ;;  %v1644_v1 = vadd.f32 %v1300_v56, %v268_v52  ;;  %v967_v45 = vld [vmem:[%s6576_s1 + $0x848] sm:$0x7f] }
 0x7d9   :  { %v1311_v47 = vadd.f32 %v967_v45, %v623_v44  ;;  %v636_v45 = vld [vmem:[%s6575_s0 + $0x8b0] sm:$0x7f] }
 0x7df   :  { %v269_v57 = vld [vmem:[%s6577_s2 + $0x7f8] sm:$0x7f] }
 0x7e0   :  { %1986 = vst.msk [vmem:[%s6578_s3 + $0x7d8] sm:$0x7f] %vm1734_vm0, %v1641_v50  ;;  %v1645_v6 = vadd.f32 %v1301_v61, %v269_v57  ;;  %v968_v50 = vld [vmem:[%s6576_s1 + $0x850] sm:$0x7f] }
 0x7e1   :  { %v1312_v52 = vadd.f32 %v968_v50, %v624_v49  ;;  %v637_v50 = vld [vmem:[%s6575_s0 + $0x8b8] sm:$0x7f] }
 0x7e7   :  { %v270_v62 = vld [vmem:[%s6577_s2 + $0x800] sm:$0x7f] }
 0x7e8   :  { %1987 = vst.msk [vmem:[%s6578_s3 + $0x7e0] sm:$0x7f] %vm1734_vm0, %v1642_v55  ;;  %v1646_v11 = vadd.f32 %v1302_v2, %v270_v62  ;;  %v969_v55 = vld [vmem:[%s6576_s1 + $0x858] sm:$0x7f] }
 0x7e9   :  { %v1313_v57 = vadd.f32 %v969_v55, %v625_v54  ;;  %v638_v55 = vld [vmem:[%s6575_s0 + $0x8c0] sm:$0x7f] }
 0x7ef   :  { %v271_v3 = vld [vmem:[%s6577_s2 + $0x808] sm:$0x7f] }
 0x7f0   :  { %1988 = vst.msk [vmem:[%s6578_s3 + $0x7e8] sm:$0x7f] %vm1734_vm0, %v1643_v60  ;;  %v1647_v16 = vadd.f32 %v1303_v7, %v271_v3  ;;  %v970_v60 = vld [vmem:[%s6576_s1 + $0x860] sm:$0x7f] }
 0x7f1   :  { %v1314_v62 = vadd.f32 %v970_v60, %v626_v59  ;;  %v639_v60 = vld [vmem:[%s6575_s0 + $0x8c8] sm:$0x7f] }
 0x7f7   :  { %v272_v8 = vld [vmem:[%s6577_s2 + $0x810] sm:$0x7f] }
 0x7f8   :  { %1989 = vst.msk [vmem:[%s6578_s3 + $0x7f0] sm:$0x7f] %vm1734_vm0, %v1644_v1  ;;  %v1648_v21 = vadd.f32 %v1304_v12, %v272_v8  ;;  %v971_v1 = vld [vmem:[%s6576_s1 + $0x868] sm:$0x7f] }
 0x7f9   :  { %v1315_v3 = vadd.f32 %v971_v1, %v627_v0  ;;  %v640_v1 = vld [vmem:[%s6575_s0 + $0x8d0] sm:$0x7f] }
 0x7ff   :  { %v273_v13 = vld [vmem:[%s6577_s2 + $0x818] sm:$0x7f] }
 0x800   :  { %1990 = vst.msk [vmem:[%s6578_s3 + $0x7f8] sm:$0x7f] %vm1734_vm0, %v1645_v6  ;;  %v1649_v26 = vadd.f32 %v1305_v17, %v273_v13  ;;  %v972_v6 = vld [vmem:[%s6576_s1 + $0x870] sm:$0x7f] }
 0x801   :  { %v1316_v8 = vadd.f32 %v972_v6, %v628_v5  ;;  %v641_v6 = vld [vmem:[%s6575_s0 + $0x8d8] sm:$0x7f] }
 0x807   :  { %v274_v18 = vld [vmem:[%s6577_s2 + $0x820] sm:$0x7f] }
 0x808   :  { %1991 = vst.msk [vmem:[%s6578_s3 + $0x800] sm:$0x7f] %vm1734_vm0, %v1646_v11  ;;  %v1650_v31 = vadd.f32 %v1306_v22, %v274_v18  ;;  %v973_v11 = vld [vmem:[%s6576_s1 + $0x878] sm:$0x7f] }
 0x809   :  { %v1317_v13 = vadd.f32 %v973_v11, %v629_v10  ;;  %v642_v11 = vld [vmem:[%s6575_s0 + $0x8e0] sm:$0x7f] }
 0x80f   :  { %v275_v23 = vld [vmem:[%s6577_s2 + $0x828] sm:$0x7f] }
 0x810   :  { %1992 = vst.msk [vmem:[%s6578_s3 + $0x808] sm:$0x7f] %vm1734_vm0, %v1647_v16  ;;  %v1651_v36 = vadd.f32 %v1307_v27, %v275_v23  ;;  %v974_v16 = vld [vmem:[%s6576_s1 + $0x880] sm:$0x7f] }
 0x811   :  { %v1318_v18 = vadd.f32 %v974_v16, %v630_v15  ;;  %v643_v16 = vld [vmem:[%s6575_s0 + $0x8e8] sm:$0x7f] }
 0x817   :  { %v276_v28 = vld [vmem:[%s6577_s2 + $0x830] sm:$0x7f] }
 0x818   :  { %1993 = vst.msk [vmem:[%s6578_s3 + $0x810] sm:$0x7f] %vm1734_vm0, %v1648_v21  ;;  %v1652_v41 = vadd.f32 %v1308_v32, %v276_v28  ;;  %v975_v21 = vld [vmem:[%s6576_s1 + $0x888] sm:$0x7f] }
 0x819   :  { %v1319_v23 = vadd.f32 %v975_v21, %v631_v20  ;;  %v644_v21 = vld [vmem:[%s6575_s0 + $0x8f0] sm:$0x7f] }
 0x81f   :  { %v277_v33 = vld [vmem:[%s6577_s2 + $0x838] sm:$0x7f] }
 0x820   :  { %1994 = vst.msk [vmem:[%s6578_s3 + $0x818] sm:$0x7f] %vm1734_vm0, %v1649_v26  ;;  %v1653_v46 = vadd.f32 %v1309_v37, %v277_v33  ;;  %v976_v26 = vld [vmem:[%s6576_s1 + $0x890] sm:$0x7f] }
 0x821   :  { %v1320_v28 = vadd.f32 %v976_v26, %v632_v25  ;;  %v645_v26 = vld [vmem:[%s6575_s0 + $0x8f8] sm:$0x7f] }
 0x827   :  { %v278_v38 = vld [vmem:[%s6577_s2 + $0x840] sm:$0x7f] }
 0x828   :  { %1995 = vst.msk [vmem:[%s6578_s3 + $0x820] sm:$0x7f] %vm1734_vm0, %v1650_v31  ;;  %v1654_v51 = vadd.f32 %v1310_v42, %v278_v38  ;;  %v977_v31 = vld [vmem:[%s6576_s1 + $0x898] sm:$0x7f] }
 0x829   :  { %v1321_v33 = vadd.f32 %v977_v31, %v633_v30  ;;  %v646_v31 = vld [vmem:[%s6575_s0 + $0x900] sm:$0x7f] }
 0x82f   :  { %v279_v43 = vld [vmem:[%s6577_s2 + $0x848] sm:$0x7f] }
 0x830   :  { %1996 = vst.msk [vmem:[%s6578_s3 + $0x828] sm:$0x7f] %vm1734_vm0, %v1651_v36  ;;  %v1655_v56 = vadd.f32 %v1311_v47, %v279_v43  ;;  %v978_v36 = vld [vmem:[%s6576_s1 + $0x8a0] sm:$0x7f] }
 0x831   :  { %v1322_v38 = vadd.f32 %v978_v36, %v634_v35  ;;  %v647_v36 = vld [vmem:[%s6575_s0 + $0x908] sm:$0x7f] }
 0x837   :  { %v280_v48 = vld [vmem:[%s6577_s2 + $0x850] sm:$0x7f] }
 0x838   :  { %1997 = vst.msk [vmem:[%s6578_s3 + $0x830] sm:$0x7f] %vm1734_vm0, %v1652_v41  ;;  %v1656_v61 = vadd.f32 %v1312_v52, %v280_v48  ;;  %v979_v41 = vld [vmem:[%s6576_s1 + $0x8a8] sm:$0x7f] }
 0x839   :  { %v1323_v43 = vadd.f32 %v979_v41, %v635_v40  ;;  %v648_v41 = vld [vmem:[%s6575_s0 + $0x910] sm:$0x7f] }
 0x83f   :  { %v281_v53 = vld [vmem:[%s6577_s2 + $0x858] sm:$0x7f] }
 0x840   :  { %1998 = vst.msk [vmem:[%s6578_s3 + $0x838] sm:$0x7f] %vm1734_vm0, %v1653_v46  ;;  %v1657_v2 = vadd.f32 %v1313_v57, %v281_v53  ;;  %v980_v46 = vld [vmem:[%s6576_s1 + $0x8b0] sm:$0x7f] }
 0x841   :  { %v1324_v48 = vadd.f32 %v980_v46, %v636_v45  ;;  %v649_v46 = vld [vmem:[%s6575_s0 + $0x918] sm:$0x7f] }
 0x847   :  { %v282_v58 = vld [vmem:[%s6577_s2 + $0x860] sm:$0x7f] }
 0x848   :  { %1999 = vst.msk [vmem:[%s6578_s3 + $0x840] sm:$0x7f] %vm1734_vm0, %v1654_v51  ;;  %v1658_v7 = vadd.f32 %v1314_v62, %v282_v58  ;;  %v981_v51 = vld [vmem:[%s6576_s1 + $0x8b8] sm:$0x7f] }
 0x849   :  { %v1325_v53 = vadd.f32 %v981_v51, %v637_v50  ;;  %v650_v51 = vld [vmem:[%s6575_s0 + $0x920] sm:$0x7f] }
 0x84f   :  { %v283_v63 = vld [vmem:[%s6577_s2 + $0x868] sm:$0x7f] }
 0x850   :  { %2000 = vst.msk [vmem:[%s6578_s3 + $0x848] sm:$0x7f] %vm1734_vm0, %v1655_v56  ;;  %v1659_v12 = vadd.f32 %v1315_v3, %v283_v63  ;;  %v982_v56 = vld [vmem:[%s6576_s1 + $0x8c0] sm:$0x7f] }
 0x851   :  { %v1326_v58 = vadd.f32 %v982_v56, %v638_v55  ;;  %v651_v56 = vld [vmem:[%s6575_s0 + $0x928] sm:$0x7f] }
 0x857   :  { %v284_v4 = vld [vmem:[%s6577_s2 + $0x870] sm:$0x7f] }
 0x858   :  { %2001 = vst.msk [vmem:[%s6578_s3 + $0x850] sm:$0x7f] %vm1734_vm0, %v1656_v61  ;;  %v1660_v17 = vadd.f32 %v1316_v8, %v284_v4  ;;  %v983_v61 = vld [vmem:[%s6576_s1 + $0x8c8] sm:$0x7f] }
 0x859   :  { %v1327_v63 = vadd.f32 %v983_v61, %v639_v60  ;;  %v652_v61 = vld [vmem:[%s6575_s0 + $0x930] sm:$0x7f] }
 0x85f   :  { %v285_v9 = vld [vmem:[%s6577_s2 + $0x878] sm:$0x7f] }
 0x860   :  { %2002 = vst.msk [vmem:[%s6578_s3 + $0x858] sm:$0x7f] %vm1734_vm0, %v1657_v2  ;;  %v1661_v22 = vadd.f32 %v1317_v13, %v285_v9  ;;  %v984_v2 = vld [vmem:[%s6576_s1 + $0x8d0] sm:$0x7f] }
 0x861   :  { %v1328_v4 = vadd.f32 %v984_v2, %v640_v1  ;;  %v653_v2 = vld [vmem:[%s6575_s0 + $0x938] sm:$0x7f] }
 0x867   :  { %v286_v14 = vld [vmem:[%s6577_s2 + $0x880] sm:$0x7f] }
 0x868   :  { %2003 = vst.msk [vmem:[%s6578_s3 + $0x860] sm:$0x7f] %vm1734_vm0, %v1658_v7  ;;  %v1662_v27 = vadd.f32 %v1318_v18, %v286_v14  ;;  %v985_v7 = vld [vmem:[%s6576_s1 + $0x8d8] sm:$0x7f] }
 0x869   :  { %v1329_v9 = vadd.f32 %v985_v7, %v641_v6  ;;  %v654_v7 = vld [vmem:[%s6575_s0 + $0x940] sm:$0x7f] }
 0x86f   :  { %v287_v19 = vld [vmem:[%s6577_s2 + $0x888] sm:$0x7f] }
 0x870   :  { %2004 = vst.msk [vmem:[%s6578_s3 + $0x868] sm:$0x7f] %vm1734_vm0, %v1659_v12  ;;  %v1663_v32 = vadd.f32 %v1319_v23, %v287_v19  ;;  %v986_v12 = vld [vmem:[%s6576_s1 + $0x8e0] sm:$0x7f] }
 0x871   :  { %v1330_v14 = vadd.f32 %v986_v12, %v642_v11  ;;  %v655_v12 = vld [vmem:[%s6575_s0 + $0x948] sm:$0x7f] }
 0x877   :  { %v288_v24 = vld [vmem:[%s6577_s2 + $0x890] sm:$0x7f] }
 0x878   :  { %2005 = vst.msk [vmem:[%s6578_s3 + $0x870] sm:$0x7f] %vm1734_vm0, %v1660_v17  ;;  %v1664_v37 = vadd.f32 %v1320_v28, %v288_v24  ;;  %v987_v17 = vld [vmem:[%s6576_s1 + $0x8e8] sm:$0x7f] }
 0x879   :  { %v1331_v19 = vadd.f32 %v987_v17, %v643_v16  ;;  %v656_v17 = vld [vmem:[%s6575_s0 + $0x950] sm:$0x7f] }
 0x87f   :  { %v289_v29 = vld [vmem:[%s6577_s2 + $0x898] sm:$0x7f] }
 0x880   :  { %2006 = vst.msk [vmem:[%s6578_s3 + $0x878] sm:$0x7f] %vm1734_vm0, %v1661_v22  ;;  %v1665_v42 = vadd.f32 %v1321_v33, %v289_v29  ;;  %v988_v22 = vld [vmem:[%s6576_s1 + $0x8f0] sm:$0x7f] }
 0x881   :  { %v1332_v24 = vadd.f32 %v988_v22, %v644_v21  ;;  %v657_v22 = vld [vmem:[%s6575_s0 + $0x958] sm:$0x7f] }
 0x887   :  { %v290_v34 = vld [vmem:[%s6577_s2 + $0x8a0] sm:$0x7f] }
 0x888   :  { %2007 = vst.msk [vmem:[%s6578_s3 + $0x880] sm:$0x7f] %vm1734_vm0, %v1662_v27  ;;  %v1666_v47 = vadd.f32 %v1322_v38, %v290_v34  ;;  %v989_v27 = vld [vmem:[%s6576_s1 + $0x8f8] sm:$0x7f] }
 0x889   :  { %v1333_v29 = vadd.f32 %v989_v27, %v645_v26  ;;  %v658_v27 = vld [vmem:[%s6575_s0 + $0x960] sm:$0x7f] }
 0x88f   :  { %v291_v39 = vld [vmem:[%s6577_s2 + $0x8a8] sm:$0x7f] }
 0x890   :  { %2008 = vst.msk [vmem:[%s6578_s3 + $0x888] sm:$0x7f] %vm1734_vm0, %v1663_v32  ;;  %v1667_v52 = vadd.f32 %v1323_v43, %v291_v39  ;;  %v990_v32 = vld [vmem:[%s6576_s1 + $0x900] sm:$0x7f] }
 0x891   :  { %v1334_v34 = vadd.f32 %v990_v32, %v646_v31  ;;  %v659_v32 = vld [vmem:[%s6575_s0 + $0x968] sm:$0x7f] }
 0x897   :  { %v292_v44 = vld [vmem:[%s6577_s2 + $0x8b0] sm:$0x7f] }
 0x898   :  { %2009 = vst.msk [vmem:[%s6578_s3 + $0x890] sm:$0x7f] %vm1734_vm0, %v1664_v37  ;;  %v1668_v57 = vadd.f32 %v1324_v48, %v292_v44  ;;  %v991_v37 = vld [vmem:[%s6576_s1 + $0x908] sm:$0x7f] }
 0x899   :  { %v1335_v39 = vadd.f32 %v991_v37, %v647_v36  ;;  %v660_v37 = vld [vmem:[%s6575_s0 + $0x970] sm:$0x7f] }
 0x89f   :  { %v293_v49 = vld [vmem:[%s6577_s2 + $0x8b8] sm:$0x7f] }
 0x8a0   :  { %2010 = vst.msk [vmem:[%s6578_s3 + $0x898] sm:$0x7f] %vm1734_vm0, %v1665_v42  ;;  %v1669_v62 = vadd.f32 %v1325_v53, %v293_v49  ;;  %v992_v42 = vld [vmem:[%s6576_s1 + $0x910] sm:$0x7f] }
 0x8a1   :  { %v1336_v44 = vadd.f32 %v992_v42, %v648_v41  ;;  %v661_v42 = vld [vmem:[%s6575_s0 + $0x978] sm:$0x7f] }
 0x8a7   :  { %v294_v54 = vld [vmem:[%s6577_s2 + $0x8c0] sm:$0x7f] }
 0x8a8   :  { %2011 = vst.msk [vmem:[%s6578_s3 + $0x8a0] sm:$0x7f] %vm1734_vm0, %v1666_v47  ;;  %v1670_v3 = vadd.f32 %v1326_v58, %v294_v54  ;;  %v993_v47 = vld [vmem:[%s6576_s1 + $0x918] sm:$0x7f] }
 0x8a9   :  { %v1337_v49 = vadd.f32 %v993_v47, %v649_v46  ;;  %v662_v47 = vld [vmem:[%s6575_s0 + $0x980] sm:$0x7f] }
 0x8af   :  { %v295_v59 = vld [vmem:[%s6577_s2 + $0x8c8] sm:$0x7f] }
 0x8b0   :  { %2012 = vst.msk [vmem:[%s6578_s3 + $0x8a8] sm:$0x7f] %vm1734_vm0, %v1667_v52  ;;  %v1671_v8 = vadd.f32 %v1327_v63, %v295_v59  ;;  %v994_v52 = vld [vmem:[%s6576_s1 + $0x920] sm:$0x7f] }
 0x8b1   :  { %v1338_v54 = vadd.f32 %v994_v52, %v650_v51  ;;  %v663_v52 = vld [vmem:[%s6575_s0 + $0x988] sm:$0x7f] }
 0x8b7   :  { %v296_v0 = vld [vmem:[%s6577_s2 + $0x8d0] sm:$0x7f] }
 0x8b8   :  { %2013 = vst.msk [vmem:[%s6578_s3 + $0x8b0] sm:$0x7f] %vm1734_vm0, %v1668_v57  ;;  %v1672_v13 = vadd.f32 %v1328_v4, %v296_v0  ;;  %v995_v57 = vld [vmem:[%s6576_s1 + $0x928] sm:$0x7f] }
 0x8b9   :  { %v1339_v59 = vadd.f32 %v995_v57, %v651_v56  ;;  %v664_v57 = vld [vmem:[%s6575_s0 + $0x990] sm:$0x7f] }
 0x8bf   :  { %v297_v5 = vld [vmem:[%s6577_s2 + $0x8d8] sm:$0x7f] }
 0x8c0   :  { %2014 = vst.msk [vmem:[%s6578_s3 + $0x8b8] sm:$0x7f] %vm1734_vm0, %v1669_v62  ;;  %v1673_v18 = vadd.f32 %v1329_v9, %v297_v5  ;;  %v996_v62 = vld [vmem:[%s6576_s1 + $0x930] sm:$0x7f] }
 0x8c1   :  { %v1340_v0 = vadd.f32 %v996_v62, %v652_v61  ;;  %v665_v62 = vld [vmem:[%s6575_s0 + $0x998] sm:$0x7f] }
 0x8c7   :  { %v298_v10 = vld [vmem:[%s6577_s2 + $0x8e0] sm:$0x7f] }
 0x8c8   :  { %2015 = vst.msk [vmem:[%s6578_s3 + $0x8c0] sm:$0x7f] %vm1734_vm0, %v1670_v3  ;;  %v1674_v23 = vadd.f32 %v1330_v14, %v298_v10  ;;  %v997_v3 = vld [vmem:[%s6576_s1 + $0x938] sm:$0x7f] }
 0x8c9   :  { %v1341_v5 = vadd.f32 %v997_v3, %v653_v2  ;;  %v666_v3 = vld [vmem:[%s6575_s0 + $0x9a0] sm:$0x7f] }
 0x8cf   :  { %v299_v15 = vld [vmem:[%s6577_s2 + $0x8e8] sm:$0x7f] }
 0x8d0   :  { %2016 = vst.msk [vmem:[%s6578_s3 + $0x8c8] sm:$0x7f] %vm1734_vm0, %v1671_v8  ;;  %v1675_v28 = vadd.f32 %v1331_v19, %v299_v15  ;;  %v998_v8 = vld [vmem:[%s6576_s1 + $0x940] sm:$0x7f] }
 0x8d1   :  { %v1342_v10 = vadd.f32 %v998_v8, %v654_v7  ;;  %v667_v8 = vld [vmem:[%s6575_s0 + $0x9a8] sm:$0x7f] }
 0x8d7   :  { %v300_v20 = vld [vmem:[%s6577_s2 + $0x8f0] sm:$0x7f] }
 0x8d8   :  { %2017 = vst.msk [vmem:[%s6578_s3 + $0x8d0] sm:$0x7f] %vm1734_vm0, %v1672_v13  ;;  %v1676_v33 = vadd.f32 %v1332_v24, %v300_v20  ;;  %v999_v13 = vld [vmem:[%s6576_s1 + $0x948] sm:$0x7f] }
 0x8d9   :  { %v1343_v15 = vadd.f32 %v999_v13, %v655_v12  ;;  %v668_v13 = vld [vmem:[%s6575_s0 + $0x9b0] sm:$0x7f] }
 0x8df   :  { %v301_v25 = vld [vmem:[%s6577_s2 + $0x8f8] sm:$0x7f] }
 0x8e0   :  { %2018 = vst.msk [vmem:[%s6578_s3 + $0x8d8] sm:$0x7f] %vm1734_vm0, %v1673_v18  ;;  %v1677_v38 = vadd.f32 %v1333_v29, %v301_v25  ;;  %v1000_v18 = vld [vmem:[%s6576_s1 + $0x950] sm:$0x7f] }
 0x8e1   :  { %v1344_v20 = vadd.f32 %v1000_v18, %v656_v17  ;;  %v669_v18 = vld [vmem:[%s6575_s0 + $0x9b8] sm:$0x7f] }
 0x8e7   :  { %v302_v30 = vld [vmem:[%s6577_s2 + $0x900] sm:$0x7f] }
 0x8e8   :  { %2019 = vst.msk [vmem:[%s6578_s3 + $0x8e0] sm:$0x7f] %vm1734_vm0, %v1674_v23  ;;  %v1678_v43 = vadd.f32 %v1334_v34, %v302_v30  ;;  %v1001_v23 = vld [vmem:[%s6576_s1 + $0x958] sm:$0x7f] }
 0x8e9   :  { %v1345_v25 = vadd.f32 %v1001_v23, %v657_v22  ;;  %v670_v23 = vld [vmem:[%s6575_s0 + $0x9c0] sm:$0x7f] }
 0x8ef   :  { %v303_v35 = vld [vmem:[%s6577_s2 + $0x908] sm:$0x7f] }
 0x8f0   :  { %2020 = vst.msk [vmem:[%s6578_s3 + $0x8e8] sm:$0x7f] %vm1734_vm0, %v1675_v28  ;;  %v1679_v48 = vadd.f32 %v1335_v39, %v303_v35  ;;  %v1002_v28 = vld [vmem:[%s6576_s1 + $0x960] sm:$0x7f] }
 0x8f1   :  { %v1346_v30 = vadd.f32 %v1002_v28, %v658_v27  ;;  %v671_v28 = vld [vmem:[%s6575_s0 + $0x9c8] sm:$0x7f] }
 0x8f7   :  { %v304_v40 = vld [vmem:[%s6577_s2 + $0x910] sm:$0x7f] }
 0x8f8   :  { %2021 = vst.msk [vmem:[%s6578_s3 + $0x8f0] sm:$0x7f] %vm1734_vm0, %v1676_v33  ;;  %v1680_v53 = vadd.f32 %v1336_v44, %v304_v40  ;;  %v1003_v33 = vld [vmem:[%s6576_s1 + $0x968] sm:$0x7f] }
 0x8f9   :  { %v1347_v35 = vadd.f32 %v1003_v33, %v659_v32  ;;  %v672_v33 = vld [vmem:[%s6575_s0 + $0x9d0] sm:$0x7f] }
 0x8ff   :  { %v305_v45 = vld [vmem:[%s6577_s2 + $0x918] sm:$0x7f] }
 0x900   :  { %2022 = vst.msk [vmem:[%s6578_s3 + $0x8f8] sm:$0x7f] %vm1734_vm0, %v1677_v38  ;;  %v1681_v58 = vadd.f32 %v1337_v49, %v305_v45  ;;  %v1004_v38 = vld [vmem:[%s6576_s1 + $0x970] sm:$0x7f] }
 0x901   :  { %v1348_v40 = vadd.f32 %v1004_v38, %v660_v37  ;;  %v673_v38 = vld [vmem:[%s6575_s0 + $0x9d8] sm:$0x7f] }
 0x907   :  { %v306_v50 = vld [vmem:[%s6577_s2 + $0x920] sm:$0x7f] }
 0x908   :  { %2023 = vst.msk [vmem:[%s6578_s3 + $0x900] sm:$0x7f] %vm1734_vm0, %v1678_v43  ;;  %v1682_v63 = vadd.f32 %v1338_v54, %v306_v50  ;;  %v1005_v43 = vld [vmem:[%s6576_s1 + $0x978] sm:$0x7f] }
 0x909   :  { %v1349_v45 = vadd.f32 %v1005_v43, %v661_v42  ;;  %v674_v43 = vld [vmem:[%s6575_s0 + $0x9e0] sm:$0x7f] }
 0x90f   :  { %v307_v55 = vld [vmem:[%s6577_s2 + $0x928] sm:$0x7f] }
 0x910   :  { %2024 = vst.msk [vmem:[%s6578_s3 + $0x908] sm:$0x7f] %vm1734_vm0, %v1679_v48  ;;  %v1683_v4 = vadd.f32 %v1339_v59, %v307_v55  ;;  %v1006_v48 = vld [vmem:[%s6576_s1 + $0x980] sm:$0x7f] }
 0x911   :  { %v1350_v50 = vadd.f32 %v1006_v48, %v662_v47  ;;  %v675_v48 = vld [vmem:[%s6575_s0 + $0x9e8] sm:$0x7f] }
 0x917   :  { %v308_v60 = vld [vmem:[%s6577_s2 + $0x930] sm:$0x7f] }
 0x918   :  { %2025 = vst.msk [vmem:[%s6578_s3 + $0x910] sm:$0x7f] %vm1734_vm0, %v1680_v53  ;;  %v1684_v9 = vadd.f32 %v1340_v0, %v308_v60  ;;  %v1007_v53 = vld [vmem:[%s6576_s1 + $0x988] sm:$0x7f] }
 0x919   :  { %v1351_v55 = vadd.f32 %v1007_v53, %v663_v52  ;;  %v676_v53 = vld [vmem:[%s6575_s0 + $0x9f0] sm:$0x7f] }
 0x91f   :  { %v309_v1 = vld [vmem:[%s6577_s2 + $0x938] sm:$0x7f] }
 0x920   :  { %2026 = vst.msk [vmem:[%s6578_s3 + $0x918] sm:$0x7f] %vm1734_vm0, %v1681_v58  ;;  %v1685_v14 = vadd.f32 %v1341_v5, %v309_v1  ;;  %v1008_v58 = vld [vmem:[%s6576_s1 + $0x990] sm:$0x7f] }
 0x921   :  { %v1352_v60 = vadd.f32 %v1008_v58, %v664_v57  ;;  %v677_v58 = vld [vmem:[%s6575_s0 + $0x9f8] sm:$0x7f] }
 0x927   :  { %v310_v6 = vld [vmem:[%s6577_s2 + $0x940] sm:$0x7f] }
 0x928   :  { %2027 = vst.msk [vmem:[%s6578_s3 + $0x920] sm:$0x7f] %vm1734_vm0, %v1682_v63  ;;  %v1686_v19 = vadd.f32 %v1342_v10, %v310_v6  ;;  %v1009_v63 = vld [vmem:[%s6576_s1 + $0x998] sm:$0x7f] }
 0x929   :  { %v1353_v1 = vadd.f32 %v1009_v63, %v665_v62  ;;  %v678_v63 = vld [vmem:[%s6575_s0 + $0xa00] sm:$0x7f] }
 0x92f   :  { %v311_v11 = vld [vmem:[%s6577_s2 + $0x948] sm:$0x7f] }
 0x930   :  { %2028 = vst.msk [vmem:[%s6578_s3 + $0x928] sm:$0x7f] %vm1734_vm0, %v1683_v4  ;;  %v1687_v24 = vadd.f32 %v1343_v15, %v311_v11  ;;  %v1010_v4 = vld [vmem:[%s6576_s1 + $0x9a0] sm:$0x7f] }
 0x931   :  { %v1354_v6 = vadd.f32 %v1010_v4, %v666_v3  ;;  %v679_v4 = vld [vmem:[%s6575_s0 + $0xa08] sm:$0x7f] }
 0x937   :  { %v312_v16 = vld [vmem:[%s6577_s2 + $0x950] sm:$0x7f] }
 0x938   :  { %2029 = vst.msk [vmem:[%s6578_s3 + $0x930] sm:$0x7f] %vm1734_vm0, %v1684_v9  ;;  %v1688_v29 = vadd.f32 %v1344_v20, %v312_v16  ;;  %v1011_v9 = vld [vmem:[%s6576_s1 + $0x9a8] sm:$0x7f] }
 0x939   :  { %v1355_v11 = vadd.f32 %v1011_v9, %v667_v8  ;;  %v680_v9 = vld [vmem:[%s6575_s0 + $0xa10] sm:$0x7f] }
 0x93f   :  { %v313_v21 = vld [vmem:[%s6577_s2 + $0x958] sm:$0x7f] }
 0x940   :  { %2030 = vst.msk [vmem:[%s6578_s3 + $0x938] sm:$0x7f] %vm1734_vm0, %v1685_v14  ;;  %v1689_v34 = vadd.f32 %v1345_v25, %v313_v21  ;;  %v1012_v14 = vld [vmem:[%s6576_s1 + $0x9b0] sm:$0x7f] }
 0x941   :  { %v1356_v16 = vadd.f32 %v1012_v14, %v668_v13  ;;  %v681_v14 = vld [vmem:[%s6575_s0 + $0xa18] sm:$0x7f] }
 0x947   :  { %v314_v26 = vld [vmem:[%s6577_s2 + $0x960] sm:$0x7f] }
 0x948   :  { %2031 = vst.msk [vmem:[%s6578_s3 + $0x940] sm:$0x7f] %vm1734_vm0, %v1686_v19  ;;  %v1690_v39 = vadd.f32 %v1346_v30, %v314_v26  ;;  %v1013_v19 = vld [vmem:[%s6576_s1 + $0x9b8] sm:$0x7f] }
 0x949   :  { %v1357_v21 = vadd.f32 %v1013_v19, %v669_v18  ;;  %v682_v19 = vld [vmem:[%s6575_s0 + $0xa20] sm:$0x7f] }
 0x94f   :  { %v315_v31 = vld [vmem:[%s6577_s2 + $0x968] sm:$0x7f] }
 0x950   :  { %2032 = vst.msk [vmem:[%s6578_s3 + $0x948] sm:$0x7f] %vm1734_vm0, %v1687_v24  ;;  %v1691_v44 = vadd.f32 %v1347_v35, %v315_v31  ;;  %v1014_v24 = vld [vmem:[%s6576_s1 + $0x9c0] sm:$0x7f] }
 0x951   :  { %v1358_v26 = vadd.f32 %v1014_v24, %v670_v23  ;;  %v683_v24 = vld [vmem:[%s6575_s0 + $0xa28] sm:$0x7f] }
 0x957   :  { %v316_v36 = vld [vmem:[%s6577_s2 + $0x970] sm:$0x7f] }
 0x958   :  { %2033 = vst.msk [vmem:[%s6578_s3 + $0x950] sm:$0x7f] %vm1734_vm0, %v1688_v29  ;;  %v1692_v49 = vadd.f32 %v1348_v40, %v316_v36  ;;  %v1015_v29 = vld [vmem:[%s6576_s1 + $0x9c8] sm:$0x7f] }
 0x959   :  { %v1359_v31 = vadd.f32 %v1015_v29, %v671_v28  ;;  %v684_v29 = vld [vmem:[%s6575_s0 + $0xa30] sm:$0x7f] }
 0x95f   :  { %v317_v41 = vld [vmem:[%s6577_s2 + $0x978] sm:$0x7f] }
 0x960   :  { %2034 = vst.msk [vmem:[%s6578_s3 + $0x958] sm:$0x7f] %vm1734_vm0, %v1689_v34  ;;  %v1693_v54 = vadd.f32 %v1349_v45, %v317_v41  ;;  %v1016_v34 = vld [vmem:[%s6576_s1 + $0x9d0] sm:$0x7f] }
 0x961   :  { %v1360_v36 = vadd.f32 %v1016_v34, %v672_v33  ;;  %v685_v34 = vld [vmem:[%s6575_s0 + $0xa38] sm:$0x7f] }
 0x967   :  { %v318_v46 = vld [vmem:[%s6577_s2 + $0x980] sm:$0x7f] }
 0x968   :  { %2035 = vst.msk [vmem:[%s6578_s3 + $0x960] sm:$0x7f] %vm1734_vm0, %v1690_v39  ;;  %v1694_v59 = vadd.f32 %v1350_v50, %v318_v46  ;;  %v1017_v39 = vld [vmem:[%s6576_s1 + $0x9d8] sm:$0x7f] }
 0x969   :  { %v1361_v41 = vadd.f32 %v1017_v39, %v673_v38  ;;  %v686_v39 = vld [vmem:[%s6575_s0 + $0xa40] sm:$0x7f] }
 0x96f   :  { %v319_v51 = vld [vmem:[%s6577_s2 + $0x988] sm:$0x7f] }
 0x970   :  { %2036 = vst.msk [vmem:[%s6578_s3 + $0x968] sm:$0x7f] %vm1734_vm0, %v1691_v44  ;;  %v1695_v0 = vadd.f32 %v1351_v55, %v319_v51  ;;  %v1018_v44 = vld [vmem:[%s6576_s1 + $0x9e0] sm:$0x7f] }
 0x971   :  { %v1362_v46 = vadd.f32 %v1018_v44, %v674_v43  ;;  %v687_v44 = vld [vmem:[%s6575_s0 + $0xa48] sm:$0x7f] }
 0x977   :  { %v320_v56 = vld [vmem:[%s6577_s2 + $0x990] sm:$0x7f] }
 0x978   :  { %2037 = vst.msk [vmem:[%s6578_s3 + $0x970] sm:$0x7f] %vm1734_vm0, %v1692_v49  ;;  %v1696_v5 = vadd.f32 %v1352_v60, %v320_v56  ;;  %v1019_v49 = vld [vmem:[%s6576_s1 + $0x9e8] sm:$0x7f] }
 0x979   :  { %v1363_v51 = vadd.f32 %v1019_v49, %v675_v48  ;;  %v688_v49 = vld [vmem:[%s6575_s0 + $0xa50] sm:$0x7f] }
 0x97f   :  { %v321_v61 = vld [vmem:[%s6577_s2 + $0x998] sm:$0x7f] }
 0x980   :  { %2038 = vst.msk [vmem:[%s6578_s3 + $0x978] sm:$0x7f] %vm1734_vm0, %v1693_v54  ;;  %v1697_v10 = vadd.f32 %v1353_v1, %v321_v61  ;;  %v1020_v54 = vld [vmem:[%s6576_s1 + $0x9f0] sm:$0x7f] }
 0x981   :  { %v1364_v56 = vadd.f32 %v1020_v54, %v676_v53  ;;  %v689_v54 = vld [vmem:[%s6575_s0 + $0xa58] sm:$0x7f] }
 0x987   :  { %v322_v2 = vld [vmem:[%s6577_s2 + $0x9a0] sm:$0x7f] }
 0x988   :  { %2039 = vst.msk [vmem:[%s6578_s3 + $0x980] sm:$0x7f] %vm1734_vm0, %v1694_v59  ;;  %v1698_v15 = vadd.f32 %v1354_v6, %v322_v2  ;;  %v1021_v59 = vld [vmem:[%s6576_s1 + $0x9f8] sm:$0x7f] }
 0x989   :  { %v1365_v61 = vadd.f32 %v1021_v59, %v677_v58  ;;  %v690_v59 = vld [vmem:[%s6575_s0 + $0xa60] sm:$0x7f] }
 0x98f   :  { %v323_v7 = vld [vmem:[%s6577_s2 + $0x9a8] sm:$0x7f] }
 0x990   :  { %2040 = vst.msk [vmem:[%s6578_s3 + $0x988] sm:$0x7f] %vm1734_vm0, %v1695_v0  ;;  %v1699_v20 = vadd.f32 %v1355_v11, %v323_v7  ;;  %v1022_v0 = vld [vmem:[%s6576_s1 + $0xa00] sm:$0x7f] }
 0x991   :  { %v1366_v2 = vadd.f32 %v1022_v0, %v678_v63  ;;  %v691_v0 = vld [vmem:[%s6575_s0 + $0xa68] sm:$0x7f] }
 0x997   :  { %v324_v12 = vld [vmem:[%s6577_s2 + $0x9b0] sm:$0x7f] }
 0x998   :  { %2041 = vst.msk [vmem:[%s6578_s3 + $0x990] sm:$0x7f] %vm1734_vm0, %v1696_v5  ;;  %v1700_v25 = vadd.f32 %v1356_v16, %v324_v12  ;;  %v1023_v5 = vld [vmem:[%s6576_s1 + $0xa08] sm:$0x7f] }
 0x999   :  { %v1367_v7 = vadd.f32 %v1023_v5, %v679_v4  ;;  %v692_v5 = vld [vmem:[%s6575_s0 + $0xa70] sm:$0x7f] }
 0x99f   :  { %v325_v17 = vld [vmem:[%s6577_s2 + $0x9b8] sm:$0x7f] }
 0x9a0   :  { %2042 = vst.msk [vmem:[%s6578_s3 + $0x998] sm:$0x7f] %vm1734_vm0, %v1697_v10  ;;  %v1701_v30 = vadd.f32 %v1357_v21, %v325_v17  ;;  %v1024_v10 = vld [vmem:[%s6576_s1 + $0xa10] sm:$0x7f] }
 0x9a1   :  { %v1368_v12 = vadd.f32 %v1024_v10, %v680_v9  ;;  %v693_v10 = vld [vmem:[%s6575_s0 + $0xa78] sm:$0x7f] }
 0x9a7   :  { %v326_v22 = vld [vmem:[%s6577_s2 + $0x9c0] sm:$0x7f] }
 0x9a8   :  { %2043 = vst.msk [vmem:[%s6578_s3 + $0x9a0] sm:$0x7f] %vm1734_vm0, %v1698_v15  ;;  %v1702_v35 = vadd.f32 %v1358_v26, %v326_v22  ;;  %v1025_v15 = vld [vmem:[%s6576_s1 + $0xa18] sm:$0x7f] }
 0x9a9   :  { %v1369_v17 = vadd.f32 %v1025_v15, %v681_v14  ;;  %v694_v15 = vld [vmem:[%s6575_s0 + $0xa80] sm:$0x7f] }
 0x9af   :  { %v327_v27 = vld [vmem:[%s6577_s2 + $0x9c8] sm:$0x7f] }
 0x9b0   :  { %2044 = vst.msk [vmem:[%s6578_s3 + $0x9a8] sm:$0x7f] %vm1734_vm0, %v1699_v20  ;;  %v1703_v40 = vadd.f32 %v1359_v31, %v327_v27  ;;  %v1026_v20 = vld [vmem:[%s6576_s1 + $0xa20] sm:$0x7f] }
 0x9b1   :  { %v1370_v22 = vadd.f32 %v1026_v20, %v682_v19  ;;  %v695_v20 = vld [vmem:[%s6575_s0 + $0xa88] sm:$0x7f] }
 0x9b7   :  { %v328_v32 = vld [vmem:[%s6577_s2 + $0x9d0] sm:$0x7f] }
 0x9b8   :  { %2045 = vst.msk [vmem:[%s6578_s3 + $0x9b0] sm:$0x7f] %vm1734_vm0, %v1700_v25  ;;  %v1704_v45 = vadd.f32 %v1360_v36, %v328_v32  ;;  %v1027_v25 = vld [vmem:[%s6576_s1 + $0xa28] sm:$0x7f] }
 0x9b9   :  { %v1371_v27 = vadd.f32 %v1027_v25, %v683_v24  ;;  %v696_v25 = vld [vmem:[%s6575_s0 + $0xa90] sm:$0x7f] }
 0x9bf   :  { %v329_v37 = vld [vmem:[%s6577_s2 + $0x9d8] sm:$0x7f] }
 0x9c0   :  { %2046 = vst.msk [vmem:[%s6578_s3 + $0x9b8] sm:$0x7f] %vm1734_vm0, %v1701_v30  ;;  %v1705_v50 = vadd.f32 %v1361_v41, %v329_v37  ;;  %v1028_v30 = vld [vmem:[%s6576_s1 + $0xa30] sm:$0x7f] }
 0x9c1   :  { %v1372_v32 = vadd.f32 %v1028_v30, %v684_v29  ;;  %v697_v30 = vld [vmem:[%s6575_s0 + $0xa98] sm:$0x7f] }
 0x9c7   :  { %v330_v42 = vld [vmem:[%s6577_s2 + $0x9e0] sm:$0x7f] }
 0x9c8   :  { %2047 = vst.msk [vmem:[%s6578_s3 + $0x9c0] sm:$0x7f] %vm1734_vm0, %v1702_v35  ;;  %v1706_v55 = vadd.f32 %v1362_v46, %v330_v42  ;;  %v1029_v35 = vld [vmem:[%s6576_s1 + $0xa38] sm:$0x7f] }
 0x9c9   :  { %v1373_v37 = vadd.f32 %v1029_v35, %v685_v34  ;;  %v698_v35 = vld [vmem:[%s6575_s0 + $0xaa0] sm:$0x7f] }
 0x9cf   :  { %v331_v47 = vld [vmem:[%s6577_s2 + $0x9e8] sm:$0x7f] }
 0x9d0   :  { %2048 = vst.msk [vmem:[%s6578_s3 + $0x9c8] sm:$0x7f] %vm1734_vm0, %v1703_v40  ;;  %v1707_v60 = vadd.f32 %v1363_v51, %v331_v47  ;;  %v1030_v40 = vld [vmem:[%s6576_s1 + $0xa40] sm:$0x7f] }
 0x9d1   :  { %v1374_v42 = vadd.f32 %v1030_v40, %v686_v39  ;;  %v699_v40 = vld [vmem:[%s6575_s0 + $0xaa8] sm:$0x7f] }
 0x9d7   :  { %v332_v52 = vld [vmem:[%s6577_s2 + $0x9f0] sm:$0x7f] }
 0x9d8   :  { %2049 = vst.msk [vmem:[%s6578_s3 + $0x9d0] sm:$0x7f] %vm1734_vm0, %v1704_v45  ;;  %v1708_v1 = vadd.f32 %v1364_v56, %v332_v52  ;;  %v1031_v45 = vld [vmem:[%s6576_s1 + $0xa48] sm:$0x7f] }
 0x9d9   :  { %v1375_v47 = vadd.f32 %v1031_v45, %v687_v44  ;;  %v700_v45 = vld [vmem:[%s6575_s0 + $0xab0] sm:$0x7f] }
 0x9df   :  { %v333_v57 = vld [vmem:[%s6577_s2 + $0x9f8] sm:$0x7f] }
 0x9e0   :  { %2050 = vst.msk [vmem:[%s6578_s3 + $0x9d8] sm:$0x7f] %vm1734_vm0, %v1705_v50  ;;  %v1709_v6 = vadd.f32 %v1365_v61, %v333_v57  ;;  %v1032_v50 = vld [vmem:[%s6576_s1 + $0xa50] sm:$0x7f] }
 0x9e1   :  { %v1376_v52 = vadd.f32 %v1032_v50, %v688_v49  ;;  %v701_v50 = vld [vmem:[%s6575_s0 + $0xab8] sm:$0x7f] }
 0x9e7   :  { %v334_v62 = vld [vmem:[%s6577_s2 + $0xa00] sm:$0x7f] }
 0x9e8   :  { %2051 = vst.msk [vmem:[%s6578_s3 + $0x9e0] sm:$0x7f] %vm1734_vm0, %v1706_v55  ;;  %v1710_v11 = vadd.f32 %v1366_v2, %v334_v62  ;;  %v1033_v55 = vld [vmem:[%s6576_s1 + $0xa58] sm:$0x7f] }
 0x9e9   :  { %v1377_v57 = vadd.f32 %v1033_v55, %v689_v54 }
 0x9ef   :  { %v335_v3 = vld [vmem:[%s6577_s2 + $0xa08] sm:$0x7f] }
 0x9f0   :  { %2052 = vst.msk [vmem:[%s6578_s3 + $0x9e8] sm:$0x7f] %vm1734_vm0, %v1707_v60  ;;  %v1711_v16 = vadd.f32 %v1367_v7, %v335_v3  ;;  %v1034_v60 = vld [vmem:[%s6576_s1 + $0xa60] sm:$0x7f] }
 0x9f1   :  { %v1378_v62 = vadd.f32 %v1034_v60, %v690_v59 }
 0x9f7   :  { %v336_v8 = vld [vmem:[%s6577_s2 + $0xa10] sm:$0x7f] }
 0x9f8   :  { %2053 = vst.msk [vmem:[%s6578_s3 + $0x9f0] sm:$0x7f] %vm1734_vm0, %v1708_v1  ;;  %v1712_v21 = vadd.f32 %v1368_v12, %v336_v8  ;;  %v1035_v1 = vld [vmem:[%s6576_s1 + $0xa68] sm:$0x7f] }
 0x9f9   :  { %v1379_v3 = vadd.f32 %v1035_v1, %v691_v0 }
 0x9ff   :  { %v337_v13 = vld [vmem:[%s6577_s2 + $0xa18] sm:$0x7f] }
 0xa00   :  { %2054 = vst.msk [vmem:[%s6578_s3 + $0x9f8] sm:$0x7f] %vm1734_vm0, %v1709_v6  ;;  %v1713_v26 = vadd.f32 %v1369_v17, %v337_v13  ;;  %v1036_v6 = vld [vmem:[%s6576_s1 + $0xa70] sm:$0x7f] }
 0xa01   :  { %v1380_v8 = vadd.f32 %v1036_v6, %v692_v5 }
 0xa07   :  { %v338_v18 = vld [vmem:[%s6577_s2 + $0xa20] sm:$0x7f] }
 0xa08   :  { %2055 = vst.msk [vmem:[%s6578_s3 + $0xa00] sm:$0x7f] %vm1734_vm0, %v1710_v11  ;;  %v1714_v31 = vadd.f32 %v1370_v22, %v338_v18  ;;  %v1037_v11 = vld [vmem:[%s6576_s1 + $0xa78] sm:$0x7f] }
 0xa09   :  { %v1381_v13 = vadd.f32 %v1037_v11, %v693_v10 }
 0xa0f   :  { %v339_v23 = vld [vmem:[%s6577_s2 + $0xa28] sm:$0x7f] }
 0xa10   :  { %2056 = vst.msk [vmem:[%s6578_s3 + $0xa08] sm:$0x7f] %vm1734_vm0, %v1711_v16  ;;  %v1715_v36 = vadd.f32 %v1371_v27, %v339_v23  ;;  %v1038_v16 = vld [vmem:[%s6576_s1 + $0xa80] sm:$0x7f] }
 0xa11   :  { %v1382_v18 = vadd.f32 %v1038_v16, %v694_v15 }
 0xa17   :  { %v340_v28 = vld [vmem:[%s6577_s2 + $0xa30] sm:$0x7f] }
 0xa18   :  { %2057 = vst.msk [vmem:[%s6578_s3 + $0xa10] sm:$0x7f] %vm1734_vm0, %v1712_v21  ;;  %v1716_v41 = vadd.f32 %v1372_v32, %v340_v28  ;;  %v1039_v21 = vld [vmem:[%s6576_s1 + $0xa88] sm:$0x7f] }
 0xa19   :  { %v1383_v23 = vadd.f32 %v1039_v21, %v695_v20 }
 0xa1f   :  { %v341_v33 = vld [vmem:[%s6577_s2 + $0xa38] sm:$0x7f] }
 0xa20   :  { %2058 = vst.msk [vmem:[%s6578_s3 + $0xa18] sm:$0x7f] %vm1734_vm0, %v1713_v26  ;;  %v1717_v46 = vadd.f32 %v1373_v37, %v341_v33  ;;  %v1040_v26 = vld [vmem:[%s6576_s1 + $0xa90] sm:$0x7f] }
 0xa21   :  { %v1384_v28 = vadd.f32 %v1040_v26, %v696_v25 }
 0xa27   :  { %v342_v38 = vld [vmem:[%s6577_s2 + $0xa40] sm:$0x7f] }
 0xa28   :  { %2059 = vst.msk [vmem:[%s6578_s3 + $0xa20] sm:$0x7f] %vm1734_vm0, %v1714_v31  ;;  %v1718_v51 = vadd.f32 %v1374_v42, %v342_v38  ;;  %v1041_v31 = vld [vmem:[%s6576_s1 + $0xa98] sm:$0x7f] }
 0xa29   :  { %v1385_v33 = vadd.f32 %v1041_v31, %v697_v30 }
 0xa2f   :  { %v343_v43 = vld [vmem:[%s6577_s2 + $0xa48] sm:$0x7f] }
 0xa30   :  { %2060 = vst.msk [vmem:[%s6578_s3 + $0xa28] sm:$0x7f] %vm1734_vm0, %v1715_v36  ;;  %v1719_v56 = vadd.f32 %v1375_v47, %v343_v43  ;;  %v1042_v36 = vld [vmem:[%s6576_s1 + $0xaa0] sm:$0x7f] }
 0xa31   :  { %v1386_v38 = vadd.f32 %v1042_v36, %v698_v35 }
 0xa37   :  { %v344_v48 = vld [vmem:[%s6577_s2 + $0xa50] sm:$0x7f] }
 0xa38   :  { %2061 = vst.msk [vmem:[%s6578_s3 + $0xa30] sm:$0x7f] %vm1734_vm0, %v1716_v41  ;;  %v1720_v61 = vadd.f32 %v1376_v52, %v344_v48  ;;  %v1043_v41 = vld [vmem:[%s6576_s1 + $0xaa8] sm:$0x7f] }
 0xa39   :  { %v1387_v43 = vadd.f32 %v1043_v41, %v699_v40 }
 0xa3f   :  { %v345_v53 = vld [vmem:[%s6577_s2 + $0xa58] sm:$0x7f] }
 0xa40   :  { %2062 = vst.msk [vmem:[%s6578_s3 + $0xa38] sm:$0x7f] %vm1734_vm0, %v1717_v46  ;;  %v1721_v2 = vadd.f32 %v1377_v57, %v345_v53  ;;  %v1044_v46 = vld [vmem:[%s6576_s1 + $0xab0] sm:$0x7f] }
 0xa41   :  { %v1388_v48 = vadd.f32 %v1044_v46, %v700_v45 }
 0xa47   :  { %v346_v58 = vld [vmem:[%s6577_s2 + $0xa60] sm:$0x7f] }
 0xa48   :  { %2063 = vst.msk [vmem:[%s6578_s3 + $0xa40] sm:$0x7f] %vm1734_vm0, %v1718_v51  ;;  %v1722_v7 = vadd.f32 %v1378_v62, %v346_v58  ;;  %v1045_v51 = vld [vmem:[%s6576_s1 + $0xab8] sm:$0x7f] }
 0xa49   :  { %v1389_v53 = vadd.f32 %v1045_v51, %v701_v50 }
 0xa4f   :  { %v347_v63 = vld [vmem:[%s6577_s2 + $0xa68] sm:$0x7f] }
 0xa50   :  { %2064 = vst.msk [vmem:[%s6578_s3 + $0xa48] sm:$0x7f] %vm1734_vm0, %v1719_v56  ;;  %v1723_v12 = vadd.f32 %v1379_v3, %v347_v63 }
 0xa57   :  { %v348_v4 = vld [vmem:[%s6577_s2 + $0xa70] sm:$0x7f] }
 0xa58   :  { %2065 = vst.msk [vmem:[%s6578_s3 + $0xa50] sm:$0x7f] %vm1734_vm0, %v1720_v61  ;;  %v1724_v17 = vadd.f32 %v1380_v8, %v348_v4 }
 0xa5f   :  { %v349_v9 = vld [vmem:[%s6577_s2 + $0xa78] sm:$0x7f] }
 0xa60   :  { %2066 = vst.msk [vmem:[%s6578_s3 + $0xa58] sm:$0x7f] %vm1734_vm0, %v1721_v2  ;;  %v1725_v22 = vadd.f32 %v1381_v13, %v349_v9 }
 0xa67   :  { %v350_v14 = vld [vmem:[%s6577_s2 + $0xa80] sm:$0x7f] }
 0xa68   :  { %2067 = vst.msk [vmem:[%s6578_s3 + $0xa60] sm:$0x7f] %vm1734_vm0, %v1722_v7  ;;  %v1726_v27 = vadd.f32 %v1382_v18, %v350_v14 }
 0xa6f   :  { %v351_v19 = vld [vmem:[%s6577_s2 + $0xa88] sm:$0x7f] }
 0xa70   :  { %2068 = vst.msk [vmem:[%s6578_s3 + $0xa68] sm:$0x7f] %vm1734_vm0, %v1723_v12  ;;  %v1727_v32 = vadd.f32 %v1383_v23, %v351_v19 }
 0xa77   :  { %v352_v24 = vld [vmem:[%s6577_s2 + $0xa90] sm:$0x7f] }
 0xa78   :  { %2069 = vst.msk [vmem:[%s6578_s3 + $0xa70] sm:$0x7f] %vm1734_vm0, %v1724_v17  ;;  %v1728_v37 = vadd.f32 %v1384_v28, %v352_v24 }
 0xa7f   :  { %v353_v29 = vld [vmem:[%s6577_s2 + $0xa98] sm:$0x7f] }
 0xa80   :  { %2070 = vst.msk [vmem:[%s6578_s3 + $0xa78] sm:$0x7f] %vm1734_vm0, %v1725_v22  ;;  %v1729_v42 = vadd.f32 %v1385_v33, %v353_v29 }
 0xa87   :  { %v354_v34 = vld [vmem:[%s6577_s2 + $0xaa0] sm:$0x7f] }
 0xa88   :  { %2071 = vst.msk [vmem:[%s6578_s3 + $0xa80] sm:$0x7f] %vm1734_vm0, %v1726_v27  ;;  %v1730_v47 = vadd.f32 %v1386_v38, %v354_v34 }
 0xa8f   :  { %v355_v39 = vld [vmem:[%s6577_s2 + $0xaa8] sm:$0x7f] }
 0xa90   :  { %2072 = vst.msk [vmem:[%s6578_s3 + $0xa88] sm:$0x7f] %vm1734_vm0, %v1727_v32  ;;  %v1731_v52 = vadd.f32 %v1387_v43, %v355_v39 }
 0xa97   :  { %v356_v44 = vld [vmem:[%s6577_s2 + $0xab0] sm:$0x7f] }
 0xa98   :  { %2073 = vst.msk [vmem:[%s6578_s3 + $0xa90] sm:$0x7f] %vm1734_vm0, %v1728_v37  ;;  %v1732_v54 = vadd.f32 %v1388_v48, %v356_v44 }
 0xa9f   :  { %v357_v49 = vld [vmem:[%s6577_s2 + $0xab8] sm:$0x7f] }
 0xaa0   :  { %2074 = vst.msk [vmem:[%s6578_s3 + $0xa98] sm:$0x7f] %vm1734_vm0, %v1729_v42  ;;  %2075 = vst.msk [vmem:[%s6578_s3 + $0xaa0] sm:$0x7f] %vm1734_vm0, %v1730_v47  ;;  %v1733_v55 = vadd.f32 %v1389_v53, %v357_v49 }
 0xaa1   :  { %2076 = vst.msk [vmem:[%s6578_s3 + $0xaa8] sm:$0x7f] %vm1734_vm0, %v1731_v52  ;;  %2077 = vst.msk [vmem:[%s6578_s3 + $0xab0] sm:$0x7f] %vm1734_vm0, %v1732_v54 }
 0xaa2   :  { %2078 = vst.msk [vmem:[%s6578_s3 + $0xab8] sm:$0x7f] %vm1734_vm0, %v1733_v55 }

</bundles_post_ra>
